<compile_context>
chip_gen: v5e
topology: v5e:2x2
jax: 0.10.0
libtpu: 0.0.40
codegen_flags: <defaults>
</compile_context>

<pallas_src>
import functools

import jax
import jax.numpy as jnp
from jax.experimental import pallas as pl
from jax.experimental.pallas import tpu as pltpu


def sampling_generator(N, reverse=False):
    samplings = [False, True] * (N // 2)
    if reverse:
        return list(reversed(samplings[:N]))
    return samplings[:N]


def _round_up(x, m):
    return (x + m - 1) // m * m


def _vmem_cap_bytes():
    """Generation-aware scoped-VMEM ceiling (leave ~25% headroom for compiler scratch)."""
    phys = 128 << 20
    try:
        get_info = getattr(pltpu, "get_tpu_info", None)
        if get_info is not None:
            phys = int(getattr(get_info(), "vmem_capacity_bytes", phys))
    except Exception:
        pass
    # ~48 MiB on v7x (64 MiB physical), ~96-100 MiB on v5e/v6e (128 MiB physical).
    return int(min(phys * 3 // 4, 100 << 20))


# ---------------------------------------------------------------------------
# Pallas kernel: fused per-tap conv + bias + GroupNorm(2) + SiLU
# ---------------------------------------------------------------------------
def _convsc_kernel(x_ref, w_ref, p_ref, o_ref, *, k, stride, h_out, w_out, c_out):
    # x_ref: (stride*stride, Hq, Wq, C_in)  bf16 phase-split zero-padded input (one image)
    # w_ref: (k*k, C_in, C_out)             bf16 per-tap weights (no channel padding)
    # p_ref: (3, C_out)                     f32  [bias; gamma; beta]
    # o_ref: (P, C_out)                     bf16 with P = h_out * w_out
    P = h_out * w_out

    # --- conv as k*k shifted-view matmuls, f32 accumulation on the MXU ----------------
    # TODO(synk): for larger C_in / v5e, lane-concatenate the taps into one (P, k*k*C_in)
    #             bf16 operand and do a single big-K matmul to fill the MXU contraction
    #             depth and drop the epilogue adds.
    acc = None
    for kh in range(k):
        for kw in range(k):
            pi = (kh % stride) * stride + (kw % stride)        # phase index
            r0 = kh // stride
            c0 = kw // stride
            xt = x_ref[pi, r0:r0 + h_out, c0:c0 + w_out, :]     # (h_out, w_out, C_in) bf16
            xt = xt.reshape(P, xt.shape[-1])
            d = jnp.dot(xt, w_ref[kh * k + kw], preferred_element_type=jnp.float32)
            acc = d if acc is None else acc + d

    bias = p_ref[0:1, :]
    gamma = p_ref[1:2, :]
    beta = p_ref[2:3, :]
    y = acc + bias                                              # (P, C_out) f32

    # --- GroupNorm(2 groups): reduce over P (sublanes) first, then tiny (1, C) masked sums
    s1 = jnp.sum(y, axis=0, keepdims=True)                      # (1, C_out)
    s2 = jnp.sum(y * y, axis=0, keepdims=True)                  # (1, C_out)
    cg = c_out // 2
    col = jax.lax.broadcasted_iota(jnp.int32, (1, c_out), 1)
    g0 = (col < cg).astype(jnp.float32)
    g1 = 1.0 - g0
    n_per = jnp.float32(P * cg)
    mean0 = jnp.sum(s1 * g0) / n_per
    mean1 = jnp.sum(s1 * g1) / n_per
    var0 = jnp.sum(s2 * g0) / n_per - mean0 * mean0
    var1 = jnp.sum(s2 * g1) / n_per - mean1 * mean1
    inv0 = jax.lax.rsqrt(var0 + 1e-5)
    inv1 = jax.lax.rsqrt(var1 + 1e-5)
    mean_c = g0 * mean0 + g1 * mean1                            # (1, C_out)
    scale = (g0 * inv0 + g1 * inv1) * gamma
    shift = beta - mean_c * scale
    yn = y * scale + shift
    o_ref[...] = (yn * jax.nn.sigmoid(yn)).astype(o_ref.dtype)  # SiLU, bf16 writeback


def convsc_pallas(x_nhwc, w_hwio, b, gamma, beta, stride):
    """One ConvSC layer: Conv2d(k, stride, pad=(k-stride+1)//2) + GroupNorm(2) + SiLU."""
    N, H, W, c_in = x_nhwc.shape
    k = w_hwio.shape[0]
    c_out = w_hwio.shape[-1]
    assert c_out % 2 == 0, "GroupNorm(2) requires an even number of output channels"
    pad = (k - stride + 1) // 2
    h_out = (H + 2 * pad - k) // stride + 1
    w_out = (W + 2 * pad - k) // stride + 1
    P = h_out * w_out

    # Zero-pad spatially (+ extend to a multiple of stride) and space-to-depth split into
    # stride*stride phases so every conv tap is a *contiguous* in-kernel slice.  The pad and
    # the (no-op for bf16 layer inputs) cast fuse into one pass; only stride-2 layers pay the
    # phase-split transpose pass.
    hp, wp = H + 2 * pad, W + 2 * pad
    eh, ew = (-hp) % stride, (-wp) % stride
    xp = jnp.pad(x_nhwc.astype(jnp.bfloat16),
                 ((0, 0), (pad, pad + eh), (pad, pad + ew), (0, 0)))
    hq, wq = (hp + eh) // stride, (wp + ew) // stride
    phases = xp.reshape(N, hq, stride, wq, stride, c_in)
    phases = phases.transpose(0, 2, 4, 1, 3, 5).reshape(N, stride * stride, hq, wq, c_in)

    # Per-tap weights (no channel padding) + bias/gamma/beta packed as one small operand.
    w_taps = w_hwio.reshape(k * k, c_in, c_out).astype(jnp.bfloat16)
    params = jnp.stack([b, gamma, beta]).astype(jnp.float32)        # (3, C_out)

    # Scoped-VMEM budget: correct (sublane, lane) padding per buffer (bf16 sublane tile = 16),
    # double buffering, plus f32 acc / tap-relayout temps; clamped to a per-generation cap.
    LANE, SUB_BF16, SUB_F32 = 128, 16, 8
    in_blk = stride * stride * hq * _round_up(wq, SUB_BF16) * _round_up(c_in, LANE) * 2
    out_blk = _round_up(P, SUB_BF16) * _round_up(c_out, LANE) * 2
    w_blk = k * k * _round_up(c_in, SUB_BF16) * _round_up(c_out, LANE) * 2
    p_blk = _round_up(3, SUB_F32) * _round_up(c_out, LANE) * 4
    tmps = (3 * _round_up(P, SUB_F32) * _round_up(c_out, LANE) * 4 +
            k * k * _round_up(P, SUB_BF16) * _round_up(c_in, LANE) * 2)
    need = 2 * (in_blk + out_blk + w_blk + p_blk) + tmps + (4 << 20)
    vmem_limit = int(min(max(need, 16 << 20), _vmem_cap_bytes()))

    out = pl.pallas_call(
        functools.partial(_convsc_kernel, k=k, stride=stride,
                          h_out=h_out, w_out=w_out, c_out=c_out),
        out_shape=jax.ShapeDtypeStruct((N, P, c_out), jnp.bfloat16),
        grid_spec=pltpu.PrefetchScalarGridSpec(
            num_scalar_prefetch=0,
            grid=(N,),
            in_specs=[
                pl.BlockSpec((None, stride * stride, hq, wq, c_in),
                             lambda n: (n, 0, 0, 0, 0)),
                pl.BlockSpec((k * k, c_in, c_out), lambda n: (0, 0, 0)),
                pl.BlockSpec((3, c_out), lambda n: (0, 0)),
            ],
            out_specs=pl.BlockSpec((None, P, c_out), lambda n: (n, 0, 0)),
        ),
        compiler_params=pltpu.CompilerParams(
            dimension_semantics=("parallel",),
            vmem_limit_bytes=vmem_limit,
        ),
    )(phases, w_taps, params)

    # Free row-major reshape; activations stay bf16 with no channel padding to strip / re-pad.
    return out.reshape(N, h_out, w_out, c_out)


# ---------------------------------------------------------------------------
# Encoder (forward semantics identical to the PyTorch module)
# ---------------------------------------------------------------------------
def init_encoder_params(key, C_in, C_hid, N_S, spatio_kernel):
    samplings = sampling_generator(N_S)
    params = []
    cin = C_in
    for s in samplings:
        key, k1, k2, k3, k4 = jax.random.split(key, 5)
        stride = 2 if s else 1
        w = 0.1 * jax.random.normal(k1, (spatio_kernel, spatio_kernel, cin, C_hid), jnp.float32)
        b = 0.05 * jax.random.normal(k2, (C_hid,), jnp.float32)
        gamma = 1.0 + 0.1 * jax.random.normal(k3, (C_hid,), jnp.float32)
        beta = 0.05 * jax.random.normal(k4, (C_hid,), jnp.float32)
        params.append((w, b, gamma, beta, stride))
        cin = C_hid
    return params


def encoder_forward(x_nchw, params):
    # NCHW (PyTorch convention) -> NHWC for the TPU kernel; bf16 activations across layers.
    h = jnp.transpose(x_nchw, (0, 2, 3, 1))
    enc1 = None
    for i, (w, b, g, bt, stride) in enumerate(params):
        h = convsc_pallas(h, w, b, g, bt, stride)
        if i == 0:
            enc1 = h
    latent = jnp.transpose(h, (0, 3, 1, 2)).astype(jnp.float32)
    enc1 = jnp.transpose(enc1, (0, 3, 1, 2)).astype(jnp.float32)
    return latent, enc1


# ---------------------------------------------------------------------------
# Pure-JAX reference (f32, for correctness check only)
# ---------------------------------------------------------------------------
def _convsc_ref(x_nhwc, w_hwio, b, gamma, beta, stride):
    k = w_hwio.shape[0]
    pad = (k - stride + 1) // 2
    y = jax.lax.conv_general_dilated(
        x_nhwc, w_hwio, window_strides=(stride, stride),
        padding=[(pad, pad), (pad, pad)],
        dimension_numbers=("NHWC", "HWIO", "NHWC"))
    y = y + b
    N, H, W, C = y.shape
    yg = y.reshape(N, H, W, 2, C // 2)
    mean = yg.mean(axis=(1, 2, 4), keepdims=True)
    var = ((yg - mean) ** 2).mean(axis=(1, 2, 4), keepdims=True)
    yn = ((yg - mean) * jax.lax.rsqrt(var + 1e-5)).reshape(N, H, W, C)
    yn = yn * gamma + beta
    return yn * jax.nn.sigmoid(yn)


def encoder_forward_ref(x_nchw, params):
    h = jnp.transpose(x_nchw, (0, 2, 3, 1)).astype(jnp.float32)
    enc1 = None
    for i, (w, b, g, bt, stride) in enumerate(params):
        h = _convsc_ref(h, w, b, g, bt, stride)
        if i == 0:
            enc1 = h
    return jnp.transpose(h, (0, 3, 1, 2)), jnp.transpose(enc1, (0, 3, 1, 2))


if __name__ == "__main__":
    # Small shapes consistent with the module: x is NCHW.
    C_in, C_hid, N_S, spatio_kernel = 4, 16, 2, 3
    B, H, W = 2, 16, 16

    key = jax.random.PRNGKey(0)
    kx, kp = jax.random.split(key)
    x = jax.random.normal(kx, (B, C_in, H, W), jnp.float32)
    params = init_encoder_params(kp, C_in, C_hid, N_S, spatio_kernel)

    latent, enc1 = jax.block_until_ready(encoder_forward(x, params))
    latent_ref, enc1_ref = jax.block_until_ready(encoder_forward_ref(x, params))

    assert latent.shape == (B, C_hid, H // 2, W // 2), latent.shape
    assert enc1.shape == (B, C_hid, H, W), enc1.shape
    # Kernel uses bf16 MXU operands / bf16 writeback with f32 accumulation & GN math;
    # reference is pure f32, so use a bf16-level tolerance.
    assert jnp.allclose(latent, latent_ref, rtol=4e-2, atol=4e-2)
    assert jnp.allclose(enc1, enc1_ref, rtol=4e-2, atol=4e-2)

    print("KERNEL_OK")
</pallas_src>

<mosaic_0001>
module attributes {stable_mosaic.version = 11 : i64} {
  func.func @_convsc_kernel(%arg0: i32, %arg1: memref<1x1x18x18x4xbf16, #tpu.memory_space<vmem>>, %arg2: memref<9x4x16xbf16, #tpu.memory_space<vmem>>, %arg3: memref<3x16xf32, #tpu.memory_space<vmem>>, %arg4: memref<1x256x16xbf16, #tpu.memory_space<vmem>>) attributes {dimension_semantics = [#tpu.dimension_semantics<parallel>], iteration_bounds = array<i64: 2>, scalar_prefetch = 0 : i64, scratch_operands = 0 : i64, tpu.core_type = #tpu.core_type<tc>, window_params = [{transform_indices = @transform_0, window_bounds = array<i64: 1, 1, 18, 18, 4>}, {pipeline_mode = #tpu.pipeline_mode<synchronous>, transform_indices = @transform_1, window_bounds = array<i64: 9, 4, 16>}, {pipeline_mode = #tpu.pipeline_mode<synchronous>, transform_indices = @transform_2, window_bounds = array<i64: 3, 16>}, {transform_indices = @transform_3, window_bounds = array<i64: 1, 256, 16>}]} {
    %c0 = arith.constant 0 : index
    %c0_0 = arith.constant 0 : index
    %c0_1 = arith.constant 0 : index
    %c0_2 = arith.constant 0 : index
    %c0_3 = arith.constant 0 : index
    %0 = vector.load %arg1[%c0, %c0_0, %c0_1, %c0_2, %c0_3] : memref<1x1x18x18x4xbf16, #tpu.memory_space<vmem>>, vector<1x1x16x16x4xbf16>
    %1 = vector.shape_cast %0 : vector<1x1x16x16x4xbf16> to vector<16x16x4xbf16>
    %2 = vector.shape_cast %1 : vector<16x16x4xbf16> to vector<256x4xbf16>
    %c0_4 = arith.constant 0 : index
    %c0_5 = arith.constant 0 : index
    %c0_6 = arith.constant 0 : index
    %3 = vector.load %arg2[%c0_4, %c0_5, %c0_6] : memref<9x4x16xbf16, #tpu.memory_space<vmem>>, vector<1x4x16xbf16>
    %4 = vector.shape_cast %3 : vector<1x4x16xbf16> to vector<4x16xbf16>
    %cst = arith.constant dense<0.000000e+00> : vector<256x16xf32>
    %5 = tpu.matmul %2, %4, %cst {dimension_numbers = #tpu.dot_dimension_numbers<[1], [0], [0], [1], [0, 0, 1, 1], [], []>} : vector<256x4xbf16>, vector<4x16xbf16>, vector<256x16xf32> -> vector<256x16xf32>
    %c0_7 = arith.constant 0 : index
    %c0_8 = arith.constant 0 : index
    %c0_9 = arith.constant 0 : index
    %c1 = arith.constant 1 : index
    %c0_10 = arith.constant 0 : index
    %6 = vector.load %arg1[%c0_7, %c0_8, %c0_9, %c1, %c0_10] : memref<1x1x18x18x4xbf16, #tpu.memory_space<vmem>>, vector<1x1x16x16x4xbf16>
    %7 = vector.shape_cast %6 : vector<1x1x16x16x4xbf16> to vector<16x16x4xbf16>
    %8 = vector.shape_cast %7 : vector<16x16x4xbf16> to vector<256x4xbf16>
    %c1_11 = arith.constant 1 : index
    %c0_12 = arith.constant 0 : index
    %c0_13 = arith.constant 0 : index
    %9 = vector.load %arg2[%c1_11, %c0_12, %c0_13] : memref<9x4x16xbf16, #tpu.memory_space<vmem>>, vector<1x4x16xbf16>
    %10 = vector.shape_cast %9 : vector<1x4x16xbf16> to vector<4x16xbf16>
    %cst_14 = arith.constant dense<0.000000e+00> : vector<256x16xf32>
    %11 = tpu.matmul %8, %10, %cst_14 {dimension_numbers = #tpu.dot_dimension_numbers<[1], [0], [0], [1], [0, 0, 1, 1], [], []>} : vector<256x4xbf16>, vector<4x16xbf16>, vector<256x16xf32> -> vector<256x16xf32>
    %12 = arith.addf %5, %11 : vector<256x16xf32>
    %c0_15 = arith.constant 0 : index
    %c0_16 = arith.constant 0 : index
    %c0_17 = arith.constant 0 : index
    %c2 = arith.constant 2 : index
    %c0_18 = arith.constant 0 : index
    %13 = vector.load %arg1[%c0_15, %c0_16, %c0_17, %c2, %c0_18] : memref<1x1x18x18x4xbf16, #tpu.memory_space<vmem>>, vector<1x1x16x16x4xbf16>
    %14 = vector.shape_cast %13 : vector<1x1x16x16x4xbf16> to vector<16x16x4xbf16>
    %15 = vector.shape_cast %14 : vector<16x16x4xbf16> to vector<256x4xbf16>
    %c2_19 = arith.constant 2 : index
    %c0_20 = arith.constant 0 : index
    %c0_21 = arith.constant 0 : index
    %16 = vector.load %arg2[%c2_19, %c0_20, %c0_21] : memref<9x4x16xbf16, #tpu.memory_space<vmem>>, vector<1x4x16xbf16>
    %17 = vector.shape_cast %16 : vector<1x4x16xbf16> to vector<4x16xbf16>
    %cst_22 = arith.constant dense<0.000000e+00> : vector<256x16xf32>
    %18 = tpu.matmul %15, %17, %cst_22 {dimension_numbers = #tpu.dot_dimension_numbers<[1], [0], [0], [1], [0, 0, 1, 1], [], []>} : vector<256x4xbf16>, vector<4x16xbf16>, vector<256x16xf32> -> vector<256x16xf32>
    %19 = arith.addf %12, %18 : vector<256x16xf32>
    %c0_23 = arith.constant 0 : index
    %c0_24 = arith.constant 0 : index
    %c1_25 = arith.constant 1 : index
    %c0_26 = arith.constant 0 : index
    %c0_27 = arith.constant 0 : index
    %20 = vector.load %arg1[%c0_23, %c0_24, %c1_25, %c0_26, %c0_27] : memref<1x1x18x18x4xbf16, #tpu.memory_space<vmem>>, vector<1x1x16x16x4xbf16>
    %21 = vector.shape_cast %20 : vector<1x1x16x16x4xbf16> to vector<16x16x4xbf16>
    %22 = vector.shape_cast %21 : vector<16x16x4xbf16> to vector<256x4xbf16>
    %c3 = arith.constant 3 : index
    %c0_28 = arith.constant 0 : index
    %c0_29 = arith.constant 0 : index
    %23 = vector.load %arg2[%c3, %c0_28, %c0_29] : memref<9x4x16xbf16, #tpu.memory_space<vmem>>, vector<1x4x16xbf16>
    %24 = vector.shape_cast %23 : vector<1x4x16xbf16> to vector<4x16xbf16>
    %cst_30 = arith.constant dense<0.000000e+00> : vector<256x16xf32>
    %25 = tpu.matmul %22, %24, %cst_30 {dimension_numbers = #tpu.dot_dimension_numbers<[1], [0], [0], [1], [0, 0, 1, 1], [], []>} : vector<256x4xbf16>, vector<4x16xbf16>, vector<256x16xf32> -> vector<256x16xf32>
    %26 = arith.addf %19, %25 : vector<256x16xf32>
    %c0_31 = arith.constant 0 : index
    %c0_32 = arith.constant 0 : index
    %c1_33 = arith.constant 1 : index
    %c1_34 = arith.constant 1 : index
    %c0_35 = arith.constant 0 : index
    %27 = vector.load %arg1[%c0_31, %c0_32, %c1_33, %c1_34, %c0_35] : memref<1x1x18x18x4xbf16, #tpu.memory_space<vmem>>, vector<1x1x16x16x4xbf16>
    %28 = vector.shape_cast %27 : vector<1x1x16x16x4xbf16> to vector<16x16x4xbf16>
    %29 = vector.shape_cast %28 : vector<16x16x4xbf16> to vector<256x4xbf16>
    %c4 = arith.constant 4 : index
    %c0_36 = arith.constant 0 : index
    %c0_37 = arith.constant 0 : index
    %30 = vector.load %arg2[%c4, %c0_36, %c0_37] : memref<9x4x16xbf16, #tpu.memory_space<vmem>>, vector<1x4x16xbf16>
    %31 = vector.shape_cast %30 : vector<1x4x16xbf16> to vector<4x16xbf16>
    %cst_38 = arith.constant dense<0.000000e+00> : vector<256x16xf32>
    %32 = tpu.matmul %29, %31, %cst_38 {dimension_numbers = #tpu.dot_dimension_numbers<[1], [0], [0], [1], [0, 0, 1, 1], [], []>} : vector<256x4xbf16>, vector<4x16xbf16>, vector<256x16xf32> -> vector<256x16xf32>
    %33 = arith.addf %26, %32 : vector<256x16xf32>
    %c0_39 = arith.constant 0 : index
    %c0_40 = arith.constant 0 : index
    %c1_41 = arith.constant 1 : index
    %c2_42 = arith.constant 2 : index
    %c0_43 = arith.constant 0 : index
    %34 = vector.load %arg1[%c0_39, %c0_40, %c1_41, %c2_42, %c0_43] : memref<1x1x18x18x4xbf16, #tpu.memory_space<vmem>>, vector<1x1x16x16x4xbf16>
    %35 = vector.shape_cast %34 : vector<1x1x16x16x4xbf16> to vector<16x16x4xbf16>
    %36 = vector.shape_cast %35 : vector<16x16x4xbf16> to vector<256x4xbf16>
    %c5 = arith.constant 5 : index
    %c0_44 = arith.constant 0 : index
    %c0_45 = arith.constant 0 : index
    %37 = vector.load %arg2[%c5, %c0_44, %c0_45] : memref<9x4x16xbf16, #tpu.memory_space<vmem>>, vector<1x4x16xbf16>
    %38 = vector.shape_cast %37 : vector<1x4x16xbf16> to vector<4x16xbf16>
    %cst_46 = arith.constant dense<0.000000e+00> : vector<256x16xf32>
    %39 = tpu.matmul %36, %38, %cst_46 {dimension_numbers = #tpu.dot_dimension_numbers<[1], [0], [0], [1], [0, 0, 1, 1], [], []>} : vector<256x4xbf16>, vector<4x16xbf16>, vector<256x16xf32> -> vector<256x16xf32>
    %40 = arith.addf %33, %39 : vector<256x16xf32>
    %c0_47 = arith.constant 0 : index
    %c0_48 = arith.constant 0 : index
    %c2_49 = arith.constant 2 : index
    %c0_50 = arith.constant 0 : index
    %c0_51 = arith.constant 0 : index
    %41 = vector.load %arg1[%c0_47, %c0_48, %c2_49, %c0_50, %c0_51] : memref<1x1x18x18x4xbf16, #tpu.memory_space<vmem>>, vector<1x1x16x16x4xbf16>
    %42 = vector.shape_cast %41 : vector<1x1x16x16x4xbf16> to vector<16x16x4xbf16>
    %43 = vector.shape_cast %42 : vector<16x16x4xbf16> to vector<256x4xbf16>
    %c6 = arith.constant 6 : index
    %c0_52 = arith.constant 0 : index
    %c0_53 = arith.constant 0 : index
    %44 = vector.load %arg2[%c6, %c0_52, %c0_53] : memref<9x4x16xbf16, #tpu.memory_space<vmem>>, vector<1x4x16xbf16>
    %45 = vector.shape_cast %44 : vector<1x4x16xbf16> to vector<4x16xbf16>
    %cst_54 = arith.constant dense<0.000000e+00> : vector<256x16xf32>
    %46 = tpu.matmul %43, %45, %cst_54 {dimension_numbers = #tpu.dot_dimension_numbers<[1], [0], [0], [1], [0, 0, 1, 1], [], []>} : vector<256x4xbf16>, vector<4x16xbf16>, vector<256x16xf32> -> vector<256x16xf32>
    %47 = arith.addf %40, %46 : vector<256x16xf32>
    %c0_55 = arith.constant 0 : index
    %c0_56 = arith.constant 0 : index
    %c2_57 = arith.constant 2 : index
    %c1_58 = arith.constant 1 : index
    %c0_59 = arith.constant 0 : index
    %48 = vector.load %arg1[%c0_55, %c0_56, %c2_57, %c1_58, %c0_59] : memref<1x1x18x18x4xbf16, #tpu.memory_space<vmem>>, vector<1x1x16x16x4xbf16>
    %49 = vector.shape_cast %48 : vector<1x1x16x16x4xbf16> to vector<16x16x4xbf16>
    %50 = vector.shape_cast %49 : vector<16x16x4xbf16> to vector<256x4xbf16>
    %c7 = arith.constant 7 : index
    %c0_60 = arith.constant 0 : index
    %c0_61 = arith.constant 0 : index
    %51 = vector.load %arg2[%c7, %c0_60, %c0_61] : memref<9x4x16xbf16, #tpu.memory_space<vmem>>, vector<1x4x16xbf16>
    %52 = vector.shape_cast %51 : vector<1x4x16xbf16> to vector<4x16xbf16>
    %cst_62 = arith.constant dense<0.000000e+00> : vector<256x16xf32>
    %53 = tpu.matmul %50, %52, %cst_62 {dimension_numbers = #tpu.dot_dimension_numbers<[1], [0], [0], [1], [0, 0, 1, 1], [], []>} : vector<256x4xbf16>, vector<4x16xbf16>, vector<256x16xf32> -> vector<256x16xf32>
    %54 = arith.addf %47, %53 : vector<256x16xf32>
    %c0_63 = arith.constant 0 : index
    %c0_64 = arith.constant 0 : index
    %c2_65 = arith.constant 2 : index
    %c2_66 = arith.constant 2 : index
    %c0_67 = arith.constant 0 : index
    %55 = vector.load %arg1[%c0_63, %c0_64, %c2_65, %c2_66, %c0_67] : memref<1x1x18x18x4xbf16, #tpu.memory_space<vmem>>, vector<1x1x16x16x4xbf16>
    %56 = vector.shape_cast %55 : vector<1x1x16x16x4xbf16> to vector<16x16x4xbf16>
    %57 = vector.shape_cast %56 : vector<16x16x4xbf16> to vector<256x4xbf16>
    %c8 = arith.constant 8 : index
    %c0_68 = arith.constant 0 : index
    %c0_69 = arith.constant 0 : index
    %58 = vector.load %arg2[%c8, %c0_68, %c0_69] : memref<9x4x16xbf16, #tpu.memory_space<vmem>>, vector<1x4x16xbf16>
    %59 = vector.shape_cast %58 : vector<1x4x16xbf16> to vector<4x16xbf16>
    %cst_70 = arith.constant dense<0.000000e+00> : vector<256x16xf32>
    %60 = tpu.matmul %57, %59, %cst_70 {dimension_numbers = #tpu.dot_dimension_numbers<[1], [0], [0], [1], [0, 0, 1, 1], [], []>} : vector<256x4xbf16>, vector<4x16xbf16>, vector<256x16xf32> -> vector<256x16xf32>
    %61 = arith.addf %54, %60 : vector<256x16xf32>
    %c0_71 = arith.constant 0 : index
    %c0_72 = arith.constant 0 : index
    %62 = vector.load %arg3[%c0_71, %c0_72] : memref<3x16xf32, #tpu.memory_space<vmem>>, vector<1x16xf32>
    %c1_73 = arith.constant 1 : index
    %c0_74 = arith.constant 0 : index
    %63 = vector.load %arg3[%c1_73, %c0_74] : memref<3x16xf32, #tpu.memory_space<vmem>>, vector<1x16xf32>
    %c2_75 = arith.constant 2 : index
    %c0_76 = arith.constant 0 : index
    %64 = vector.load %arg3[%c2_75, %c0_76] : memref<3x16xf32, #tpu.memory_space<vmem>>, vector<1x16xf32>
    %65 = vector.broadcast %62 : vector<1x16xf32> to vector<256x16xf32>
    %66 = arith.addf %61, %65 : vector<256x16xf32>
    %cst_77 = arith.constant dense<0.000000e+00> : vector<16xf32>
    %67 = vector.multi_reduction <add>, %66, %cst_77 [0] : vector<256x16xf32> to vector<16xf32>
    %68 = vector.shape_cast %67 : vector<16xf32> to vector<1x16xf32>
    %69 = arith.mulf %66, %66 : vector<256x16xf32>
    %cst_78 = arith.constant dense<0.000000e+00> : vector<16xf32>
    %70 = vector.multi_reduction <add>, %69, %cst_78 [0] : vector<256x16xf32> to vector<16xf32>
    %71 = vector.shape_cast %70 : vector<16xf32> to vector<1x16xf32>
    %72 = tpu.iota {dimensions = array<i32: 1>} : vector<1x16xi32>
    %c8_i32 = arith.constant 8 : i32
    %73 = vector.broadcast %c8_i32 : i32 to vector<1x16xi32>
    %74 = arith.cmpi slt, %72, %73 : vector<1x16xi32>
    %75 = arith.extui %74 : vector<1x16xi1> to vector<1x16xi32>
    %76 = arith.sitofp %75 : vector<1x16xi32> to vector<1x16xf32>
    %cst_79 = arith.constant 1.000000e+00 : f32
    %77 = vector.broadcast %cst_79 : f32 to vector<1x16xf32>
    %78 = arith.subf %77, %76 : vector<1x16xf32>
    %79 = arith.mulf %68, %76 : vector<1x16xf32>
    %80 = vector.shape_cast %79 : vector<1x16xf32> to vector<1x1x16xf32>
    %cst_80 = arith.constant dense<0.000000e+00> : vector<1xf32>
    %81 = vector.multi_reduction <add>, %80, %cst_80 [1, 2] : vector<1x1x16xf32> to vector<1xf32>
    %82 = vector.shape_cast %81 : vector<1xf32> to vector<1x1x1xf32>
    %83 = vector.extract %82[0, 0, 0] : f32 from vector<1x1x1xf32>
    %cst_81 = arith.constant 2.048000e+03 : f32
    %84 = arith.divf %83, %cst_81 : f32
    %85 = arith.mulf %68, %78 : vector<1x16xf32>
    %86 = vector.shape_cast %85 : vector<1x16xf32> to vector<1x1x16xf32>
    %cst_82 = arith.constant dense<0.000000e+00> : vector<1xf32>
    %87 = vector.multi_reduction <add>, %86, %cst_82 [1, 2] : vector<1x1x16xf32> to vector<1xf32>
    %88 = vector.shape_cast %87 : vector<1xf32> to vector<1x1x1xf32>
    %89 = vector.extract %88[0, 0, 0] : f32 from vector<1x1x1xf32>
    %cst_83 = arith.constant 2.048000e+03 : f32
    %90 = arith.divf %89, %cst_83 : f32
    %91 = arith.mulf %71, %76 : vector<1x16xf32>
    %92 = vector.shape_cast %91 : vector<1x16xf32> to vector<1x1x16xf32>
    %cst_84 = arith.constant dense<0.000000e+00> : vector<1xf32>
    %93 = vector.multi_reduction <add>, %92, %cst_84 [1, 2] : vector<1x1x16xf32> to vector<1xf32>
    %94 = vector.shape_cast %93 : vector<1xf32> to vector<1x1x1xf32>
    %95 = vector.extract %94[0, 0, 0] : f32 from vector<1x1x1xf32>
    %cst_85 = arith.constant 2.048000e+03 : f32
    %96 = arith.divf %95, %cst_85 : f32
    %97 = arith.mulf %84, %84 : f32
    %98 = arith.subf %96, %97 : f32
    %99 = arith.mulf %71, %78 : vector<1x16xf32>
    %100 = vector.shape_cast %99 : vector<1x16xf32> to vector<1x1x16xf32>
    %cst_86 = arith.constant dense<0.000000e+00> : vector<1xf32>
    %101 = vector.multi_reduction <add>, %100, %cst_86 [1, 2] : vector<1x1x16xf32> to vector<1xf32>
    %102 = vector.shape_cast %101 : vector<1xf32> to vector<1x1x1xf32>
    %103 = vector.extract %102[0, 0, 0] : f32 from vector<1x1x1xf32>
    %cst_87 = arith.constant 2.048000e+03 : f32
    %104 = arith.divf %103, %cst_87 : f32
    %105 = arith.mulf %90, %90 : f32
    %106 = arith.subf %104, %105 : f32
    %cst_88 = arith.constant 9.99999974E-6 : f32
    %107 = arith.addf %98, %cst_88 : f32
    %108 = math.rsqrt %107 : f32
    %cst_89 = arith.constant 9.99999974E-6 : f32
    %109 = arith.addf %106, %cst_89 : f32
    %110 = math.rsqrt %109 : f32
    %111 = vector.broadcast %84 : f32 to vector<1x16xf32>
    %112 = arith.mulf %76, %111 : vector<1x16xf32>
    %113 = vector.broadcast %90 : f32 to vector<1x16xf32>
    %114 = arith.mulf %78, %113 : vector<1x16xf32>
    %115 = arith.addf %112, %114 : vector<1x16xf32>
    %116 = vector.broadcast %108 : f32 to vector<1x16xf32>
    %117 = arith.mulf %76, %116 : vector<1x16xf32>
    %118 = vector.broadcast %110 : f32 to vector<1x16xf32>
    %119 = arith.mulf %78, %118 : vector<1x16xf32>
    %120 = arith.addf %117, %119 : vector<1x16xf32>
    %121 = arith.mulf %120, %63 : vector<1x16xf32>
    %122 = arith.mulf %115, %121 : vector<1x16xf32>
    %123 = arith.subf %64, %122 : vector<1x16xf32>
    %124 = vector.broadcast %121 : vector<1x16xf32> to vector<256x16xf32>
    %125 = arith.mulf %66, %124 : vector<256x16xf32>
    %126 = vector.broadcast %123 : vector<1x16xf32> to vector<256x16xf32>
    %127 = arith.addf %125, %126 : vector<256x16xf32>
    %128 = arith.negf %127 : vector<256x16xf32>
    %129 = math.exp %128 : vector<256x16xf32>
    %cst_90 = arith.constant 1.000000e+00 : f32
    %130 = vector.broadcast %cst_90 : f32 to vector<256x16xf32>
    %131 = arith.addf %130, %129 : vector<256x16xf32>
    %132 = arith.divf %130, %131 : vector<256x16xf32>
    %133 = arith.mulf %127, %132 : vector<256x16xf32>
    %134 = arith.truncf %133 : vector<256x16xf32> to vector<256x16xbf16>
    %c0_91 = arith.constant 0 : index
    %c0_92 = arith.constant 0 : index
    %c0_93 = arith.constant 0 : index
    %135 = vector.load %arg4[%c0_91, %c0_92, %c0_93] : memref<1x256x16xbf16, #tpu.memory_space<vmem>>, vector<1x256x16xbf16>
    %136 = vector.shape_cast %135 : vector<1x256x16xbf16> to vector<256x16xbf16>
    %137 = vector.shape_cast %134 : vector<256x16xbf16> to vector<1x256x16xbf16>
    tpu.vector_store %arg4[%c0_91, %c0_92, %c0_93], %137 {strides = array<i32>} : memref<1x256x16xbf16, #tpu.memory_space<vmem>>, vector<1x256x16xbf16>,
    return
  }
  func.func @transform_0(%arg0: i32) -> (i32, i32, i32, i32, i32) {
    %c0_i32 = arith.constant 0 : i32
    %c0_i32_0 = arith.constant 0 : i32
    %c0_i32_1 = arith.constant 0 : i32
    %c0_i32_2 = arith.constant 0 : i32
    %c0_i32_3 = arith.constant 0 : i32
    return %arg0, %c0_i32, %c0_i32_0, %c0_i32_1, %c0_i32_2 : i32, i32, i32, i32, i32
  }
  func.func @transform_1(%arg0: i32) -> (i32, i32, i32) {
    %c0_i32 = arith.constant 0 : i32
    %c0_i32_0 = arith.constant 0 : i32
    %c0_i32_1 = arith.constant 0 : i32
    %c0_i32_2 = arith.constant 0 : i32
    return %c0_i32, %c0_i32_0, %c0_i32_1 : i32, i32, i32
  }
  func.func @transform_2(%arg0: i32) -> (i32, i32) {
    %c0_i32 = arith.constant 0 : i32
    %c0_i32_0 = arith.constant 0 : i32
    %c0_i32_1 = arith.constant 0 : i32
    return %c0_i32, %c0_i32_0 : i32, i32
  }
  func.func @transform_3(%arg0: i32) -> (i32, i32, i32) {
    %c0_i32 = arith.constant 0 : i32
    %c0_i32_0 = arith.constant 0 : i32
    %c0_i32_1 = arith.constant 0 : i32
    return %arg0, %c0_i32, %c0_i32_0 : i32, i32, i32
  }
}

</mosaic_0001>

<bundles_post_ra>
// kernel: tpu_custom_call.1
= control target key start
LH: loop header
LB: loop body
LE: loop exit
PB: predicated region body
PF: predicated region fallthrough
CT: control target
= control target key end

     0   :  { %s6165_s12 = smov 0   ;;  %s9379_s0 = inlined_call_operand.vmem [shape: bf16[2,1,18,18,4], index: 0, kind: input, shape index: {}]   ;;  %s9380_s1 = inlined_call_operand.vmem [shape: bf16[9,4,16], index: 1, kind: input, shape index: {}]   ;;  %s9381_s2 = inlined_call_operand.vmem [shape: f32[3,16], index: 2, kind: input, shape index: {}]   ;;  %s9382_s3 = inlined_call_operand.vmem [shape: bf16[2,256,16], index: 3, kind: output, shape index: {}]  }
   0x1 LB: > { %s5246_s13 = sadd.s32 4294967295, %s6141_s12   ;;  %p5250_p0 = scmp.ge.s32.totalorder %s6141_s12, 1  ;;  %s6141_s12 = sphi %s6165_s12, %s13_s12  }
   0x2   : > { %p137_p1 = scmp.lt.s32.totalorder %s6141_s12, 3 }
   0x4   : > { %p138_p2 = pnand %p5250_p0, %p137_p1 }
   0x6   : > { %141 = sbr.rel (%p138_p2) target bundleno = 1215 (0x4bf), region = 32 }
   0xb   : > { %v5254_v0 = vld [vmem:[%s9380_s1 + $0x2] sm:$0x3]  ;;  %vm707_vm0 = vcmask 1041408   ;;  %p161_p3 = scmp.lt.s32.totalorder %s5246_s13, 1  ;;  %v5367_v2 = vld [vmem:[%s9380_s1 + $0x4] sm:$0x3] }
   0xc   : > { %v709_v1 = vsel %vm707_vm0, %v5254_v0, 0  ;;  %v1282_v3 = vsel %vm707_vm0, %v5367_v2, 0  ;;  %v5416_v4 = vld [vmem:[%s9380_s1 + $0x6] sm:$0x3]  ;;  %v204_v5 = vld [vmem:[%s9380_s1] sm:$0x3] }
   0xd   : > { %5922 = vmatpush.bf16.msra.mxu1 %v709_v1  ;;  %5923 = vmatpush.bf16.msra.mxu2 %v709_v1  ;;  %s9698_s13 = smov (!%p161_p3, %s5246_s13), 1  ;;  %v5545_v6 = vld [vmem:[%s9380_s1 + $0x8] sm:$0x3]  ;;  %v1569_v7 = vsel %vm707_vm0, %v5416_v4, 0  ;;  %v929_v8 = vsel %vm707_vm0, %v204_v5, 0  ;;  %vm658_vm4 = vcmask 31744  }
   0xe   : > { %5924 = vmatpush.bf16.msra.mxu3 %v709_v1  ;;  %718 = vmatpush.bf16.msra.mxu0 %v709_v1  ;;  %s5925_s24 = smul.u32 216, %s9698_s13  ;;  %v2223_v9 = vsel %vm707_vm0, %v5545_v6, 0  ;;  %vm221_vm1 = vsmask.f32 3328  ;;  %vm222_vm2 = vsmask.f32 7440 }
   0xf   : > { %vm6211_vm3 = vmor %vm221_vm1, %vm222_vm2  ;;  %vm1068_vm5 = vcmask 1042432   ;;  %vm1069_vm6 = vcmask 1046532   ;;  %vm4119_vm8 = vcmask 130048   ;;  %vm4297_vm10 = vcmask 122880   ;;  %s5873_s7 = sshll.u32 %s9698_s13, 7 }
  0x10   : > { %s6199_s27 = scalar_lea.vmem %s9379_s0, %s5925_s24  ;;  %vm6385_vm7 = vmor %vm1068_vm5, %vm1069_vm6  ;;  %s9113_s9 = scalar_lea.vmem %s9382_s3, %s5873_s7 }
  0x11   : > { %1291 = vmatpush.bf16.msrb.mxu2 %v1282_v3  ;;  %938 = vmatpush.bf16.msrb.mxu1 %v929_v8  ;;  %v180_v10 = vld [vmem:[%s6199_s27 + $0x30] sm:$0xf]  ;;  %v181_v11 = vld [vmem:[%s6199_s27 + $0x34] sm:$0xf]  ;;  %v209_v12 = vld [vmem:[%s6199_s27 + $0x38] sm:$0x1] }
  0x12   : > { %1578 = vmatpush.bf16.msrb.mxu3 %v1569_v7  ;;  %2232 = vmatpush.bf16.msrb.mxu0 %v2223_v9  ;;  %v321_v13 = vshrl.u32 %v180_v10, 16  ;;  %v324_v14 = vshll.u32 %v180_v10, 16  ;;  %v330_v15 = vshll.u32 %v181_v11, 16  ;;  %v334_v16 = vshrl.u32 %v181_v11, 16  ;;  %v188_v17 = vld [vmem:[%s6199_s27 + $0x60] sm:$0xf] }
  0x13   : > { %v340_v18 = vshll.u32 %v209_v12, 16  ;;  %v189_v19 = vld [vmem:[%s6199_s27 + $0x64] sm:$0xf]  ;;  %v213_v20 = vld [vmem:[%s6199_s27 + $0x68] sm:$0x1]  ;;  %v417_v21 = vshrl.u32 %v188_v17, 16 }
  0x14   : > { %v323_v22 = vrot.slane %v321_v13, 4  ;;  %v326_v23 = vrot.slane %v324_v14, 5  ;;  %v332_v24 = vrot.slane %v330_v15, 5  ;;  %v336_v25 = vrot.slane %v334_v16, 4  ;;  %v196_v26 = vld [vmem:[%s6199_s27 + $0x90] sm:$0xf] }
  0x15   : > { %v342_v27 = vrot.slane %v340_v18, 5  ;;  %v419_v28 = vrot.slane %v417_v21, 4  ;;  %v420_v29 = vshll.u32 %v188_v17, 16  ;;  %v426_v30 = vshll.u32 %v189_v19, 16  ;;  %v197_v35 = vld [vmem:[%s6199_s27 + $0x94] sm:$0xf] }
  0x16   : > { %v327_v31 = vor.u32 %v326_v23, %v323_v22  ;;  %v337_v32 = vor.u32 %v336_v25, %v332_v24  ;;  %v430_v33 = vshrl.u32 %v189_v19, 16  ;;  %v436_v34 = vshll.u32 %v213_v20, 16  ;;  %v217_v45 = vld [vmem:[%s6199_s27 + $0x98] sm:$0x1]  ;;  %v172_v61 = vld [vmem:[%s6199_s27] sm:$0xf] }
  0x17   : > { %v422_v37 = vrot.slane %v420_v29, 5  ;;  %v428_v38 = vrot.slane %v426_v30, 5  ;;  %v513_v39 = vshrl.u32 %v196_v26, 16  ;;  %v516_v47 = vshll.u32 %v196_v26, 16  ;;  %v6224_v1 = vld [vmem:[%s6199_s27 + $0x4] sm:$0xf] }
  0x18   : > { %v328_v40 = vrot.slane %v327_v31, 4  ;;  %v338_v41 = vrot.slane %v337_v32, 4  ;;  %v432_v42 = vrot.slane %v430_v33, 4  ;;  %v438_v43 = vrot.slane %v436_v34, 5  ;;  %v6227_v2 = vld [vmem:[%s6199_s27 + $0x8] sm:$0x1] }
  0x19   : > { %v423_v44 = vor.u32 %v422_v37, %v419_v28  ;;  %v515_v46 = vrot.slane %v513_v39, 4  ;;  %v522_v48 = vshll.u32 %v197_v35, 16  ;;  %v526_v52 = vshrl.u32 %v197_v35, 16  ;;  %v182_v19 = vld [vmem:[%s6199_s27 + $0x3c] sm:$0xf] }
  0x1a   : > { %v333_v49 = vsel %vm6211_vm3, %v328_v40, %v332_v24  ;;  %v343_v50 = vsel %vm6211_vm3, %v338_v41, %v342_v27  ;;  %v433_v51 = vor.u32 %v432_v42, %v428_v38  ;;  %v518_v56 = vrot.slane %v516_v47, 5  ;;  %v6239_v20 = vld [vmem:[%s6199_s27 + $0x40] sm:$0xf]  ;;  %v6244_v25 = vld [vmem:[%s6199_s27 + $0x44] sm:$0x1] }
  0x1b   : > { %v618_v53 = vunpack.c.l.b16 %v333_v49  ;;  %v619_v54 = vunpack.c.l.b16 %v343_v50  ;;  %v424_v55 = vrot.slane %v423_v44, 4  ;;  %v524_v58 = vrot.slane %v522_v48, 5  ;;  %v190_v33 = vld [vmem:[%s6199_s27 + $0x6c] sm:$0xf]  ;;  %v214_v47 = vld [vmem:[%s6199_s27 + $0x74] sm:$0x1] }
  0x1c   : > { %v434_v57 = vrot.slane %v433_v51, 4  ;;  %v528_v59 = vrot.slane %v526_v52, 4  ;;  %v532_v60 = vshll.u32 %v217_v45, 16  ;;  %v519_v0 = vor.u32 %v518_v56, %v515_v46 }
  0x1d   : > { %v646_v62 = vpack.c.b16 %v619_v54, %v618_v53  ;;  %v429_v63 = vsel %vm6211_vm3, %v424_v55, %v428_v38  ;;  %v225_v9 = vshrl.u32 %v172_v61, 16  ;;  %v228_v10 = vshll.u32 %v172_v61, 16  ;;  %v198_v61 = vld [vmem:[%s6199_s27 + $0x9c] sm:$0xf] }
  0x1e   : > { %v439_v3 = vsel %vm6211_vm3, %v434_v57, %v438_v43  ;;  %v626_v4 = vunpack.c.l.b16 %v429_v63  ;;  %v529_v5 = vor.u32 %v528_v59, %v524_v58  ;;  %v534_v6 = vrot.slane %v532_v60, 5  ;;  %v191_v43 = vld [vmem:[%s6199_s27 + $0x70] sm:$0xf] }
  0x1f   : > { %5259 = vmatmul.msk.bf16.vlgmr.msra.gmra.mxu1 %vm658_vm4, %v646_v62  ;;  %v627_v7 = vunpack.c.l.b16 %v439_v3  ;;  %v520_v8 = vrot.slane %v519_v0, 4  ;;  %v234_v12 = vshll.u32 %v6224_v1, 16  ;;  %v238_v13 = vshrl.u32 %v6224_v1, 16  ;;  %v199_v3 = vld [vmem:[%s6199_s27 + $0xa0] sm:$0xf] }
  0x20   : > { %v530_v11 = vrot.slane %v529_v5, 4  ;;  %v244_v14 = vshll.u32 %v6227_v2, 16  ;;  %v227_v17 = vrot.slane %v225_v9, 4  ;;  %v230_v18 = vrot.slane %v228_v10, 5 }
  0x21   : > { %v650_v15 = vpack.c.b16 %v627_v7, %v626_v4  ;;  %v525_v16 = vsel %vm6211_vm3, %v520_v8, %v524_v58  ;;  %v236_v23 = vrot.slane %v234_v12, 5  ;;  %v240_v24 = vrot.slane %v238_v13, 4  ;;  %v218_v8 = vld [vmem:[%s6199_s27 + $0xa4] sm:$0x1] }
  0x22   : > { %v535_v21 = vsel %vm6211_vm3, %v530_v11, %v534_v6  ;;  %v634_v22 = vunpack.c.l.b16 %v525_v16  ;;  %v231_v27 = vor.u32 %v230_v18, %v227_v17  ;;  %v246_v28 = vrot.slane %v244_v14, 5 }
  0x23   : > { %5263 = vmatmul.msk.bf16.vlgmr.msra.gmra.mxu2 %vm658_vm4, %v650_v15  ;;  %v635_v26 = vunpack.c.l.b16 %v535_v21  ;;  %v241_v29 = vor.u32 %v240_v24, %v236_v23  ;;  %v345_v30 = vshrl.u32 %v182_v19, 16  ;;  %v348_v31 = vshll.u32 %v182_v19, 16 }
  0x24   : > { %v354_v32 = vshll.u32 %v6239_v20, 16  ;;  %v232_v35 = vrot.slane %v231_v27, 4  ;;  %v358_v37 = vshrl.u32 %v6239_v20, 16  ;;  %v364_v38 = vshll.u32 %v6244_v25, 16 }
  0x25   : > { %v654_v34 = vpack.c.b16 %v635_v26, %v634_v22  ;;  %v242_v39 = vrot.slane %v241_v29, 4  ;;  %v347_v40 = vrot.slane %v345_v30, 4  ;;  %v350_v41 = vrot.slane %v348_v31, 5  ;;  %v174_v22 = vld [vmem:[%s6199_s27 + $0xc] sm:$0xf] }
  0x26   : > { %v356_v42 = vrot.slane %v354_v32, 5  ;;  %v237_v44 = vsel %vm6211_vm3, %v232_v35, %v236_v23  ;;  %v360_v45 = vrot.slane %v358_v37, 4  ;;  %v366_v46 = vrot.slane %v364_v38, 5  ;;  %v6273_v32 = vld [vmem:[%s6199_s27 + $0x14] sm:$0x1] }
  0x27   : > { %5267 = vmatmul.msk.bf16.vlgmr.msra.gmra.mxu3 %vm658_vm4, %v654_v34  ;;  %v441_v48 = vshrl.u32 %v190_v33, 16  ;;  %v247_v49 = vsel %vm6211_vm3, %v242_v39, %v246_v28  ;;  %v610_v50 = vunpack.c.l.b16 %v237_v44  ;;  %v351_v51 = vor.u32 %v350_v41, %v347_v40  ;;  %v6270_v28 = vld [vmem:[%s6199_s27 + $0x10] sm:$0xf] }
  0x28   : > { %v444_v52 = vshll.u32 %v190_v33, 16  ;;  %v611_v53 = vunpack.c.l.b16 %v247_v49  ;;  %v361_v54 = vor.u32 %v360_v45, %v356_v42  ;;  %v450_v56 = vshll.u32 %v191_v43, 16 }
  0x29   : > { %v443_v55 = vrot.slane %v441_v48, 4  ;;  %v352_v57 = vrot.slane %v351_v51, 4  ;;  %v454_v59 = vshrl.u32 %v191_v43, 16  ;;  %v460_v60 = vshll.u32 %v214_v47, 16  ;;  %v6283_v47 = vld [vmem:[%s6199_s27 + $0x4c] sm:$0xf] }
  0x2a   : > { %v446_v58 = vrot.slane %v444_v52, 5  ;;  %v642_v62 = vpack.c.b16 %v611_v53, %v610_v50  ;;  %v362_v63 = vrot.slane %v361_v54, 4  ;;  %v452_v0 = vrot.slane %v450_v56, 5  ;;  %v6288_v56 = vld [vmem:[%s6199_s27 + $0x50] sm:$0x1] }
  0x2b   : > { %v357_v4 = vsel %vm6211_vm3, %v352_v57, %v356_v42  ;;  %v456_v6 = vrot.slane %v454_v59, 4  ;;  %v462_v7 = vrot.slane %v460_v60, 5  ;;  %v537_v11 = vshrl.u32 %v198_v61, 16  ;;  %v184_v42 = vld [vmem:[%s6199_s27 + $0x48] sm:$0xf] }
  0x2c   : > { %v447_v5 = vor.u32 %v446_v58, %v443_v55  ;;  %5255 = vmatmul.msk.bf16.vlgmr.msra.gmra.mxu0 %vm658_vm4, %v642_v62  ;;  %v367_v9 = vsel %vm6211_vm3, %v362_v63, %v366_v46  ;;  %v620_v10 = vunpack.c.l.b16 %v357_v4  ;;  %v540_v12 = vshll.u32 %v198_v61, 16 }
  0x2d   : > { %v621_v13 = vunpack.c.l.b16 %v367_v9  ;;  %v457_v15 = vor.u32 %v456_v6, %v452_v0  ;;  %v546_v16 = vshll.u32 %v199_v3, 16  ;;  %v539_v17 = vrot.slane %v537_v11, 4 }
  0x2e   : > { %v448_v14 = vrot.slane %v447_v5, 4  ;;  %v542_v18 = vrot.slane %v540_v12, 5  ;;  %v550_v19 = vshrl.u32 %v199_v3, 16  ;;  %v556_v21 = vshll.u32 %v218_v8, 16  ;;  %v192_v3 = vld [vmem:[%s6199_s27 + $0x78] sm:$0xf] }
  0x2f   : > { %v647_v23 = vpack.c.b16 %v621_v13, %v620_v10  ;;  %v458_v26 = vrot.slane %v457_v15, 4  ;;  %v548_v27 = vrot.slane %v546_v16, 5  ;;  %v249_v35 = vshrl.u32 %v174_v22, 16  ;;  %v193_v8 = vld [vmem:[%s6199_s27 + $0x7c] sm:$0xf] }
  0x30   : > { %v453_v24 = vsel %vm6211_vm3, %v448_v14, %v452_v0  ;;  %v543_v30 = vor.u32 %v542_v18, %v539_v17  ;;  %v552_v31 = vrot.slane %v550_v19, 4  ;;  %v558_v34 = vrot.slane %v556_v21, 5  ;;  %v215_v16 = vld [vmem:[%s6199_s27 + $0x80] sm:$0x1] }
  0x31   : > { %v628_v29 = vunpack.c.l.b16 %v453_v24  ;;  %5260 = vmatmul.msk.bf16.gmra.mxu1 %vm658_vm4, %v647_v23  ;;  %v463_v33 = vsel %vm6211_vm3, %v458_v26, %v462_v7  ;;  %v252_v37 = vshll.u32 %v174_v22, 16  ;;  %v258_v41 = vshll.u32 %v6270_v28, 16 }
  0x32   : > { %v629_v38 = vunpack.c.l.b16 %v463_v33  ;;  %v544_v39 = vrot.slane %v543_v30, 4  ;;  %v553_v40 = vor.u32 %v552_v31, %v548_v27  ;;  %v251_v43 = vrot.slane %v249_v35, 4 }
  0x33   : > { %v254_v44 = vrot.slane %v252_v37, 5  ;;  %v262_v45 = vshrl.u32 %v6270_v28, 16  ;;  %v268_v46 = vshll.u32 %v6273_v32, 16  ;;  %v260_v51 = vrot.slane %v258_v41, 5 }
  0x34   : > { %v651_v48 = vpack.c.b16 %v629_v38, %v628_v29  ;;  %v549_v49 = vsel %vm6211_vm3, %v544_v39, %v548_v27  ;;  %v554_v50 = vrot.slane %v553_v40, 4  ;;  %v369_v58 = vshrl.u32 %v184_v42, 16  ;;  %v201_v39 = vld [vmem:[%s6199_s27 + $0xac] sm:$0xf]  ;;  %v219_v40 = vld [vmem:[%s6199_s27 + $0xb0] sm:$0x1] }
  0x35   : > { %v636_v52 = vunpack.c.l.b16 %v549_v49  ;;  %v255_v53 = vor.u32 %v254_v44, %v251_v43  ;;  %v264_v54 = vrot.slane %v262_v45, 4  ;;  %v270_v55 = vrot.slane %v268_v46, 5 }
  0x36   : > { %5264 = vmatmul.msk.bf16.gmra.mxu2 %vm658_vm4, %v651_v48  ;;  %v559_v57 = vsel %vm6211_vm3, %v554_v50, %v558_v34  ;;  %v372_v59 = vshll.u32 %v184_v42, 16  ;;  %v378_v60 = vshll.u32 %v6283_v47, 16  ;;  %v382_v0 = vshrl.u32 %v6283_v47, 16  ;;  %v200_v34 = vld [vmem:[%s6199_s27 + $0xa8] sm:$0xf] }
  0x37   : > { %v637_v61 = vunpack.c.l.b16 %v559_v57  ;;  %v256_v62 = vrot.slane %v255_v53, 4  ;;  %v265_v63 = vor.u32 %v264_v54, %v260_v51  ;;  %v371_v4 = vrot.slane %v369_v58, 4 }
  0x38   : > { %v374_v5 = vrot.slane %v372_v59, 5  ;;  %v380_v6 = vrot.slane %v378_v60, 5  ;;  %v388_v7 = vshll.u32 %v6288_v56, 16  ;;  %v384_v12 = vrot.slane %v382_v0, 4  ;;  %v176_v59 = vld [vmem:[%s6199_s27 + $0x18] sm:$0xf] }
  0x39   : > { %v655_v9 = vpack.c.b16 %v637_v61, %v636_v52  ;;  %v261_v10 = vsel %vm6211_vm3, %v256_v62, %v260_v51  ;;  %v266_v11 = vrot.slane %v265_v63, 4  ;;  %v465_v17 = vshrl.u32 %v192_v3, 16  ;;  %v6316_v63 = vld [vmem:[%s6199_s27 + $0x1c] sm:$0xf]  ;;  %v6319_v0 = vld [vmem:[%s6199_s27 + $0x20] sm:$0x1] }
  0x3a   : > { %v612_v13 = vunpack.c.l.b16 %v261_v10  ;;  %v375_v14 = vor.u32 %v374_v5, %v371_v4  ;;  %v390_v15 = vrot.slane %v388_v7, 5  ;;  %v385_v19 = vor.u32 %v384_v12, %v380_v6 }
  0x3b   : > { %5268 = vmatmul.msk.bf16.gmra.mxu3 %vm658_vm4, %v655_v9  ;;  %v271_v18 = vsel %vm6211_vm3, %v266_v11, %v270_v55  ;;  %v468_v21 = vshll.u32 %v192_v3, 16  ;;  %v474_v22 = vshll.u32 %v193_v8, 16  ;;  %v467_v26 = vrot.slane %v465_v17, 4 }
  0x3c   : > { %v613_v23 = vunpack.c.l.b16 %v271_v18  ;;  %v376_v24 = vrot.slane %v375_v14, 4  ;;  %v478_v27 = vshrl.u32 %v193_v8, 16  ;;  %v386_v29 = vrot.slane %v385_v19, 4 }
  0x3d   : > { %v470_v30 = vrot.slane %v468_v21, 5  ;;  %v476_v31 = vrot.slane %v474_v22, 5  ;;  %v484_v33 = vshll.u32 %v215_v16, 16  ;;  %v561_v48 = vshrl.u32 %v200_v34, 16  ;;  %v6329_v21 = vld [vmem:[%s6199_s27 + $0x58] sm:$0xf] }
  0x3e   : > { %v643_v35 = vpack.c.b16 %v613_v23, %v612_v13  ;;  %v381_v37 = vsel %vm6211_vm3, %v376_v24, %v380_v6  ;;  %v480_v38 = vrot.slane %v478_v27, 4  ;;  %v391_v41 = vsel %vm6211_vm3, %v386_v29, %v390_v15  ;;  %v186_v15 = vld [vmem:[%s6199_s27 + $0x54] sm:$0xf]  ;;  %v6334_v27 = vld [vmem:[%s6199_s27 + $0x5c] sm:$0x1] }
  0x3f   : > { %v622_v42 = vunpack.c.l.b16 %v381_v37  ;;  %v471_v43 = vor.u32 %v470_v30, %v467_v26  ;;  %v486_v44 = vrot.slane %v484_v33, 5  ;;  %v623_v45 = vunpack.c.l.b16 %v391_v41 }
  0x40   : > { %5256 = vmatmul.msk.bf16.gmra.mxu0 %vm658_vm4, %v643_v35  ;;  %v481_v46 = vor.u32 %v480_v38, %v476_v31  ;;  %v564_v49 = vshll.u32 %v200_v34, 16  ;;  %v570_v51 = vshll.u32 %v201_v39, 16  ;;  %v574_v52 = vshrl.u32 %v201_v39, 16  ;;  %v194_v39 = vld [vmem:[%s6199_s27 + $0x84] sm:$0xf] }
  0x41   : > { %v472_v50 = vrot.slane %v471_v43, 4  ;;  %v580_v53 = vshll.u32 %v219_v40, 16  ;;  %v648_v54 = vpack.c.b16 %v623_v45, %v622_v42  ;;  %v563_v57 = vrot.slane %v561_v48, 4 }
  0x42   : > { %v482_v55 = vrot.slane %v481_v46, 4  ;;  %v566_v58 = vrot.slane %v564_v49, 5  ;;  %v572_v61 = vrot.slane %v570_v51, 5  ;;  %v576_v62 = vrot.slane %v574_v52, 4  ;;  %v195_v49 = vld [vmem:[%s6199_s27 + $0x88] sm:$0xf] }
  0x43   : > { %v477_v60 = vsel %vm6211_vm3, %v472_v50, %v476_v31  ;;  %5261 = vmatmul.msk.bf16.gmra.mxu1 %vm658_vm4, %v648_v54  ;;  %v582_v6 = vrot.slane %v580_v53, 5  ;;  %v273_v9 = vshrl.u32 %v176_v59, 16  ;;  %v276_v10 = vshll.u32 %v176_v59, 16  ;;  %v216_v53 = vld [vmem:[%s6199_s27 + $0x8c] sm:$0x1] }
  0x44   : > { %v487_v3 = vsel %vm6211_vm3, %v482_v55, %v486_v44  ;;  %v630_v4 = vunpack.c.l.b16 %v477_v60  ;;  %v567_v5 = vor.u32 %v566_v58, %v563_v57  ;;  %v577_v8 = vor.u32 %v576_v62, %v572_v61 }
  0x45   : > { %v631_v7 = vunpack.c.l.b16 %v487_v3  ;;  %v282_v12 = vshll.u32 %v6316_v63, 16  ;;  %v286_v13 = vshrl.u32 %v6316_v63, 16  ;;  %v292_v14 = vshll.u32 %v6319_v0, 16 }
  0x46   : > { %v568_v11 = vrot.slane %v567_v5, 4  ;;  %v578_v17 = vrot.slane %v577_v8, 4  ;;  %v275_v18 = vrot.slane %v273_v9, 4  ;;  %v278_v19 = vrot.slane %v276_v10, 5  ;;  %v202_v8 = vld [vmem:[%s6199_s27 + $0xb4] sm:$0xf] }
  0x47   : > { %v652_v16 = vpack.c.b16 %v631_v7, %v630_v4  ;;  %v284_v23 = vrot.slane %v282_v12, 5  ;;  %v288_v24 = vrot.slane %v286_v13, 4  ;;  %v294_v26 = vrot.slane %v292_v14, 5  ;;  %v203_v12 = vld [vmem:[%s6199_s27 + $0xb8] sm:$0xf] }
  0x48   : > { %v573_v22 = vsel %vm6211_vm3, %v568_v11, %v572_v61  ;;  %v583_v29 = vsel %vm6211_vm3, %v578_v17, %v582_v6  ;;  %v279_v31 = vor.u32 %v278_v19, %v275_v18  ;;  %v393_v33 = vshrl.u32 %v186_v15, 16  ;;  %v220_v17 = vld [vmem:[%s6199_s27 + $0xbc] sm:$0x1] }
  0x49   : > { %5265 = vmatmul.msk.bf16.gmra.mxu2 %vm658_vm4, %v652_v16  ;;  %v638_v30 = vunpack.c.l.b16 %v573_v22  ;;  %v639_v34 = vunpack.c.l.b16 %v583_v29  ;;  %v289_v35 = vor.u32 %v288_v24, %v284_v23  ;;  %v396_v37 = vshll.u32 %v186_v15, 16 }
  0x4a   : > { %v402_v38 = vshll.u32 %v6329_v21, 16  ;;  %v280_v40 = vrot.slane %v279_v31, 4  ;;  %v395_v41 = vrot.slane %v393_v33, 4  ;;  %v406_v42 = vshrl.u32 %v6329_v21, 16 }
  0x4b   : > { %v412_v43 = vshll.u32 %v6334_v27, 16  ;;  %v656_v44 = vpack.c.b16 %v639_v34, %v638_v30  ;;  %v290_v45 = vrot.slane %v289_v35, 4  ;;  %v398_v46 = vrot.slane %v396_v37, 5  ;;  %v178_v37 = vld [vmem:[%s6199_s27 + $0x24] sm:$0xf] }
  0x4c   : > { %v404_v48 = vrot.slane %v402_v38, 5  ;;  %v285_v50 = vsel %vm6211_vm3, %v280_v40, %v284_v23  ;;  %v408_v51 = vrot.slane %v406_v42, 4  ;;  %v489_v54 = vshrl.u32 %v194_v39, 16  ;;  %v6362_v42 = vld [vmem:[%s6199_s27 + $0x28] sm:$0xf] }
  0x4d   : > { %v414_v52 = vrot.slane %v412_v43, 5  ;;  %5269 = vmatmul.msk.bf16.gmra.mxu3 %vm658_vm4, %v656_v44  ;;  %v295_v55 = vsel %vm6211_vm3, %v290_v45, %v294_v26  ;;  %v614_v57 = vunpack.c.l.b16 %v285_v50  ;;  %v399_v58 = vor.u32 %v398_v46, %v395_v41 }
  0x4e   : > { %v492_v59 = vshll.u32 %v194_v39, 16  ;;  %v615_v60 = vunpack.c.l.b16 %v295_v55  ;;  %v409_v61 = vor.u32 %v408_v51, %v404_v48  ;;  %v491_v62 = vrot.slane %v489_v54, 4 }
  0x4f   : > { %v498_v3 = vshll.u32 %v195_v49, 16  ;;  %v400_v4 = vrot.slane %v399_v58, 4  ;;  %v502_v6 = vshrl.u32 %v195_v49, 16  ;;  %v508_v7 = vshll.u32 %v216_v53, 16 }
  0x50   : > { %v494_v5 = vrot.slane %v492_v59, 5  ;;  %v644_v9 = vpack.c.b16 %v615_v60, %v614_v57  ;;  %v410_v10 = vrot.slane %v409_v61, 4  ;;  %v585_v22 = vshrl.u32 %v202_v8, 16  ;;  %v1020_v61 = vld [vmem:[%s6199_s27] sm:$0xe] }
  0x51   : > { %v500_v11 = vrot.slane %v498_v3, 5  ;;  %v405_v13 = vsel %vm6211_vm3, %v400_v4, %v404_v48  ;;  %v504_v15 = vrot.slane %v502_v6, 4  ;;  %v510_v16 = vrot.slane %v508_v7, 5  ;;  %v6366_v48 = vld [vmem:[%s6199_s27 + $0x2c] sm:$0x1] }
  0x52   : > { %v495_v14 = vor.u32 %v494_v5, %v491_v62  ;;  %5257 = vmatmul.msk.bf16.gmra.mxu0 %vm658_vm4, %v644_v9  ;;  %v415_v18 = vsel %vm6211_vm3, %v410_v10, %v414_v52  ;;  %v624_v19 = vunpack.c.l.b16 %v405_v13  ;;  %v588_v23 = vshll.u32 %v202_v8, 16  ;;  %v5497_v6 = vld [vmem:[%s6199_s27 + $0xc] sm:$0xf] }
  0x53   : > { %v625_v24 = vunpack.c.l.b16 %v415_v18  ;;  %v505_v29 = vor.u32 %v504_v15, %v500_v11  ;;  %v594_v30 = vshll.u32 %v203_v12, 16  ;;  %v587_v31 = vrot.slane %v585_v22, 4 }
  0x54   : > { %v496_v26 = vrot.slane %v495_v14, 4  ;;  %v590_v33 = vrot.slane %v588_v23, 5  ;;  %v598_v34 = vshrl.u32 %v203_v12, 16  ;;  %v604_v35 = vshll.u32 %v220_v17, 16  ;;  %v5498_v12 = vld [vmem:[%s6199_s27 + $0x10] sm:$0xf] }
  0x55   : > { %v649_v38 = vpack.c.b16 %v625_v24, %v624_v19  ;;  %v506_v40 = vrot.slane %v505_v29, 4  ;;  %v596_v41 = vrot.slane %v594_v30, 5  ;;  %v1076_v43 = vrot.slane %v6227_v2, 5 }
  0x56   : > { %v501_v39 = vsel %vm6211_vm3, %v496_v26, %v500_v11  ;;  %v591_v45 = vor.u32 %v590_v33, %v587_v31  ;;  %v600_v46 = vrot.slane %v598_v34, 4  ;;  %v606_v50 = vrot.slane %v604_v35, 5  ;;  %v5643_v11 = vld [vmem:[%s9380_s1 + $0xc] sm:$0x3] }
  0x57   : > { %v632_v44 = vunpack.c.l.b16 %v501_v39  ;;  %5262 = vmatmul.msk.bf16.gmra.mxu1 %vm658_vm4, %v649_v38  ;;  %v511_v49 = vsel %vm6211_vm3, %v506_v40, %v510_v16  ;;  %v297_v51 = vshrl.u32 %v178_v37, 16  ;;  %v300_v52 = vshll.u32 %v178_v37, 16  ;;  %v5499_v38 = vld [vmem:[%s6199_s27 + $0x14] sm:$0x1] }
  0x58   : > { %v633_v53 = vunpack.c.l.b16 %v511_v49  ;;  %v592_v54 = vrot.slane %v591_v45, 4  ;;  %v601_v55 = vor.u32 %v600_v46, %v596_v41  ;;  %v306_v2 = vshll.u32 %v6362_v42, 16  ;;  %v5772_v45 = vld [vmem:[%s9380_s1 + $0xe] sm:$0x3] }
  0x59   : > { %v299_v57 = vrot.slane %v297_v51, 4  ;;  %v302_v58 = vrot.slane %v300_v52, 5  ;;  %v310_v59 = vshrl.u32 %v6362_v42, 16  ;;  %v316_v60 = vshll.u32 %v6366_v48, 16  ;;  %v5874_v51 = vld [vmem:[%s6199_s27] sm:$0xff] }
  0x5a   : > { %v653_v62 = vpack.c.b16 %v633_v53, %v632_v44  ;;  %v597_v3 = vsel %vm6211_vm3, %v592_v54, %v596_v41  ;;  %v602_v4 = vrot.slane %v601_v55, 4  ;;  %v308_v5 = vrot.slane %v306_v2, 5  ;;  %v5821_v2 = vld [vmem:[%s9380_s1 + $0x10] sm:$0x3] }
  0x5b   : > { %v640_v7 = vunpack.c.l.b16 %v597_v3  ;;  %v303_v8 = vor.u32 %v302_v58, %v299_v57  ;;  %v312_v9 = vrot.slane %v310_v59, 4  ;;  %v318_v10 = vrot.slane %v316_v60, 5 }
  0x5c   : > { %5266 = vmatmul.msk.bf16.gmra.mxu2 %vm658_vm4, %v653_v62  ;;  %v607_v13 = vsel %vm6211_vm3, %v602_v4, %v606_v50  ;;  %v5351_v14 = vrot.slane %v1020_v61, 9  ;;  %v1073_v19 = vrot.slane %v6224_v1, 5  ;;  %v2908_v22 = vsel %vm707_vm0, %v5643_v11, 0  ;;  %v5594_v50 = vld [vmem:[%s9380_s1 + $0xa] sm:$0x3] }
  0x5d   : > { %v641_v15 = vunpack.c.l.b16 %v607_v13  ;;  %v304_v16 = vrot.slane %v303_v8, 4  ;;  %v313_v17 = vor.u32 %v312_v9, %v308_v5  ;;  %v1741_v23 = vshrl.u32 %v5497_v6, 16  ;;  %2917 = vmatpush.bf16.msra.mxu2 %v2908_v22  ;;  %v1021_v8 = vld [vmem:[%s6199_s27 + $0xc] sm:$0xe] }
  0x5e   : > { %v1744_v24 = vshll.u32 %v5497_v6, 16  ;;  %v1750_v26 = vshll.u32 %v5498_v12, 16  ;;  %v1074_v33 = vsel %vm6385_vm7, %v5351_v14, %v1073_v19  ;;  %v1075_v35 = vrot.slane %v1073_v19, 4  ;;  %v5501_v6 = vld [vmem:[%s6199_s27 + $0x1c] sm:$0xf] }
  0x5f   : > { %v657_v29 = vpack.c.b16 %v641_v15, %v640_v7  ;;  %v309_v30 = vsel %vm6211_vm3, %v304_v16, %v308_v5  ;;  %v314_v31 = vrot.slane %v313_v17, 4  ;;  %v1185_v37 = vunpack.c.l.b16 %v1074_v33  ;;  %v5500_v5 = vld [vmem:[%s6199_s27 + $0x18] sm:$0xf]  ;;  %v5890_v15 = vld [vmem:[%s6199_s27 + $0xc] sm:$0xff] }
  0x60   : > { %v616_v34 = vunpack.c.l.b16 %v309_v30  ;;  %v1743_v1 = vrot.slane %v1741_v23, 4  ;;  %v1746_v40 = vrot.slane %v1744_v24, 5  ;;  %v1752_v41 = vrot.slane %v1750_v26, 5  ;;  %v5502_v30 = vld [vmem:[%s6199_s27 + $0x20] sm:$0x1] }
  0x61   : > { %5270 = vmatmul.msk.bf16.gmra.mxu3 %vm658_vm4, %v657_v29  ;;  %v319_v39 = vsel %vm6211_vm3, %v314_v31, %v318_v10  ;;  %v1754_v44 = vshrl.u32 %v5498_v12, 16  ;;  %v1077_v49 = vsel %vm6385_vm7, %v1075_v35, %v1076_v43  ;;  %v1760_v55 = vshll.u32 %v5499_v38, 16  ;;  %v5875_v35 = vld [vmem:[%s6199_s27 + $0xc] sm:$0xff] }
  0x62   : > { %v617_v46 = vunpack.c.l.b16 %v319_v39  ;;  %v1186_v52 = vunpack.c.l.b16 %v1077_v49  ;;  %v1747_v53 = vor.u32 %v1746_v40, %v1743_v1  ;;  %v3562_v58 = vsel %vm707_vm0, %v5772_v45, 0 }
  0x63   : > { %v1756_v54 = vrot.slane %v1754_v44, 4  ;;  %3571 = vmatpush.bf16.msra.mxu3 %v3562_v58  ;;  %v2621_v60 = vsel %vm707_vm0, %v5594_v50, 0  ;;  %v3960_v61 = vsel %vm707_vm0, %v5821_v2, 0  ;;  %v1762_v4 = vrot.slane %v1760_v55, 5  ;;  %v1022_v50 = vld [vmem:[%s6199_s27 + $0x18] sm:$0xe] }
  0x64   : > { %v645_v57 = vpack.c.b16 %v617_v46, %v616_v34  ;;  %v1217_v43 = vpack.c.b16 %v1186_v52, %v1185_v37  ;;  %2630 = vmatpush.bf16.msra.mxu1 %v2621_v60  ;;  %v1748_v62 = vrot.slane %v1747_v53, 4  ;;  %3969 = vmatpush.bf16.msra.mxu0 %v3960_v61  ;;  %v1080_v7 = vrot.slane %v6270_v28, 5  ;;  %v5504_v46 = vld [vmem:[%s6199_s27 + $0x28] sm:$0xf] }
  0x65   : > { %v1757_v59 = vor.u32 %v1756_v54, %v1752_v41  ;;  %v1765_v9 = vshrl.u32 %v5500_v5, 16  ;;  %v1768_v10 = vshll.u32 %v5500_v5, 16  ;;  %v1774_v13 = vshll.u32 %v5501_v6, 16 }
  0x66   : > { %5258 = vmatmul.msk.bf16.gmra.mxu0 %vm658_vm4, %v645_v57  ;;  %v1753_v11 = vsel %vm6211_vm3, %v1748_v62, %v1752_v41  ;;  %v1778_v14 = vshrl.u32 %v5501_v6, 16  ;;  %v5352_v16 = vrot.slane %v1021_v8, 9  ;;  %v1082_v17 = vrot.slane %v1080_v7, 4  ;;  %v5503_v41 = vld [vmem:[%s6199_s27 + $0x24] sm:$0xf] }
  0x67   : > { %5335 = vmatmul.msk.bf16.vlgmr.msrb.gmra.mxu1 %vm658_vm4, %v5874_v51  ;;  %v1758_v3 = vrot.slane %v1757_v59, 4  ;;  %v1083_v28 = vrot.slane %v6273_v32, 5  ;;  %v2126_v19 = vunpack.c.l.b16 %v1753_v11  ;;  %v1767_v23 = vrot.slane %v1765_v9, 4  ;;  %v5505_v6 = vld [vmem:[%s6199_s27 + $0x2c] sm:$0x1] }
  0x68   : > { %v1770_v24 = vrot.slane %v1768_v10, 5  ;;  %v1776_v26 = vrot.slane %v1774_v13, 5  ;;  %v1780_v29 = vrot.slane %v1778_v14, 4  ;;  %v1081_v31 = vsel %vm6385_vm7, %v5352_v16, %v1080_v7 }
  0x69   : > { %v1763_v12 = vsel %vm6211_vm3, %v1758_v3, %v1762_v4  ;;  %v1084_v33 = vsel %vm6385_vm7, %v1082_v17, %v1083_v28  ;;  %v1784_v38 = vshll.u32 %v5502_v30, 16  ;;  %v1187_v1 = vunpack.c.l.b16 %v1081_v31 }
  0x6a   : > { %v2127_v22 = vunpack.c.l.b16 %v1763_v12  ;;  %v1771_v32 = vor.u32 %v1770_v24, %v1767_v23  ;;  %v1781_v37 = vor.u32 %v1780_v29, %v1776_v26  ;;  %v1188_v39 = vunpack.c.l.b16 %v1084_v33  ;;  %v5876_v12 = vld [vmem:[%s6199_s27 + $0x18] sm:$0xff]  ;;  %v1023_v29 = vld [vmem:[%s6199_s27 + $0x24] sm:$0xe] }
  0x6b   : > { %v1786_v45 = vrot.slane %v1784_v38, 5  ;;  %v1087_v51 = vrot.slane %v6316_v63, 5  ;;  %v1789_v52 = vshrl.u32 %v5503_v41, 16  ;;  %v1792_v54 = vshll.u32 %v5503_v41, 16 }
  0x6c   : > { %5368 = vmatmul.msk.bf16.vlgmr.msrb.gmra.mxu2 %vm658_vm4, %v1217_v43  ;;  %v2158_v34 = vpack.c.b16 %v2127_v22, %v2126_v19  ;;  %v1772_v40 = vrot.slane %v1771_v32, 4  ;;  %v1782_v44 = vrot.slane %v1781_v37, 4  ;;  %v1218_v49 = vpack.c.b16 %v1188_v39, %v1187_v1  ;;  %v5891_v43 = vld [vmem:[%s6199_s27 + $0x18] sm:$0xff]  ;;  %v5506_v19 = vld [vmem:[%s6199_s27 + $0x30] sm:$0xf]  ;;  %v5892_v32 = vld [vmem:[%s6199_s27 + $0x24] sm:$0xff] }
  0x6d   : > { %v1798_v55 = vshll.u32 %v5504_v46, 16  ;;  %v1802_v2 = vshrl.u32 %v5504_v46, 16  ;;  %v5353_v58 = vrot.slane %v1022_v50, 9  ;;  %v1089_v60 = vrot.slane %v1087_v51, 4  ;;  %v5507_v22 = vld [vmem:[%s6199_s27 + $0x34] sm:$0xf] }
  0x6e   : > { %v1777_v53 = vsel %vm6211_vm3, %v1772_v40, %v1776_v26  ;;  %v1787_v57 = vsel %vm6211_vm3, %v1782_v44, %v1786_v45  ;;  %v1090_v63 = vrot.slane %v6319_v0, 5  ;;  %v1791_v61 = vrot.slane %v1789_v52, 4  ;;  %v5508_v45 = vld [vmem:[%s6199_s27 + $0x38] sm:$0x1] }
  0x6f   : > { %v2128_v59 = vunpack.c.l.b16 %v1777_v53  ;;  %v2129_v62 = vunpack.c.l.b16 %v1787_v57  ;;  %v1794_v3 = vrot.slane %v1792_v54, 5  ;;  %v1800_v4 = vrot.slane %v1798_v55, 5  ;;  %v5510_v57 = vld [vmem:[%s6199_s27 + $0x40] sm:$0xf] }
  0x70   : > { %v1804_v5 = vrot.slane %v1802_v2, 4  ;;  %v1088_v7 = vsel %vm6385_vm7, %v5353_v58, %v1087_v51  ;;  %v1091_v8 = vsel %vm6385_vm7, %v1089_v60, %v1090_v63  ;;  %v1808_v0 = vshll.u32 %v5505_v6, 16  ;;  %v5509_v2 = vld [vmem:[%s6199_s27 + $0x3c] sm:$0xf]  ;;  %v6085_v63 = vld [vmem:[%s6199_s27 + $0x34] sm:$0xf] }
  0x71   : > { %5481 = vmatmul.msk.bf16.vlgmr.msrb.gmra.mxu3 %vm658_vm4, %v5890_v15  ;;  %v2159_v9 = vpack.c.b16 %v2129_v62, %v2128_v59  ;;  %v1795_v10 = vor.u32 %v1794_v3, %v1791_v61  ;;  %v1189_v13 = vunpack.c.l.b16 %v1088_v7  ;;  %v1190_v14 = vunpack.c.l.b16 %v1091_v8  ;;  %v1024_v62 = vld [vmem:[%s6199_s27 + $0x30] sm:$0xe] }
  0x72   : > { %v1805_v11 = vor.u32 %v1804_v5, %v1800_v4  ;;  %v1810_v17 = vrot.slane %v1808_v0, 5  ;;  %v1094_v23 = vrot.slane %v6362_v42, 5  ;;  %v1813_v30 = vshrl.u32 %v5506_v19, 16  ;;  %v6086_v0 = vld [vmem:[%s6199_s27 + $0x38] sm:$0x1] }
  0x73   : > { %v1796_v15 = vrot.slane %v1795_v10, 4  ;;  %v1219_v28 = vpack.c.b16 %v1190_v14, %v1189_v13  ;;  %v1816_v31 = vshll.u32 %v5506_v19, 16  ;;  %v1822_v33 = vshll.u32 %v5507_v22, 16  ;;  %v5893_v13 = vld [vmem:[%s6199_s27 + $0x30] sm:$0xff] }
  0x74   : > { %v1806_v16 = vrot.slane %v1805_v11, 4  ;;  %v1096_v37 = vrot.slane %v1094_v23, 4  ;;  %v1097_v42 = vrot.slane %v6366_v48, 5  ;;  %v1815_v39 = vrot.slane %v1813_v30, 4  ;;  %v5877_v48 = vld [vmem:[%s6199_s27 + $0x24] sm:$0xff] }
  0x75   : > { %v1801_v24 = vsel %vm6211_vm3, %v1796_v15, %v1800_v4  ;;  %v1818_v40 = vrot.slane %v1816_v31, 5  ;;  %v1824_v41 = vrot.slane %v1822_v33, 5  ;;  %v1832_v53 = vshll.u32 %v5508_v45, 16  ;;  %v5878_v33 = vld [vmem:[%s6199_s27 + $0x30] sm:$0xff] }
  0x76   : > { %5546 = vmatmul.msk.bf16.vlgmr.msrb.gmra.mxu0 %vm658_vm4, %v2158_v34  ;;  %v1811_v26 = vsel %vm6211_vm3, %v1806_v16, %v1810_v17  ;;  %v1826_v34 = vshrl.u32 %v5507_v22, 16  ;;  %v2130_v38 = vunpack.c.l.b16 %v1801_v24  ;;  %v1101_v61 = vrot.slane %v6085_v63, 5  ;;  %v5511_v22 = vld [vmem:[%s6199_s27 + $0x44] sm:$0x1] }
  0x77   : > { %5336 = vmatmul.msk.bf16.gmra.mxu1 %vm658_vm4, %v5875_v35  ;;  %v5354_v35 = vrot.slane %v1023_v29, 9  ;;  %v2131_v1 = vunpack.c.l.b16 %v1811_v26  ;;  %v1819_v51 = vor.u32 %v1818_v40, %v1815_v39  ;;  %v1834_v59 = vrot.slane %v1832_v53, 5  ;;  %v5512_v39 = vld [vmem:[%s6199_s27 + $0x48] sm:$0xf]  ;;  %v5513_v40 = vld [vmem:[%s6199_s27 + $0x4c] sm:$0xf] }
  0x78   : > { %v1828_v44 = vrot.slane %v1826_v34, 4  ;;  %v1837_v3 = vshrl.u32 %v5509_v2, 16  ;;  %v1840_v4 = vshll.u32 %v5509_v2, 16  ;;  %v1846_v5 = vshll.u32 %v5510_v57, 16  ;;  %v5894_v2 = vld [vmem:[%s6199_s27 + $0x3c] sm:$0xff] }
  0x79   : > { %v1095_v46 = vsel %vm6385_vm7, %v5354_v35, %v1094_v23  ;;  %v2160_v50 = vpack.c.b16 %v2131_v1, %v2130_v38  ;;  %v1820_v58 = vrot.slane %v1819_v51, 4  ;;  %v1850_v6 = vshrl.u32 %v5510_v57, 16 }
  0x7a   : > { %v1829_v52 = vor.u32 %v1828_v44, %v1824_v41  ;;  %v1191_v54 = vunpack.c.l.b16 %v1095_v46  ;;  %v5355_v10 = vrot.slane %v1024_v62, 9  ;;  %v1103_v11 = vrot.slane %v1101_v61, 4 }
  0x7b   : > { %v1825_v8 = vsel %vm6211_vm3, %v1820_v58, %v1824_v41  ;;  %v1839_v14 = vrot.slane %v1837_v3, 4  ;;  %v1842_v15 = vrot.slane %v1840_v4, 5  ;;  %v1848_v16 = vrot.slane %v1846_v5, 5  ;;  %v5514_v4 = vld [vmem:[%s6199_s27 + $0x50] sm:$0x1] }
  0x7c   : > { %5369 = vmatmul.msk.bf16.gmra.mxu2 %vm658_vm4, %v1218_v49  ;;  %v1098_v49 = vsel %vm6385_vm7, %v1096_v37, %v1097_v42  ;;  %v1852_v17 = vrot.slane %v1850_v6, 4  ;;  %v1102_v23 = vsel %vm6385_vm7, %v5355_v10, %v1101_v61  ;;  %v1856_v30 = vshll.u32 %v5511_v22, 16 }
  0x7d   : > { %v1192_v55 = vunpack.c.l.b16 %v1098_v49  ;;  %v1843_v26 = vor.u32 %v1842_v15, %v1839_v14  ;;  %v1861_v51 = vshrl.u32 %v5512_v39, 16  ;;  %v1870_v53 = vshll.u32 %v5513_v40, 16 }
  0x7e   : > { %v1853_v29 = vor.u32 %v1852_v17, %v1848_v16  ;;  %v1858_v1 = vrot.slane %v1856_v30, 5 }
  0x7f   : > { %v1220_v60 = vpack.c.b16 %v1192_v55, %v1191_v54  ;;  %v1844_v42 = vrot.slane %v1843_v26, 4  ;;  %v1874_v54 = vshrl.u32 %v5513_v40, 16  ;;  %v1872_v62 = vrot.slane %v1870_v53, 5 }
  0x80   : > { %v1854_v38 = vrot.slane %v1853_v29, 4  ;;  %v1115_v26 = vrot.slane %v6283_v47, 5 }
  0x81   : > { %5482 = vmatmul.msk.bf16.gmra.mxu3 %vm658_vm4, %v5891_v43  ;;  %v1830_v43 = vrot.slane %v1829_v52, 4  ;;  %v1849_v45 = vsel %vm6211_vm3, %v1844_v42, %v1848_v16  ;;  %v1864_v52 = vshll.u32 %v5512_v39, 16  ;;  %v1876_v3 = vrot.slane %v1874_v54, 4  ;;  %v5517_v54 = vld [vmem:[%s6199_s27 + $0x5c] sm:$0x1] }
  0x82   : > { %v1859_v46 = vsel %vm6211_vm3, %v1854_v38, %v1858_v1  ;;  %v2134_v55 = vunpack.c.l.b16 %v1849_v45  ;;  %v5895_v1 = vld [vmem:[%s6199_s27 + $0x48] sm:$0xff]  ;;  %v1117_v40 = vrot.slane %v1115_v26, 4 }
  0x83   : > { %v2135_v57 = vunpack.c.l.b16 %v1859_v46  ;;  %v1866_v61 = vrot.slane %v1864_v52, 5  ;;  %v1877_v10 = vor.u32 %v1876_v3, %v1872_v62 }
  0x85   : > { %v1878_v16 = vrot.slane %v1877_v10, 4 }
  0x86   : > { %5547 = vmatmul.msk.bf16.gmra.mxu0 %vm658_vm4, %v2159_v9  ;;  %v1835_v9 = vsel %vm6211_vm3, %v1830_v43, %v1834_v59 }
  0x87   : > { %5337 = vmatmul.msk.bf16.gmra.mxu1 %vm658_vm4, %v5876_v12  ;;  %v1104_v12 = vrot.slane %v6086_v0, 5  ;;  %v2133_v19 = vunpack.c.l.b16 %v1835_v9 }
  0x89   : > { %v1105_v24 = vsel %vm6385_vm7, %v1103_v11, %v1104_v12  ;;  %v1880_v11 = vshll.u32 %v5514_v4, 16  ;;  %v5879_v12 = vld [vmem:[%s6199_s27 + $0x3c] sm:$0xff] }
  0x8a   : > { %v1194_v35 = vunpack.c.l.b16 %v1105_v24  ;;  %v5516_v24 = vld [vmem:[%s6199_s27 + $0x58] sm:$0xf]  ;;  %v5518_v4 = vld [vmem:[%s6199_s27 + $0x60] sm:$0xf] }
  0x8b   : > { %v1882_v17 = vrot.slane %v1880_v11, 5  ;;  %v1898_v42 = vshrl.u32 %v5516_v24, 16 }
  0x8c   : > { %5370 = vmatmul.msk.bf16.gmra.mxu2 %vm658_vm4, %v1219_v28  ;;  %v2132_v28 = vunpack.c.l.b16 %v1825_v8  ;;  %v2162_v8 = vpack.c.b16 %v2135_v57, %v2134_v55 }
  0x8d   : > { %v1883_v30 = vsel %vm6211_vm3, %v1878_v16, %v1882_v17  ;;  %v1900_v52 = vrot.slane %v1898_v42, 4 }
  0x8e   : > { %v2161_v31 = vpack.c.b16 %v2133_v19, %v2132_v28  ;;  %v2137_v46 = vunpack.c.l.b16 %v1883_v30 }
  0x91   : > { %5483 = vmatmul.msk.bf16.gmra.mxu3 %vm658_vm4, %v5892_v32  ;;  %v1193_v32 = vunpack.c.l.b16 %v1102_v23  ;;  %v5515_v23 = vld [vmem:[%s6199_s27 + $0x54] sm:$0xf] }
  0x93   : > { %v1221_v44 = vpack.c.b16 %v1194_v35, %v1193_v32  ;;  %v1888_v32 = vshll.u32 %v5515_v23, 16  ;;  %v1894_v35 = vshll.u32 %v5516_v24, 16 }
  0x96   : > { %5548 = vmatmul.msk.bf16.gmra.mxu0 %vm658_vm4, %v2160_v50  ;;  %v1108_v50 = vrot.slane %v6239_v20, 5  ;;  %v1863_v20 = vrot.slane %v1861_v51, 4  ;;  %v1896_v51 = vrot.slane %v1894_v35, 5  ;;  %v1125_v35 = vrot.slane %v6334_v27, 5 }
  0x97   : > { %5338 = vmatmul.msk.bf16.gmra.mxu1 %vm658_vm4, %v5877_v48  ;;  %v1025_v48 = vld [vmem:[%s6199_s27 + $0x3c] sm:$0xe] }
  0x98   : > { %v5356_v43 = vrot.slane %v1025_v48, 9  ;;  %v1110_v59 = vrot.slane %v1108_v50, 4  ;;  %v1890_v48 = vrot.slane %v1888_v32, 5 }
  0x9a   : > { %v1109_v5 = vsel %vm6385_vm7, %v5356_v43, %v1108_v50  ;;  %v5880_v43 = vld [vmem:[%s6199_s27 + $0x48] sm:$0xff] }
  0x9c   : > { %v6480_v7 = vpop.f32.mrf.mxu1  ;;  %5371 = vmatmul.msk.bf16.gmra.mxu2 %vm658_vm4, %v1220_v60  ;;  %v1111_v60 = vrot.slane %v6244_v25, 5  ;;  %v1867_v25 = vor.u32 %v1866_v61, %v1863_v20  ;;  %v1904_v20 = vshll.u32 %v5517_v54, 16  ;;  %v5881_v54 = vld [vmem:[%s6199_s27 + $0x54] sm:$0xff] }
  0x9e   : > { %v1112_v6 = vsel %vm6385_vm7, %v1110_v59, %v1111_v60  ;;  %v1868_v15 = vrot.slane %v1867_v25, 4  ;;  %v1901_v60 = vor.u32 %v1900_v52, %v1896_v51  ;;  %v1906_v10 = vrot.slane %v1904_v20, 5 }
  0x9f   : > { %v1196_v14 = vunpack.c.l.b16 %v1112_v6 }
  0xa0   : > { %v1873_v29 = vsel %vm6211_vm3, %v1868_v15, %v1872_v62  ;;  %v1902_v25 = vrot.slane %v1901_v60, 4  ;;  %v1122_v15 = vrot.slane %v6329_v21, 5 }
  0xa1   : > { %5484 = vmatmul.msk.bf16.gmra.mxu3 %vm658_vm4, %v5893_v13  ;;  %v1195_v13 = vunpack.c.l.b16 %v1109_v5  ;;  %v2136_v45 = vunpack.c.l.b16 %v1873_v29  ;;  %v5519_v5 = vld [vmem:[%s6199_s27 + $0x64] sm:$0xf] }
  0xa2   : > { %v1922_v16 = vshrl.u32 %v5519_v5, 16  ;;  %v1907_v24 = vsel %vm6211_vm3, %v1902_v25, %v1906_v10  ;;  %v1124_v32 = vrot.slane %v1122_v15, 4  ;;  %v6087_v10 = vld [vmem:[%s6199_s27 + $0x64] sm:$0xf] }
  0xa3   : > { %v1222_v19 = vpack.c.b16 %v1196_v14, %v1195_v13  ;;  %v2163_v57 = vpack.c.b16 %v2137_v46, %v2136_v45  ;;  %v1912_v13 = vshll.u32 %v5518_v4, 16  ;;  %v1918_v14 = vshll.u32 %v5519_v5, 16 }
  0xa4   : > { %v6496_v34 = vpop.f32.mrf.mxu1  ;;  %v1924_v42 = vrot.slane %v1922_v16, 4 }
  0xa5   : > { %v1914_v30 = vrot.slane %v1912_v13, 5  ;;  %v1028_v13 = vld [vmem:[%s6199_s27 + $0x60] sm:$0xe] }
  0xa6   : > { %v6498_v37 = vpop.f32.mrf.mxu2  ;;  %5549 = vmatmul.msk.bf16.gmra.mxu0 %vm658_vm4, %v2161_v31  ;;  %v1026_v31 = vld [vmem:[%s6199_s27 + $0x48] sm:$0xe] }
  0xa7   : > { %5339 = vmatmul.msk.bf16.gmra.mxu1 %vm658_vm4, %v5878_v33  ;;  %v1885_v33 = vshrl.u32 %v5515_v23, 16  ;;  %v5357_v47 = vrot.slane %v1026_v31, 9  ;;  %v1920_v31 = vrot.slane %v1918_v14, 5 }
  0xa9   : > { %v6504_v41 = vpop.f32.mrf.mxu0  ;;  %v1887_v50 = vrot.slane %v1885_v33, 4  ;;  %v5896_v33 = vld [vmem:[%s6199_s27 + $0x54] sm:$0xff]  ;;  %v1925_v27 = vor.u32 %v1924_v42, %v1920_v31 }
  0xaa   : > { %v6510_v49 = vpop.f32.mrf.mxu3 }
  0xab   : > { %v1891_v59 = vor.u32 %v1890_v48, %v1887_v50  ;;  %v1126_v48 = vsel %vm6385_vm7, %v1124_v32, %v1125_v35  ;;  %v1926_v60 = vrot.slane %v1925_v27, 4 }
  0xac   : > { %5372 = vmatmul.msk.bf16.gmra.mxu2 %vm658_vm4, %v1221_v44  ;;  %v1118_v44 = vrot.slane %v6288_v56, 5 }
  0xae   : > { %v6516_v58 = vpop.f32.mrf.mxu1  ;;  %v6519_v63 = vpop.f32.mrf.mxu2  ;;  %v1119_v56 = vsel %vm6385_vm7, %v1117_v40, %v1118_v44  ;;  %v5520_v40 = vld [vmem:[%s6199_s27 + $0x68] sm:$0x1] }
  0xaf   : > { %v1198_v62 = vunpack.c.l.b16 %v1119_v56 }
  0xb1   : > { %5485 = vmatmul.msk.bf16.gmra.mxu3 %vm658_vm4, %v5894_v2  ;;  %v6527_v9 = vpop.f32.mrf.mxu0  ;;  %v1116_v2 = vsel %vm6385_vm7, %v5357_v47, %v1115_v26  ;;  %v2139_v47 = vunpack.c.l.b16 %v1907_v24 }
  0xb2   : > { %v6529_v0 = vpop.f32.mrf.mxu3  ;;  %v1197_v61 = vunpack.c.l.b16 %v1116_v2 }
  0xb4   : > { %v1223_v11 = vpack.c.b16 %v1198_v62, %v1197_v61  ;;  %v5521_v61 = vld [vmem:[%s6199_s27 + $0x6c] sm:$0xf]  ;;  %v5522_v62 = vld [vmem:[%s6199_s27 + $0x70] sm:$0xf] }
  0xb5   : > { %v1933_v14 = vshrl.u32 %v5521_v61, 16  ;;  %v1942_v16 = vshll.u32 %v5522_v62, 16 }
  0xb6   : > { %5550 = vmatmul.msk.bf16.gmra.mxu0 %vm658_vm4, %v2162_v8  ;;  %v6533_v28 = vpop.f32.mrf.mxu1  ;;  %v1892_v8 = vrot.slane %v1891_v59, 4 }
  0xb7   : > { %5340 = vmatmul.msk.bf16.gmra.mxu1 %vm658_vm4, %v5879_v12  ;;  %v1909_v12 = vshrl.u32 %v5518_v4, 16  ;;  %v1935_v35 = vrot.slane %v1933_v14, 4  ;;  %v5525_v14 = vld [vmem:[%s6199_s27 + $0x7c] sm:$0xf] }
  0xb8   : > { %v1897_v23 = vsel %vm6211_vm3, %v1892_v8, %v1896_v51  ;;  %v1928_v51 = vshll.u32 %v5520_v40, 16 }
  0xb9   : > { %v6536_v22 = vpop.f32.mrf.mxu2  ;;  %v1911_v29 = vrot.slane %v1909_v12, 4 }
  0xba   : > { %v1930_v20 = vrot.slane %v1928_v51, 5 }
  0xbb   : > { %v1915_v46 = vor.u32 %v1914_v30, %v1911_v29  ;;  %v5897_v30 = vld [vmem:[%s6199_s27 + $0x60] sm:$0xff] }
  0xbc   : > { %5373 = vmatmul.msk.bf16.gmra.mxu2 %vm658_vm4, %v1222_v19  ;;  %v1027_v19 = vld [vmem:[%s6199_s27 + $0x54] sm:$0xe]  ;;  %v1931_v25 = vsel %vm6211_vm3, %v1926_v60, %v1930_v20 }
  0xbd   : > { %v6546_v38 = vpop.f32.mrf.mxu0  ;;  %v5358_v21 = vrot.slane %v1027_v19, 9  ;;  %v1916_v59 = vrot.slane %v1915_v46, 4  ;;  %v1946_v19 = vshrl.u32 %v5522_v62, 16  ;;  %v5523_v46 = vld [vmem:[%s6199_s27 + $0x74] sm:$0x1] }
  0xbe   : > { %v6550_v39 = vpop.f32.mrf.mxu3 }
  0xbf   : > { %v1123_v50 = vsel %vm6385_vm7, %v5358_v21, %v1122_v15  ;;  %v1921_v8 = vsel %vm6211_vm3, %v1916_v59, %v1920_v31  ;;  %v1936_v15 = vshll.u32 %v5521_v61, 16  ;;  %v5359_v21 = vrot.slane %v1028_v13, 9  ;;  %v5524_v13 = vld [vmem:[%s6199_s27 + $0x78] sm:$0xf] }
  0xc0   : > { %v6553_v53 = vpop.f32.mrf.mxu1  ;;  %v1199_v56 = vunpack.c.l.b16 %v1123_v50  ;;  %v2140_v31 = vunpack.c.l.b16 %v1921_v8 }
  0xc1   : > { %5486 = vmatmul.msk.bf16.gmra.mxu3 %vm658_vm4, %v5895_v1  ;;  %v6557_v55 = vpop.f32.mrf.mxu2  ;;  %v2138_v1 = vunpack.c.l.b16 %v1897_v23  ;;  %v6088_v23 = vld [vmem:[%s6199_s27 + $0x68] sm:$0x1]  ;;  %v1938_v42 = vrot.slane %v1936_v15, 5  ;;  %v6089_v15 = vld [vmem:[%s6199_s27 + $0x70] sm:$0xf] }
  0xc2   : > { %v1132_v24 = vrot.slane %v6088_v23, 5  ;;  %v1029_v23 = vld [vmem:[%s6199_s27 + $0x6c] sm:$0xe] }
  0xc3   : > { %v2164_v52 = vpack.c.b16 %v2139_v47, %v2138_v1  ;;  %v1944_v1 = vrot.slane %v1942_v16, 5  ;;  %v1948_v47 = vrot.slane %v1946_v19, 4  ;;  %v1939_v51 = vor.u32 %v1938_v42, %v1935_v35  ;;  %v6090_v42 = vld [vmem:[%s6199_s27 + $0x74] sm:$0x1] }
  0xc4   : > { %v1136_v16 = vrot.slane %v6089_v15, 5 }
  0xc5   : > { %v6564_v3 = vpop.f32.mrf.mxu0 }
  0xc6   : > { %5551 = vmatmul.msk.bf16.gmra.mxu0 %vm658_vm4, %v2163_v57  ;;  %v6569_v6 = vpop.f32.mrf.mxu3  ;;  %v1200_v57 = vunpack.c.l.b16 %v1126_v48 }
  0xc7   : > { %5341 = vmatmul.msk.bf16.gmra.mxu1 %vm658_vm4, %v5880_v43 }
  0xc8   : > { %v6573_v17 = vpop.f32.mrf.mxu1  ;;  %v1224_v4 = vpack.c.b16 %v1200_v57, %v1199_v56  ;;  %v5882_v57 = vld [vmem:[%s6199_s27 + $0x60] sm:$0xff] }
  0xcc   : > { %v6580_v26 = vpop.f32.mrf.mxu2  ;;  %5374 = vmatmul.msk.bf16.gmra.mxu2 %vm658_vm4, %v1223_v11  ;;  %v1129_v11 = vrot.slane %v6087_v10, 5 }
  0xce   : > { %v1131_v32 = vrot.slane %v1129_v11, 4  ;;  %v1130_v50 = vsel %vm6385_vm7, %v5359_v21, %v1129_v11  ;;  %v1970_v21 = vshrl.u32 %v5525_v14, 16 }
  0xcf   : > { %v6586_v44 = vpop.f32.mrf.mxu0  ;;  %v1201_v20 = vunpack.c.l.b16 %v1130_v50  ;;  %v5360_v50 = vrot.slane %v1029_v23, 9 }
  0xd0   : > { %v6588_v45 = vpop.f32.mrf.mxu3  ;;  %v1133_v48 = vsel %vm6385_vm7, %v1131_v32, %v1132_v24 }
  0xd1   : > { %5487 = vmatmul.msk.bf16.gmra.mxu3 %vm658_vm4, %v5896_v33  ;;  %v2141_v33 = vunpack.c.l.b16 %v1931_v25  ;;  %v1202_v61 = vunpack.c.l.b16 %v1133_v48  ;;  %v1138_v48 = vrot.slane %v1136_v16, 4 }
  0xd3   : > { %v2165_v27 = vpack.c.b16 %v2141_v33, %v2140_v31  ;;  %v1225_v11 = vpack.c.b16 %v1202_v61, %v1201_v20  ;;  %v1960_v31 = vshll.u32 %v5524_v13, 16  ;;  %v1966_v33 = vshll.u32 %v5525_v14, 16 }
  0xd4   : > { %v6596_v2 = vpop.f32.mrf.mxu1  ;;  %v6598_v43 = vpop.f32.mrf.mxu2  ;;  %v1972_v20 = vrot.slane %v1970_v21, 4 }
  0xd6   : > { %5552 = vmatmul.msk.bf16.gmra.mxu0 %vm658_vm4, %v2164_v52  ;;  %v1949_v52 = vor.u32 %v1948_v47, %v1944_v1  ;;  %v1139_v47 = vrot.slane %v6090_v42, 5 }
  0xd7   : > { %5342 = vmatmul.msk.bf16.gmra.mxu1 %vm658_vm4, %v5881_v54  ;;  %v6604_v5 = vpop.f32.mrf.mxu0  ;;  %v1952_v54 = vshll.u32 %v5523_v46, 16  ;;  %v5898_v46 = vld [vmem:[%s6199_s27 + $0x6c] sm:$0xff] }
  0xd8   : > { %v6611_v12 = vpop.f32.mrf.mxu3  ;;  %v1950_v8 = vrot.slane %v1949_v52, 4 }
  0xd9   : > { %v1954_v25 = vrot.slane %v1952_v54, 5 }
  0xdc   : > { %5375 = vmatmul.msk.bf16.gmra.mxu2 %vm658_vm4, %v1224_v4  ;;  %v6616_v29 = vpop.f32.mrf.mxu1  ;;  %v1940_v4 = vrot.slane %v1939_v51, 4 }
  0xde   : > { %v1945_v19 = vsel %vm6211_vm3, %v1940_v4, %v1944_v1  ;;  %v5526_v4 = vld [vmem:[%s6199_s27 + $0x80] sm:$0x1] }
  0xdf   : > { %v6619_v40 = vpop.f32.mrf.mxu2 }
  0xe1   : > { %5488 = vmatmul.msk.bf16.gmra.mxu3 %vm658_vm4, %v5897_v30  ;;  %v1957_v30 = vshrl.u32 %v5524_v13, 16  ;;  %v5883_v13 = vld [vmem:[%s6199_s27 + $0x6c] sm:$0xff] }
  0xe3   : > { %v6627_v56 = vpop.f32.mrf.mxu0  ;;  %v1959_v54 = vrot.slane %v1957_v30, 4 }
  0xe4   : > { %v6630_v59 = vpop.f32.mrf.mxu3  ;;  %v940_v60 = vpop.f32.mrf.mxu1 }
  0xe5   : > { %v941_v62 = vadd.f32 %v940_v60, %v6504_v41  ;;  %v1955_v41 = vsel %vm6211_vm3, %v1950_v8, %v1954_v25  ;;  %v1968_v60 = vrot.slane %v1966_v33, 5  ;;  %v1137_v8 = vsel %vm6385_vm7, %v5360_v50, %v1136_v16 }
  0xe6   : > { %5553 = vmatmul.msk.bf16.gmra.mxu0 %vm658_vm4, %v2165_v27  ;;  %v2142_v27 = vunpack.c.l.b16 %v1945_v19  ;;  %v2143_v51 = vunpack.c.l.b16 %v1955_v41  ;;  %v1976_v19 = vshll.u32 %v5526_v4, 16 }
  0xe7   : > { %v6634_v10 = vpop.f32.mrf.mxu2  ;;  %5343 = vmatmul.msk.bf16.gmra.mxu1 %vm658_vm4, %v5882_v57  ;;  %v1962_v57 = vrot.slane %v1960_v31, 5  ;;  %v1973_v15 = vor.u32 %v1972_v20, %v1968_v60 }
  0xe8   : > { %v2166_v25 = vpack.c.b16 %v2143_v51, %v2142_v27  ;;  %v1978_v42 = vrot.slane %v1976_v19, 5  ;;  %v5528_v27 = vld [vmem:[%s6199_s27 + $0x88] sm:$0xf]  ;;  %v6091_v51 = vld [vmem:[%s6199_s27 + $0x7c] sm:$0xf] }
  0xe9   : > { %v1963_v14 = vor.u32 %v1962_v57, %v1959_v54  ;;  %v1030_v54 = vld [vmem:[%s6199_s27 + $0x78] sm:$0xe] }
  0xeb   : > { %v6645_v24 = vpop.f32.mrf.mxu0  ;;  %v1964_v21 = vrot.slane %v1963_v14, 4 }
  0xec   : > { %v6647_v32 = vpop.f32.mrf.mxu3  ;;  %5376 = vmatmul.msk.bf16.gmra.mxu2 %vm658_vm4, %v1225_v11  ;;  %v942_v35 = vpop.f32.mrf.mxu1 }
  0xed   : > { %v943_v1 = vadd.f32 %v942_v35, %v6527_v9  ;;  %v1140_v9 = vsel %vm6385_vm7, %v1138_v48, %v1139_v47  ;;  %v1974_v35 = vrot.slane %v1973_v15, 4  ;;  %v5527_v47 = vld [vmem:[%s6199_s27 + $0x84] sm:$0xf]  ;;  %v5899_v15 = vld [vmem:[%s6199_s27 + $0x78] sm:$0xff] }
  0xee   : > { %v1204_v30 = vunpack.c.l.b16 %v1140_v9  ;;  %v1984_v57 = vshll.u32 %v5527_v47, 16  ;;  %v1994_v9 = vshrl.u32 %v5528_v27, 16 }
  0xef   : > { %v1293_v52 = vpop.f32.mrf.mxu2  ;;  %v1979_v4 = vsel %vm6211_vm3, %v1974_v35, %v1978_v42 }
  0xf0   : > { %v1373_v61 = vadd.f32 %v1293_v52, %v941_v62  ;;  %v1203_v62 = vunpack.c.l.b16 %v1137_v8  ;;  %v1143_v52 = vrot.slane %v6091_v51, 5  ;;  %v1990_v8 = vshll.u32 %v5528_v27, 16 }
  0xf1   : > { %5489 = vmatmul.msk.bf16.gmra.mxu3 %vm658_vm4, %v5898_v46  ;;  %v1996_v35 = vrot.slane %v1994_v9, 4 }
  0xf2   : > { %v1226_v48 = vpack.c.b16 %v1204_v30, %v1203_v62 }
  0xf3   : > { %v2234_v11 = vpop.f32.mrf.mxu0 }
  0xf4   : > { %v1580_v41 = vpop.f32.mrf.mxu3  ;;  %v945_v23 = vpop.f32.mrf.mxu1 }
  0xf5   : > { %v1660_v31 = vadd.f32 %v1580_v41, %v1373_v61  ;;  %v946_v16 = vadd.f32 %v945_v23, %v6546_v38  ;;  %v1981_v38 = vshrl.u32 %v5527_v47, 16  ;;  %v1969_v61 = vsel %vm6211_vm3, %v1964_v21, %v1968_v60 }
  0xf6   : > { %5554 = vmatmul.msk.bf16.gmra.mxu0 %vm658_vm4, %v2166_v25  ;;  %v6092_v25 = vld [vmem:[%s6199_s27 + $0x80] sm:$0x1]  ;;  %v5361_v41 = vrot.slane %v1030_v54, 9  ;;  %v1145_v23 = vrot.slane %v1143_v52, 4  ;;  %v2144_v62 = vunpack.c.l.b16 %v1969_v61  ;;  %v2145_v60 = vunpack.c.l.b16 %v1979_v4 }
  0xf7   : > { %v1295_v33 = vpop.f32.mrf.mxu2  ;;  %5344 = vmatmul.msk.bf16.gmra.mxu1 %vm658_vm4, %v5883_v13  ;;  %v6664_v46 = vadd.f32 %v2234_v11, %v1660_v31  ;;  %v1146_v11 = vrot.slane %v6092_v25, 5  ;;  %v1983_v30 = vrot.slane %v1981_v38, 4  ;;  %v1986_v31 = vrot.slane %v1984_v57, 5  ;;  %v5884_v38 = vld [vmem:[%s6199_s27 + $0x78] sm:$0xff] }
  0xf8   : > { %v1374_v50 = vadd.f32 %v1295_v33, %v943_v1  ;;  %v1992_v21 = vrot.slane %v1990_v8, 5  ;;  %v2167_v27 = vpack.c.b16 %v2145_v60, %v2144_v62  ;;  %v5531_v62 = vld [vmem:[%s6199_s27 + $0x94] sm:$0xf]  ;;  %v6093_v60 = vld [vmem:[%s6199_s27 + $0x88] sm:$0xf] }
  0xf9   : > { %v1987_v51 = vor.u32 %v1986_v31, %v1983_v30  ;;  %v1150_v30 = vrot.slane %v6093_v60, 5  ;;  %v1031_v31 = vld [vmem:[%s6199_s27 + $0x84] sm:$0xe] }
  0xfa   : > { %v1997_v57 = vor.u32 %v1996_v35, %v1992_v21 }
  0xfb   : > { %v2236_v20 = vpop.f32.mrf.mxu0  ;;  %v1988_v25 = vrot.slane %v1987_v51, 4 }
  0xfc   : > { %v1582_v1 = vpop.f32.mrf.mxu3  ;;  %5377 = vmatmul.msk.bf16.gmra.mxu2 %vm658_vm4, %v1226_v48  ;;  %v947_v13 = vpop.f32.mrf.mxu1  ;;  %v5529_v48 = vld [vmem:[%s6199_s27 + $0x8c] sm:$0x1] }
  0xfd   : > { %v1661_v14 = vadd.f32 %v1582_v1, %v1374_v50  ;;  %v948_v19 = vadd.f32 %v947_v13, %v6564_v3  ;;  %v1144_v50 = vsel %vm6385_vm7, %v5361_v41, %v1143_v52  ;;  %v1147_v3 = vsel %vm6385_vm7, %v1145_v23, %v1146_v11 }
  0xfe   : > { %v2000_v61 = vshll.u32 %v5529_v48, 16  ;;  %v1206_v8 = vunpack.c.l.b16 %v1147_v3  ;;  %v1998_v1 = vrot.slane %v1997_v57, 4  ;;  %v2018_v3 = vshrl.u32 %v5531_v62, 16  ;;  %v5900_v57 = vld [vmem:[%s6199_s27 + $0x84] sm:$0xff] }
  0xff   : > { %v1298_v33 = vpop.f32.mrf.mxu2  ;;  %v6677_v42 = vadd.f32 %v2236_v20, %v1661_v14  ;;  %v5530_v14 = vld [vmem:[%s6199_s27 + $0x90] sm:$0xf] }
 0x100   : > { %v1375_v47 = vadd.f32 %v1298_v33, %v946_v16  ;;  %v1205_v16 = vunpack.c.l.b16 %v1144_v50  ;;  %v2002_v13 = vrot.slane %v2000_v61, 5  ;;  %v2005_v33 = vshrl.u32 %v5530_v14, 16 }
 0x101   : > { %5490 = vmatmul.msk.bf16.gmra.mxu3 %vm658_vm4, %v5899_v15  ;;  %v2008_v48 = vshll.u32 %v5530_v14, 16  ;;  %v2014_v50 = vshll.u32 %v5531_v62, 16  ;;  %v5362_v61 = vrot.slane %v1031_v31, 9 }
 0x102   : > { %v1227_v23 = vpack.c.b16 %v1206_v8, %v1205_v16  ;;  %v2007_v8 = vrot.slane %v2005_v33, 4 }
 0x103   : > { %v2239_v54 = vpop.f32.mrf.mxu0 }
 0x104   : > { %v1585_v4 = vpop.f32.mrf.mxu3  ;;  %v950_v20 = vpop.f32.mrf.mxu1 }
 0x105   : > { %v1662_v9 = vadd.f32 %v1585_v4, %v1375_v47  ;;  %v951_v52 = vadd.f32 %v950_v20, %v6586_v44  ;;  %v1993_v44 = vsel %vm6211_vm3, %v1988_v25, %v1992_v21  ;;  %v2003_v47 = vsel %vm6211_vm3, %v1998_v1, %v2002_v13 }
 0x106   : > { %5555 = vmatmul.msk.bf16.gmra.mxu0 %vm658_vm4, %v2167_v27  ;;  %v6094_v27 = vld [vmem:[%s6199_s27 + $0x8c] sm:$0x1]  ;;  %v1152_v4 = vrot.slane %v1150_v30, 4  ;;  %v2146_v20 = vunpack.c.l.b16 %v1993_v44  ;;  %v2147_v16 = vunpack.c.l.b16 %v2003_v47  ;;  %v2010_v25 = vrot.slane %v2008_v48, 5  ;;  %v5885_v44 = vld [vmem:[%s6199_s27 + $0x84] sm:$0xff] }
 0x107   : > { %v1300_v11 = vpop.f32.mrf.mxu2  ;;  %5345 = vmatmul.msk.bf16.gmra.mxu1 %vm658_vm4, %v5884_v38  ;;  %v6690_v15 = vadd.f32 %v2239_v54, %v1662_v9  ;;  %v1153_v51 = vrot.slane %v6094_v27, 5  ;;  %v2020_v1 = vrot.slane %v2018_v3, 4 }
 0x108   : > { %v1376_v41 = vadd.f32 %v1300_v11, %v948_v19  ;;  %v2016_v11 = vrot.slane %v2014_v50, 5  ;;  %v2168_v62 = vpack.c.b16 %v2147_v16, %v2146_v20  ;;  %v2011_v31 = vor.u32 %v2010_v25, %v2007_v8  ;;  %v5534_v20 = vld [vmem:[%s6199_s27 + $0xa0] sm:$0xf]  ;;  %v1032_v25 = vld [vmem:[%s6199_s27 + $0x90] sm:$0xe] }
 0x10a   : > { %v2021_v33 = vor.u32 %v2020_v1, %v2016_v11 }
 0x10b   : > { %v2241_v35 = vpop.f32.mrf.mxu0 }
 0x10c   : > { %v1587_v19 = vpop.f32.mrf.mxu3  ;;  %5378 = vmatmul.msk.bf16.gmra.mxu2 %vm658_vm4, %v1227_v23  ;;  %v952_v54 = vpop.f32.mrf.mxu1  ;;  %v5532_v23 = vld [vmem:[%s6199_s27 + $0x98] sm:$0x1] }
 0x10d   : > { %v1663_v38 = vadd.f32 %v1587_v19, %v1376_v41  ;;  %v953_v21 = vadd.f32 %v952_v54, %v6604_v5  ;;  %v1151_v5 = vsel %vm6385_vm7, %v5362_v61, %v1150_v30  ;;  %v1154_v41 = vsel %vm6385_vm7, %v1152_v4, %v1153_v51  ;;  %v5533_v30 = vld [vmem:[%s6199_s27 + $0x9c] sm:$0xf] }
 0x10e   : > { %v2024_v47 = vshll.u32 %v5532_v23, 16  ;;  %v1208_v50 = vunpack.c.l.b16 %v1154_v41  ;;  %v2012_v19 = vrot.slane %v2011_v31, 4  ;;  %v2022_v54 = vrot.slane %v2021_v33, 4 }
 0x10f   : > { %v1303_v9 = vpop.f32.mrf.mxu2  ;;  %v6703_v13 = vadd.f32 %v2241_v35, %v1663_v38  ;;  %v2029_v16 = vshrl.u32 %v5533_v30, 16  ;;  %v2032_v8 = vshll.u32 %v5533_v30, 16  ;;  %v2042_v41 = vshrl.u32 %v5534_v20, 16 }
 0x110   : > { %v1377_v14 = vadd.f32 %v1303_v9, %v951_v52  ;;  %v1207_v52 = vunpack.c.l.b16 %v1151_v5  ;;  %v2026_v38 = vrot.slane %v2024_v47, 5  ;;  %v6095_v9 = vld [vmem:[%s6199_s27 + $0x94] sm:$0xf]  ;;  %v2038_v5 = vshll.u32 %v5534_v20, 16 }
 0x111   : > { %5491 = vmatmul.msk.bf16.gmra.mxu3 %vm658_vm4, %v5900_v57  ;;  %v2031_v31 = vrot.slane %v2029_v16, 4  ;;  %v2034_v33 = vrot.slane %v2032_v8, 5 }
 0x112   : > { %v1228_v4 = vpack.c.b16 %v1208_v50, %v1207_v52  ;;  %v2027_v23 = vsel %vm6211_vm3, %v2022_v54, %v2026_v38  ;;  %v5363_v52 = vrot.slane %v1032_v25, 9 }
 0x113   : > { %v2244_v60 = vpop.f32.mrf.mxu0  ;;  %v2035_v20 = vor.u32 %v2034_v33, %v2031_v31  ;;  %v5537_v31 = vld [vmem:[%s6199_s27 + $0xac] sm:$0xf] }
 0x114   : > { %v1590_v48 = vpop.f32.mrf.mxu3  ;;  %v955_v35 = vpop.f32.mrf.mxu1 }
 0x115   : > { %v1664_v3 = vadd.f32 %v1590_v48, %v1377_v14  ;;  %v956_v27 = vadd.f32 %v955_v35, %v6627_v56  ;;  %v1157_v56 = vrot.slane %v6095_v9, 5  ;;  %v2017_v14 = vsel %vm6211_vm3, %v2012_v19, %v2016_v11  ;;  %v5901_v48 = vld [vmem:[%s6199_s27 + $0x90] sm:$0xff] }
 0x116   : > { %5556 = vmatmul.msk.bf16.gmra.mxu0 %vm658_vm4, %v2168_v62  ;;  %v6096_v62 = vld [vmem:[%s6199_s27 + $0x98] sm:$0x1]  ;;  %v2148_v50 = vunpack.c.l.b16 %v2017_v14  ;;  %v2044_v19 = vrot.slane %v2042_v41, 4  ;;  %v5886_v9 = vld [vmem:[%s6199_s27 + $0x90] sm:$0xff] }
 0x117   : > { %v1305_v51 = vpop.f32.mrf.mxu2  ;;  %5346 = vmatmul.msk.bf16.gmra.mxu1 %vm658_vm4, %v5885_v44  ;;  %v6716_v57 = vadd.f32 %v2244_v60, %v1664_v3  ;;  %v1160_v60 = vrot.slane %v6096_v62, 5  ;;  %v1159_v11 = vrot.slane %v1157_v56, 4  ;;  %v2149_v3 = vunpack.c.l.b16 %v2027_v23 }
 0x118   : > { %v1378_v61 = vadd.f32 %v1305_v51, %v953_v21  ;;  %v2040_v51 = vrot.slane %v2038_v5, 5  ;;  %v2036_v62 = vrot.slane %v2035_v20, 4  ;;  %v6098_v20 = vld [vmem:[%s6199_s27 + $0xa4] sm:$0x1] }
 0x119   : > { %v2169_v16 = vpack.c.b16 %v2149_v3, %v2148_v50  ;;  %v6097_v50 = vld [vmem:[%s6199_s27 + $0xa0] sm:$0xf] }
 0x11a   : > { %v2045_v25 = vor.u32 %v2044_v19, %v2040_v51  ;;  %v1164_v3 = vrot.slane %v6097_v50, 5  ;;  %v1033_v19 = vld [vmem:[%s6199_s27 + $0x9c] sm:$0xe] }
 0x11b   : > { %v2246_v1 = vpop.f32.mrf.mxu0 }
 0x11c   : > { %v1592_v21 = vpop.f32.mrf.mxu3  ;;  %5379 = vmatmul.msk.bf16.gmra.mxu2 %vm658_vm4, %v1228_v4  ;;  %v957_v44 = vpop.f32.mrf.mxu1  ;;  %v5535_v4 = vld [vmem:[%s6199_s27 + $0xa4] sm:$0x1] }
 0x11d   : > { %v1665_v47 = vadd.f32 %v1592_v21, %v1378_v61  ;;  %v958_v35 = vadd.f32 %v957_v44, %v6645_v24  ;;  %v1158_v61 = vsel %vm6385_vm7, %v5363_v52, %v1157_v56  ;;  %v1161_v24 = vsel %vm6385_vm7, %v1159_v11, %v1160_v60  ;;  %v5536_v21 = vld [vmem:[%s6199_s27 + $0xa8] sm:$0xf] }
 0x11e   : > { %v2048_v14 = vshll.u32 %v5535_v4, 16  ;;  %v1210_v5 = vunpack.c.l.b16 %v1161_v24  ;;  %v2046_v60 = vrot.slane %v2045_v25, 4  ;;  %v2053_v52 = vshrl.u32 %v5536_v21, 16 }
 0x11f   : > { %v1308_v30 = vpop.f32.mrf.mxu2  ;;  %v6729_v54 = vadd.f32 %v2246_v1, %v1665_v47  ;;  %v2041_v11 = vsel %vm6211_vm3, %v2036_v62, %v2040_v51  ;;  %v2066_v4 = vshrl.u32 %v5537_v31, 16 }
 0x120   : > { %v1379_v38 = vadd.f32 %v1308_v30, %v956_v27  ;;  %v1209_v27 = vunpack.c.l.b16 %v1158_v61  ;;  %v2050_v44 = vrot.slane %v2048_v14, 5  ;;  %v2056_v30 = vshll.u32 %v5536_v21, 16  ;;  %v5902_v14 = vld [vmem:[%s6199_s27 + $0x9c] sm:$0xff] }
 0x121   : > { %5492 = vmatmul.msk.bf16.gmra.mxu3 %vm658_vm4, %v5901_v48  ;;  %v2055_v51 = vrot.slane %v2053_v52, 4 }
 0x122   : > { %v1229_v48 = vpack.c.b16 %v1210_v5, %v1209_v27  ;;  %v2051_v24 = vsel %vm6211_vm3, %v2046_v60, %v2050_v44  ;;  %v1166_v27 = vrot.slane %v1164_v3, 4  ;;  %v2058_v5 = vrot.slane %v2056_v30, 5  ;;  %v5538_v44 = vld [vmem:[%s6199_s27 + $0xb0] sm:$0x1] }
 0x123   : > { %v2249_v8 = vpop.f32.mrf.mxu0  ;;  %v2151_v62 = vunpack.c.l.b16 %v2051_v24 }
 0x124   : > { %v1595_v1 = vpop.f32.mrf.mxu3  ;;  %v960_v23 = vpop.f32.mrf.mxu1  ;;  %v2059_v52 = vor.u32 %v2058_v5, %v2055_v51 }
 0x125   : > { %v1666_v41 = vadd.f32 %v1595_v1, %v1379_v38  ;;  %v2062_v38 = vshll.u32 %v5537_v31, 16  ;;  %v5364_v1 = vrot.slane %v1033_v19, 9  ;;  %v5887_v19 = vld [vmem:[%s6199_s27 + $0x9c] sm:$0xff] }
 0x126   : > { %5557 = vmatmul.msk.bf16.gmra.mxu0 %vm658_vm4, %v2169_v16  ;;  %v1167_v16 = vrot.slane %v6098_v20, 5 }
 0x127   : > { %v1310_v56 = vpop.f32.mrf.mxu2  ;;  %5347 = vmatmul.msk.bf16.gmra.mxu1 %vm658_vm4, %v5886_v9  ;;  %v6742_v33 = vadd.f32 %v2249_v8, %v1666_v41  ;;  %v2150_v8 = vunpack.c.l.b16 %v2041_v11  ;;  %v961_v41 = vadd.f32 %v960_v23, %v6480_v7  ;;  %v2064_v21 = vrot.slane %v2062_v38, 5 }
 0x128   : > { %v1380_v47 = vadd.f32 %v1310_v56, %v958_v35  ;;  %v2068_v56 = vrot.slane %v2066_v4, 4  ;;  %v2072_v11 = vshll.u32 %v5538_v44, 16 }
 0x129   : > { %v2170_v7 = vpack.c.b16 %v2151_v62, %v2150_v8  ;;  %v5539_v8 = vld [vmem:[%s6199_s27 + $0xb4] sm:$0xf] }
 0x12a   : > { %v2069_v23 = vor.u32 %v2068_v56, %v2064_v21  ;;  %v2074_v51 = vrot.slane %v2072_v11, 5  ;;  %v2080_v44 = vshll.u32 %v5539_v8, 16 }
 0x12b   : > { %v2251_v61 = vpop.f32.mrf.mxu0 }
 0x12c   : > { %v1597_v35 = vpop.f32.mrf.mxu3  ;;  %5380 = vmatmul.msk.bf16.gmra.mxu2 %vm658_vm4, %v1229_v48  ;;  %v962_v9 = vpop.f32.mrf.mxu1  ;;  %v1168_v48 = vsel %vm6385_vm7, %v1166_v27, %v1167_v16  ;;  %v2070_v16 = vrot.slane %v2069_v23, 4 }
 0x12d   : > { %v1667_v25 = vadd.f32 %v1597_v35, %v1380_v47  ;;  %v1165_v47 = vsel %vm6385_vm7, %v5364_v1, %v1164_v3  ;;  %v1212_v24 = vunpack.c.l.b16 %v1168_v48  ;;  %v2060_v35 = vrot.slane %v2059_v52, 4  ;;  %v6100_v52 = vld [vmem:[%s6199_s27 + $0xb0] sm:$0x1] }
 0x12e   : > { %v963_v3 = vadd.f32 %v962_v9, %v6496_v34  ;;  %v2077_v34 = vshrl.u32 %v5539_v8, 16  ;;  %v2075_v9 = vsel %vm6211_vm3, %v2070_v16, %v2074_v51 }
 0x12f   : > { %v1313_v60 = vpop.f32.mrf.mxu2  ;;  %v6755_v31 = vadd.f32 %v2251_v61, %v1667_v25  ;;  %v1211_v61 = vunpack.c.l.b16 %v1165_v47  ;;  %v2065_v56 = vsel %vm6211_vm3, %v2060_v35, %v2064_v21 }
 0x130   : > { %v1381_v50 = vadd.f32 %v1313_v60, %v961_v41  ;;  %v6099_v41 = vld [vmem:[%s6199_s27 + $0xac] sm:$0xf]  ;;  %v1034_v60 = vld [vmem:[%s6199_s27 + $0xa8] sm:$0xe] }
 0x131   : > { %5493 = vmatmul.msk.bf16.gmra.mxu3 %vm658_vm4, %v5902_v14  ;;  %v5540_v14 = vld [vmem:[%s6199_s27 + $0xb8] sm:$0xf]  ;;  %v1230_v5 = vpack.c.b16 %v1212_v24, %v1211_v61  ;;  %v1171_v62 = vrot.slane %v6099_v41, 5  ;;  %v2152_v61 = vunpack.c.l.b16 %v2065_v56  ;;  %v2153_v24 = vunpack.c.l.b16 %v2075_v9  ;;  %v5541_v41 = vld [vmem:[%s6199_s27 + $0xbc] sm:$0x1] }
 0x132   : > { %v2090_v47 = vshrl.u32 %v5540_v14, 16 }
 0x133   : > { %v2254_v30 = vpop.f32.mrf.mxu0 }
 0x134   : > { %v1600_v38 = vpop.f32.mrf.mxu3  ;;  %v965_v4 = vpop.f32.mrf.mxu1  ;;  %v2092_v51 = vrot.slane %v2090_v47, 4 }
 0x135   : > { %v1668_v20 = vadd.f32 %v1600_v38, %v1381_v50  ;;  %v2086_v50 = vshll.u32 %v5540_v14, 16  ;;  %v5903_v38 = vld [vmem:[%s6199_s27 + $0xa8] sm:$0xff]  ;;  %v966_v35 = vadd.f32 %v965_v4, %v6516_v58  ;;  %v2171_v58 = vpack.c.b16 %v2153_v24, %v2152_v61 }
 0x136   : > { %5558 = vmatmul.msk.bf16.gmra.mxu0 %vm658_vm4, %v2170_v7  ;;  %v1174_v7 = vrot.slane %v6100_v52, 5 }
 0x137   : > { %v1315_v25 = vpop.f32.mrf.mxu2  ;;  %5348 = vmatmul.msk.bf16.gmra.mxu1 %vm658_vm4, %v5887_v19  ;;  %v6768_v1 = vadd.f32 %v2254_v30, %v1668_v20  ;;  %v5365_v30 = vrot.slane %v1034_v60, 9  ;;  %v1173_v19 = vrot.slane %v1171_v62, 4  ;;  %v2079_v20 = vrot.slane %v2077_v34, 4  ;;  %v5888_v34 = vld [vmem:[%s6199_s27 + $0xa8] sm:$0xff] }
 0x138   : > { %v1382_v27 = vadd.f32 %v1315_v25, %v963_v3  ;;  %v2082_v3 = vrot.slane %v2080_v44, 5  ;;  %v6780_v16 = vrot.slane %v2086_v50, 5  ;;  %v2096_v50 = vshll.u32 %v5541_v41, 16 }
 0x13a   : > { %v2083_v4 = vor.u32 %v2082_v3, %v2079_v20  ;;  %v2093_v56 = vor.u32 %v2092_v51, %v6780_v16  ;;  %v2098_v20 = vrot.slane %v2096_v50, 5 }
 0x13b   : > { %v2256_v48 = vpop.f32.mrf.mxu0 }
 0x13c   : > { %v1602_v23 = vpop.f32.mrf.mxu3  ;;  %5381 = vmatmul.msk.bf16.gmra.mxu2 %vm658_vm4, %v1230_v5  ;;  %v967_v11 = vpop.f32.mrf.mxu1  ;;  %v1172_v5 = vsel %vm6385_vm7, %v5365_v30, %v1171_v62  ;;  %v5542_v62 = vld [vmem:[%s6199_s27 + $0xc0] sm:$0xf]  ;;  %v6101_v30 = vld [vmem:[%s6199_s27 + $0x10] sm:$0xf] }
 0x13d   : > { %v1669_v21 = vadd.f32 %v1602_v23, %v1382_v27  ;;  %v1175_v27 = vsel %vm6385_vm7, %v1173_v19, %v1174_v7  ;;  %v1213_v9 = vunpack.c.l.b16 %v1172_v5  ;;  %v5543_v23 = vld [vmem:[%s6199_s27 + $0xc4] sm:$0xf]  ;;  %v2412_v7 = vrot.slane %v6101_v30, 5 }
 0x13e   : > { %v1214_v44 = vunpack.c.l.b16 %v1175_v27  ;;  %v968_v19 = vadd.f32 %v967_v11, %v6533_v28  ;;  %v2104_v3 = vshll.u32 %v5542_v62, 16  ;;  %v6102_v27 = vld [vmem:[%s6199_s27 + $0xb8] sm:$0xf]  ;;  %v1035_v11 = vld [vmem:[%s6199_s27 + $0xb4] sm:$0xe] }
 0x13f   : > { %v1318_v8 = vpop.f32.mrf.mxu2  ;;  %v6782_v25 = vadd.f32 %v2256_v48, %v1669_v21  ;;  %v2084_v21 = vrot.slane %v2083_v4, 4  ;;  %v1178_v41 = vrot.slane %v6102_v27, 5  ;;  %v2414_v4 = vrot.slane %v2412_v7, 4  ;;  %v5904_v27 = vld [vmem:[%s6199_s27 + $0xb4] sm:$0xff] }
 0x140   : > { %v1383_v14 = vadd.f32 %v1318_v8, %v966_v35  ;;  %v1231_v24 = vpack.c.b16 %v1214_v44, %v1213_v9  ;;  %v2101_v35 = vshrl.u32 %v5542_v62, 16  ;;  %v2110_v8 = vshll.u32 %v5543_v23, 16 }
 0x141   : > { %5494 = vmatmul.msk.bf16.gmra.mxu3 %vm658_vm4, %v5903_v38  ;;  %v2094_v38 = vrot.slane %v2093_v56, 4  ;;  %v6104_v56 = vld [vmem:[%s6199_s27 + $0x14] sm:$0x1]  ;;  %v2089_v9 = vsel %vm6211_vm3, %v2084_v21, %v6780_v16 }
 0x142   : > { %v2103_v62 = vrot.slane %v2101_v35, 4  ;;  %v2154_v21 = vunpack.c.l.b16 %v2089_v9 }
 0x143   : > { %v2259_v60 = vpop.f32.mrf.mxu0  ;;  %v2099_v44 = vsel %vm6211_vm3, %v2094_v38, %v2098_v20 }
 0x144   : > { %v1605_v47 = vpop.f32.mrf.mxu3  ;;  %v970_v48 = vpop.f32.mrf.mxu1  ;;  %v2155_v38 = vunpack.c.l.b16 %v2099_v44 }
 0x145   : > { %v1670_v52 = vadd.f32 %v1605_v47, %v1383_v14  ;;  %v2114_v14 = vshrl.u32 %v5543_v23, 16  ;;  %v2415_v47 = vrot.slane %v6104_v56, 5  ;;  %v6810_v23 = vrot.slane %v2110_v8, 5 }
 0x146   : > { %5559 = vmatmul.msk.bf16.gmra.mxu0 %vm658_vm4, %v2171_v58  ;;  %v6103_v58 = vld [vmem:[%s6199_s27 + $0xbc] sm:$0x1]  ;;  %v1180_v56 = vrot.slane %v1178_v41, 4  ;;  %v971_v16 = vadd.f32 %v970_v48, %v6553_v53 }
 0x147   : > { %v1320_v61 = vpop.f32.mrf.mxu2  ;;  %5349 = vmatmul.msk.bf16.gmra.mxu1 %vm658_vm4, %v5888_v34  ;;  %v6798_v5 = vadd.f32 %v2259_v60, %v1670_v52  ;;  %v1181_v28 = vrot.slane %v6103_v58, 5  ;;  %v2106_v52 = vrot.slane %v2104_v3, 5  ;;  %v2116_v30 = vrot.slane %v2114_v14, 4 }
 0x148   : > { %v1384_v51 = vadd.f32 %v1320_v61, %v968_v19  ;;  %v5562_v19 = vld [vmem:[%s6199_s27 + $0xc] sm:$0xe]  ;;  %v5366_v58 = vrot.slane %v1035_v11, 9  ;;  %v2416_v3 = vsel %vm6385_vm7, %v2414_v4, %v2415_v47  ;;  %v5724_v4 = vld [vmem:[%s6199_s27 + $0x18] sm:$0xf] }
 0x149   : > { %9441 = vst [vmem:[#allocation2_spill] sm:$0xff] %v6798_v5  ;;  %v5578_v5 = vrot.slane %v5562_v19, 9  ;;  %v2107_v8 = vor.u32 %v2106_v52, %v2103_v62  ;;  %v2525_v11 = vunpack.c.l.b16 %v2416_v3  ;;  %v1182_v48 = vsel %vm6385_vm7, %v1180_v56, %v1181_v28  ;;  %v5889_v62 = vld [vmem:[%s6199_s27 + $0xb4] sm:$0xff]  ;;  %v6833_v52 = vld [vmem:[%s6199_s27 + $0x1c] sm:$0xf] }
 0x14a   : > { %v1179_v53 = vsel %vm6385_vm7, %v5366_v58, %v1178_v41  ;;  %v2117_v9 = vor.u32 %v2116_v30, %v6810_v23  ;;  %v1216_v41 = vunpack.c.l.b16 %v1182_v48  ;;  %v3080_v56 = vshrl.u32 %v5724_v4, 16 }
 0x14b   : > { %v2261_v34 = vpop.f32.mrf.mxu0  ;;  %v2413_v35 = vsel %vm6385_vm7, %v5578_v5, %v2412_v7  ;;  %v2172_v7 = vpack.c.b16 %v2155_v38, %v2154_v21  ;;  %v2108_v58 = vrot.slane %v2107_v8, 4  ;;  %v3083_v30 = vshll.u32 %v5724_v4, 16 }
 0x14c   : > { %v1607_v60 = vpop.f32.mrf.mxu3  ;;  %5382 = vmatmul.msk.bf16.gmra.mxu2 %vm658_vm4, %v1231_v24  ;;  %v972_v50 = vpop.f32.mrf.mxu1  ;;  %v5544_v24 = vld [vmem:[%s6199_s27 + $0xc8] sm:$0x1]  ;;  %v2524_v14 = vunpack.c.l.b16 %v2413_v35  ;;  %v2118_v28 = vrot.slane %v2117_v9, 4  ;;  %v3093_v38 = vshrl.u32 %v6833_v52, 16  ;;  %v3082_v8 = vrot.slane %v3080_v56, 4 }
 0x14d   : > { %v1671_v61 = vadd.f32 %v1607_v60, %v1384_v51  ;;  %v2120_v5 = vshll.u32 %v5544_v24, 16  ;;  %v973_v21 = vadd.f32 %v972_v50, %v6573_v17  ;;  %v2113_v17 = vsel %vm6211_vm3, %v2108_v58, %v6810_v23  ;;  %v5726_v9 = vld [vmem:[%s6199_s27 + $0x20] sm:$0x1]  ;;  %v5727_v56 = vld [vmem:[%s6199_s27 + $0x24] sm:$0xf] }
 0x14e   : > { %v6826_v44 = vpack.c.b16 %v2525_v11, %v2524_v14  ;;  %v3085_v14 = vrot.slane %v3083_v30, 5  ;;  %v3099_v58 = vshll.u32 %v5726_v9, 16  ;;  %v6853_v30 = vld [vmem:[%s6199_s27 + $0x28] sm:$0xf] }
 0x14f   : > { %v1323_v20 = vpop.f32.mrf.mxu2  ;;  %v6829_v47 = vadd.f32 %v2261_v34, %v1671_v61  ;;  %v2122_v34 = vrot.slane %v2120_v5, 5  ;;  %v3089_v61 = vshll.u32 %v6833_v52, 16 }
 0x150   : > { %v1385_v51 = vadd.f32 %v1323_v20, %v971_v16  ;;  %v1215_v16 = vunpack.c.l.b16 %v1179_v53  ;;  %v3095_v53 = vrot.slane %v3093_v38, 4  ;;  %v3101_v38 = vrot.slane %v3099_v58, 5 }
 0x151   : > { %5495 = vmatmul.msk.bf16.gmra.mxu3 %vm658_vm4, %v5904_v27  ;;  %v2123_v50 = vsel %vm6211_vm3, %v2118_v28, %v2122_v34  ;;  %v3091_v11 = vrot.slane %v3089_v61, 5 }
 0x152   : > { %v1232_v3 = vpack.c.b16 %v1216_v41, %v1215_v16  ;;  %v3086_v16 = vor.u32 %v3085_v14, %v3082_v8  ;;  %v3107_v8 = vshll.u32 %v5727_v56, 16  ;;  %v3113_v14 = vshll.u32 %v6853_v30, 16 }
 0x153   : > { %v2264_v60 = vpop.f32.mrf.mxu0  ;;  %v3096_v41 = vor.u32 %v3095_v53, %v3091_v11 }
 0x154   : > { %v1610_v19 = vpop.f32.mrf.mxu3  ;;  %v975_v27 = vpop.f32.mrf.mxu1  ;;  %v3087_v34 = vrot.slane %v3086_v16, 4 }
 0x155   : > { %v1672_v20 = vadd.f32 %v1610_v19, %v1385_v51  ;;  %v2157_v19 = vunpack.c.l.b16 %v2123_v50  ;;  %v976_v23 = vadd.f32 %v975_v27, %v6596_v2  ;;  %v3097_v61 = vrot.slane %v3096_v41, 4 }
 0x156   : > { %5560 = vmatmul.msk.bf16.gmra.mxu0 %vm658_vm4, %v2172_v7 }
 0x157   : > { %v1325_v24 = vpop.f32.mrf.mxu2  ;;  %5350 = vmatmul.msk.bf16.gmra.mxu1 %vm658_vm4, %v5889_v62  ;;  %v6840_v51 = vadd.f32 %v2264_v60, %v1672_v20  ;;  %v5905_v60 = vld [vmem:[%s6199_s27 + $0xc0] sm:$0xff]  ;;  %v2156_v62 = vunpack.c.l.b16 %v2113_v17  ;;  %v3117_v17 = vshrl.u32 %v6853_v30, 16  ;;  %v3102_v41 = vsel %vm6211_vm3, %v3097_v61, %v3101_v38  ;;  %v6879_v38 = vld [vmem:[%s6199_s27 + $0x2c] sm:$0x1] }
 0x158   : > { %v1386_v35 = vadd.f32 %v1325_v24, %v973_v21  ;;  %v5789_v24 = vld [vmem:[%s6199_s27 + $0x18] sm:$0xe]  ;;  %v3466_v61 = vunpack.c.l.b16 %v3102_v41 }
 0x159   : > { %v2173_v21 = vpack.c.b16 %v2157_v19, %v2156_v62  ;;  %v6106_v62 = vld [vmem:[%s6199_s27 + $0x20] sm:$0x1] }
 0x15a   : > { %v2422_v19 = vrot.slane %v6106_v62, 5 }
 0x15b   : > { %v2266_v48 = vpop.f32.mrf.mxu0 }
 0x15c   : > { %v1612_v7 = vpop.f32.mrf.mxu3  ;;  %5383 = vmatmul.msk.bf16.gmra.mxu2 %vm658_vm4, %v1232_v3  ;;  %v977_v5 = vpop.f32.mrf.mxu1  ;;  %v3104_v3 = vshrl.u32 %v5727_v56, 16 }
 0x15d   : > { %v1673_v4 = vadd.f32 %v1612_v7, %v1386_v35  ;;  %v3751_v35 = vrot.slane %v6833_v52, 5  ;;  %v6105_v7 = vld [vmem:[%s6199_s27 + $0x1c] sm:$0xf]  ;;  %v3092_v52 = vsel %vm6211_vm3, %v3087_v34, %v3091_v11  ;;  %v3119_v11 = vrot.slane %v3117_v17, 4 }
 0x15f   : > { %v1328_v20 = vpop.f32.mrf.mxu2  ;;  %v6858_v2 = vadd.f32 %v2266_v48, %v1673_v4  ;;  %v5805_v48 = vrot.slane %v5789_v24, 9  ;;  %v5563_v4 = vld [vmem:[%s6199_s27 + $0x18] sm:$0xe]  ;;  %v3753_v58 = vrot.slane %v3751_v35, 4 }
 0x160   : > { %v1387_v28 = vadd.f32 %v1328_v20, %v976_v23  ;;  %v978_v23 = vadd.f32 %v977_v5, %v6616_v29  ;;  %v3754_v20 = vrot.slane %v5726_v9, 5  ;;  %v5906_v24 = vld [vmem:[%s6199_s27 + $0x18] sm:$0xff]  ;;  %v3465_v5 = vunpack.c.l.b16 %v3092_v52 }
 0x161   : > { %5496 = vmatmul.msk.bf16.gmra.mxu3 %vm658_vm4, %v5905_v60  ;;  %9442 = vst [vmem:[#allocation3_spill] sm:$0xff] %v6858_v2  ;;  %v2419_v60 = vrot.slane %v6105_v7, 5  ;;  %v6873_v7 = vrot.slane %v3113_v14, 5  ;;  %v3752_v2 = vsel %vm6385_vm7, %v5805_v48, %v3751_v35  ;;  %v3123_v35 = vshll.u32 %v6879_v38, 16 }
 0x162   : > { %v3497_v48 = vpack.c.b16 %v3466_v61, %v3465_v5  ;;  %v6107_v5 = vld [vmem:[%s6199_s27 + $0x28] sm:$0xf] }
 0x163   : > { %v2269_v27 = vpop.f32.mrf.mxu0  ;;  %v2421_v62 = vrot.slane %v2419_v60, 4  ;;  %v2426_v61 = vrot.slane %v6107_v5, 5 }
 0x164   : > { %v1615_v50 = vpop.f32.mrf.mxu3  ;;  %v980_v53 = vpop.f32.mrf.mxu1 }
 0x165   : > { %v1674_v16 = vadd.f32 %v1615_v50, %v1387_v28  ;;  %v3106_v28 = vrot.slane %v3104_v3, 4  ;;  %v3109_v50 = vrot.slane %v3107_v8, 5  ;;  %v2423_v17 = vsel %vm6385_vm7, %v2421_v62, %v2422_v19  ;;  %v6898_v62 = vld [vmem:[%s6199_s27 + $0x34] sm:$0xf] }
 0x166   : > { %5561 = vmatmul.msk.bf16.gmra.mxu0 %vm658_vm4, %v2173_v21  ;;  %v5579_v21 = vrot.slane %v5563_v4, 9  ;;  %v981_v4 = vadd.f32 %v980_v53, %v6498_v37 }
 0x167   : > { %v1330_v56 = vpop.f32.mrf.mxu2  ;;  %5595 = vmatmul.msk.bf16.vlgmr.msra.gmra.mxu1 %vm658_vm4, %v6826_v44  ;;  %v6876_v29 = vadd.f32 %v2269_v27, %v1674_v16  ;;  %v3755_v44 = vsel %vm6385_vm7, %v3753_v58, %v3754_v20  ;;  %v3110_v3 = vor.u32 %v3109_v50, %v3106_v28  ;;  %v3120_v16 = vor.u32 %v3119_v11, %v6873_v7  ;;  %v5790_v11 = vld [vmem:[%s6199_s27 + $0x24] sm:$0xe] }
 0x168   : > { %v1388_v34 = vadd.f32 %v1330_v56, %v978_v23  ;;  %v2420_v27 = vsel %vm6385_vm7, %v5579_v21, %v2419_v60  ;;  %v3863_v23 = vunpack.c.l.b16 %v3752_v2  ;;  %v3864_v41 = vunpack.c.l.b16 %v3755_v44 }
 0x169   : > { %v2526_v20 = vunpack.c.l.b16 %v2420_v27  ;;  %v2527_v60 = vunpack.c.l.b16 %v2423_v17  ;;  %v3111_v28 = vrot.slane %v3110_v3, 4  ;;  %v3121_v19 = vrot.slane %v3120_v16, 4 }
 0x16a   : > { %v3125_v50 = vrot.slane %v3123_v35, 5  ;;  %v3758_v21 = vrot.slane %v6853_v30, 5  ;;  %v5806_v17 = vrot.slane %v5790_v11, 9  ;;  %v5564_v30 = vld [vmem:[%s6199_s27 + $0x24] sm:$0xe] }
 0x16b   : > { %v2271_v9 = vpop.f32.mrf.mxu0  ;;  %v2557_v53 = vpack.c.b16 %v2527_v60, %v2526_v20 }
 0x16c   : > { %v1617_v8 = vpop.f32.mrf.mxu3  ;;  %5708 = vmatmul.msk.bf16.vlgmr.msra.gmra.mxu2 %vm658_vm4, %v5906_v24  ;;  %v982_v14 = vpop.f32.mrf.mxu1  ;;  %v5730_v24 = vld [vmem:[%s6199_s27 + $0x30] sm:$0xf]  ;;  %v3126_v27 = vsel %vm6211_vm3, %v3121_v19, %v3125_v50  ;;  %v5907_v50 = vld [vmem:[%s6199_s27 + $0x24] sm:$0xff] }
 0x16d   : > { %v1675_v52 = vadd.f32 %v1617_v8, %v1388_v34  ;;  %v3895_v34 = vpack.c.b16 %v3864_v41, %v3863_v23  ;;  %v3116_v8 = vsel %vm6211_vm3, %v3111_v28, %v6873_v7  ;;  %v3128_v16 = vshrl.u32 %v5730_v24, 16  ;;  %v6108_v41 = vld [vmem:[%s6199_s27 + $0x2c] sm:$0x1] }
 0x16e   : > { %v3760_v23 = vrot.slane %v3758_v21, 4  ;;  %v3761_v7 = vrot.slane %v6879_v38, 5  ;;  %v3467_v60 = vunpack.c.l.b16 %v3116_v8  ;;  %v2428_v28 = vrot.slane %v2426_v61, 4 }
 0x16f   : > { %v1333_v58 = vpop.f32.mrf.mxu2  ;;  %v6900_v37 = vadd.f32 %v2271_v9, %v1675_v52  ;;  %v3131_v9 = vshll.u32 %v5730_v24, 16  ;;  %v3137_v52 = vshll.u32 %v6898_v62, 16  ;;  %v3468_v11 = vunpack.c.l.b16 %v3126_v27 }
 0x170   : > { %v1389_v56 = vadd.f32 %v1333_v58, %v981_v4  ;;  %v983_v4 = vadd.f32 %v982_v14, %v6519_v63  ;;  %v2429_v58 = vrot.slane %v6108_v41, 5  ;;  %v3759_v24 = vsel %vm6385_vm7, %v5806_v17, %v3758_v21 }
 0x171   : > { %5773 = vmatmul.msk.bf16.vlgmr.msra.gmra.mxu3 %vm658_vm4, %v3497_v48  ;;  %v3141_v48 = vshrl.u32 %v6898_v62, 16  ;;  %v3130_v63 = vrot.slane %v3128_v16, 4  ;;  %v3133_v14 = vrot.slane %v3131_v9, 5  ;;  %v6921_v38 = vrot.slane %v3137_v52, 5 }
 0x172   : > { %v2430_v27 = vsel %vm6385_vm7, %v2428_v28, %v2429_v58  ;;  %v3865_v17 = vunpack.c.l.b16 %v3759_v24  ;;  %v5791_v24 = vld [vmem:[%s6199_s27 + $0x30] sm:$0xe] }
 0x173   : > { %v2274_v2 = vpop.f32.mrf.mxu0  ;;  %v3143_v5 = vrot.slane %v3141_v48, 4  ;;  %v3134_v52 = vor.u32 %v3133_v14, %v3130_v63 }
 0x174   : > { %v1620_v44 = vpop.f32.mrf.mxu3  ;;  %v985_v3 = vpop.f32.mrf.mxu1 }
 0x175   : > { %v1676_v35 = vadd.f32 %v1620_v44, %v1389_v56  ;;  %v5580_v56 = vrot.slane %v5564_v30, 9  ;;  %v6930_v30 = vld [vmem:[%s6199_s27 + $0x38] sm:$0x1]  ;;  %v3144_v48 = vor.u32 %v3143_v5, %v6921_v38  ;;  %v3135_v28 = vrot.slane %v3134_v52, 4 }
 0x176   : > { %5822 = vmatmul.msk.bf16.vlgmr.msra.gmra.mxu0 %vm658_vm4, %v3895_v34 }
 0x177   : > { %v1335_v20 = vpop.f32.mrf.mxu2  ;;  %5596 = vmatmul.msk.bf16.gmra.mxu1 %vm658_vm4, %v2557_v53  ;;  %v6919_v34 = vadd.f32 %v2274_v2, %v1676_v35  ;;  %v3762_v53 = vsel %vm6385_vm7, %v3760_v23, %v3761_v7  ;;  %v2427_v8 = vsel %vm6385_vm7, %v5580_v56, %v2426_v61  ;;  %v3498_v2 = vpack.c.b16 %v3468_v11, %v3467_v60  ;;  %v6938_v56 = vld [vmem:[%s6199_s27 + $0x40] sm:$0xf] }
 0x178   : > { %v1390_v19 = vadd.f32 %v1335_v20, %v983_v4  ;;  %v3866_v9 = vunpack.c.l.b16 %v3762_v53  ;;  %v986_v61 = vadd.f32 %v985_v3, %v6536_v22  ;;  %v2528_v4 = vunpack.c.l.b16 %v2427_v8  ;;  %v5733_v20 = vld [vmem:[%s6199_s27 + $0x3c] sm:$0xf] }
 0x179   : > { %v2529_v23 = vunpack.c.l.b16 %v2430_v27  ;;  %v3147_v7 = vshll.u32 %v6930_v30, 16  ;;  %v3765_v22 = vrot.slane %v6898_v62, 5  ;;  %v3152_v14 = vshrl.u32 %v5733_v20, 16 }
 0x17a   : > { %v3896_v60 = vpack.c.b16 %v3866_v9, %v3865_v17  ;;  %v3155_v5 = vshll.u32 %v5733_v20, 16  ;;  %v3161_v53 = vshll.u32 %v6938_v56, 16  ;;  %v3165_v8 = vshrl.u32 %v6938_v56, 16  ;;  %v6110_v9 = vld [vmem:[%s6199_s27 + $0x38] sm:$0x1] }
 0x17b   : > { %v2276_v44 = vpop.f32.mrf.mxu0  ;;  %v3149_v11 = vrot.slane %v3147_v7, 5  ;;  %v2436_v52 = vrot.slane %v6110_v9, 5  ;;  %v3768_v62 = vrot.slane %v6930_v30, 5  ;;  %v3767_v7 = vrot.slane %v3765_v22, 4  ;;  %v6965_v9 = vld [vmem:[%s6199_s27 + $0x44] sm:$0x1] }
 0x17c   : > { %v1622_v21 = vpop.f32.mrf.mxu3  ;;  %5709 = vmatmul.msk.bf16.gmra.mxu2 %vm658_vm4, %v5907_v50  ;;  %v987_v16 = vpop.f32.mrf.mxu1  ;;  %v2558_v50 = vpack.c.b16 %v2529_v23, %v2528_v4  ;;  %v3140_v4 = vsel %vm6211_vm3, %v3135_v28, %v6921_v38  ;;  %v3157_v20 = vrot.slane %v3155_v5, 5  ;;  %v6959_v30 = vrot.slane %v3161_v53, 5 }
 0x17d   : > { %v1677_v35 = vadd.f32 %v1622_v21, %v1390_v19  ;;  %v3145_v19 = vrot.slane %v3144_v48, 4  ;;  %v3469_v38 = vunpack.c.l.b16 %v3140_v4 }
 0x17f   : > { %v1338_v41 = vpop.f32.mrf.mxu2  ;;  %v6943_v3 = vadd.f32 %v2276_v44, %v1677_v35  ;;  %v5565_v44 = vld [vmem:[%s6199_s27 + $0x30] sm:$0xe]  ;;  %v988_v35 = vadd.f32 %v987_v16, %v6557_v55  ;;  %v3150_v23 = vsel %vm6211_vm3, %v3145_v19, %v3149_v11 }
 0x180   : > { %v1391_v58 = vadd.f32 %v1338_v41, %v986_v61  ;;  %v5807_v61 = vrot.slane %v5791_v24, 9  ;;  %v3167_v24 = vrot.slane %v3165_v8, 4  ;;  %v5581_v55 = vrot.slane %v5565_v44, 9 }
 0x181   : > { %5774 = vmatmul.msk.bf16.gmra.mxu3 %vm658_vm4, %v3498_v2  ;;  %v6109_v2 = vld [vmem:[%s6199_s27 + $0x34] sm:$0xf]  ;;  %v3470_v28 = vunpack.c.l.b16 %v3150_v23 }
 0x182   : > { %v2433_v17 = vrot.slane %v6109_v2, 5  ;;  %v3766_v11 = vsel %vm6385_vm7, %v5807_v61, %v3765_v22  ;;  %v3171_v22 = vshll.u32 %v6965_v9, 16 }
 0x183   : > { %v2279_v63 = vpop.f32.mrf.mxu0  ;;  %v3499_v44 = vpack.c.b16 %v3470_v28, %v3469_v38  ;;  %v6111_v28 = vld [vmem:[%s6199_s27 + $0x40] sm:$0xf] }
 0x184   : > { %v1625_v27 = vpop.f32.mrf.mxu3  ;;  %v990_v21 = vpop.f32.mrf.mxu1  ;;  %v2435_v16 = vrot.slane %v2433_v17, 4 }
 0x185   : > { %v1678_v48 = vadd.f32 %v1625_v27, %v1391_v58  ;;  %v3154_v58 = vrot.slane %v3152_v14, 4  ;;  %v5908_v27 = vld [vmem:[%s6199_s27 + $0x30] sm:$0xff] }
 0x186   : > { %5823 = vmatmul.msk.bf16.gmra.mxu0 %vm658_vm4, %v3896_v60  ;;  %v2437_v8 = vsel %vm6385_vm7, %v2435_v16, %v2436_v52  ;;  %v6984_v16 = vld [vmem:[%s6199_s27 + $0x4c] sm:$0xf] }
 0x187   : > { %v1340_v41 = vpop.f32.mrf.mxu2  ;;  %5597 = vmatmul.msk.bf16.gmra.mxu1 %vm658_vm4, %v2558_v50  ;;  %v6962_v2 = vadd.f32 %v2279_v63, %v1678_v48  ;;  %v3769_v50 = vsel %vm6385_vm7, %v3767_v7, %v3768_v62  ;;  %v3158_v14 = vor.u32 %v3157_v20, %v3154_v58  ;;  %v2434_v63 = vsel %vm6385_vm7, %v5581_v55, %v2433_v17 }
 0x188   : > { %v1392_v60 = vadd.f32 %v1340_v41, %v988_v35  ;;  %v3168_v48 = vor.u32 %v3167_v24, %v6959_v30  ;;  %v991_v62 = vadd.f32 %v990_v21, %v6580_v26  ;;  %v3867_v35 = vunpack.c.l.b16 %v3766_v11  ;;  %v5792_v24 = vld [vmem:[%s6199_s27 + $0x3c] sm:$0xe] }
 0x189   : > { %v3868_v4 = vunpack.c.l.b16 %v3769_v50  ;;  %v2530_v7 = vunpack.c.l.b16 %v2434_v63  ;;  %v2531_v17 = vunpack.c.l.b16 %v2437_v8  ;;  %v3159_v58 = vrot.slane %v3158_v14, 4 }
 0x18a   : > { %v3169_v52 = vrot.slane %v3168_v48, 4  ;;  %v3173_v20 = vrot.slane %v3171_v22, 5  ;;  %v3772_v55 = vrot.slane %v6938_v56, 5  ;;  %v2440_v11 = vrot.slane %v6111_v28, 5  ;;  %v5566_v56 = vld [vmem:[%s6199_s27 + $0x3c] sm:$0xe] }
 0x18b   : > { %v2281_v19 = vpop.f32.mrf.mxu0  ;;  %v2559_v38 = vpack.c.b16 %v2531_v17, %v2530_v7  ;;  %v5808_v8 = vrot.slane %v5792_v24, 9 }
 0x18c   : > { %v1627_v5 = vpop.f32.mrf.mxu3  ;;  %5710 = vmatmul.msk.bf16.gmra.mxu2 %vm658_vm4, %v5908_v27  ;;  %v992_v53 = vpop.f32.mrf.mxu1  ;;  %v5736_v27 = vld [vmem:[%s6199_s27 + $0x48] sm:$0xf]  ;;  %v3174_v63 = vsel %vm6211_vm3, %v3169_v52, %v3173_v20  ;;  %v5909_v20 = vld [vmem:[%s6199_s27 + $0x3c] sm:$0xff] }
 0x18d   : > { %v1679_v61 = vadd.f32 %v1627_v5, %v1392_v60  ;;  %v3897_v60 = vpack.c.b16 %v3868_v4, %v3867_v35  ;;  %v3164_v5 = vsel %vm6211_vm3, %v3159_v58, %v6959_v30  ;;  %v3176_v48 = vshrl.u32 %v5736_v27, 16  ;;  %v6112_v4 = vld [vmem:[%s6199_s27 + $0x44] sm:$0x1] }
 0x18e   : > { %v3774_v35 = vrot.slane %v3772_v55, 4  ;;  %v3775_v30 = vrot.slane %v6965_v9, 5  ;;  %v3471_v17 = vunpack.c.l.b16 %v3164_v5  ;;  %v2442_v58 = vrot.slane %v2440_v11, 4 }
 0x18f   : > { %v1343_v23 = vpop.f32.mrf.mxu2  ;;  %v6986_v26 = vadd.f32 %v2281_v19, %v1679_v61  ;;  %v3179_v19 = vshll.u32 %v5736_v27, 16  ;;  %v3185_v61 = vshll.u32 %v6984_v16, 16  ;;  %v3472_v24 = vunpack.c.l.b16 %v3174_v63 }
 0x190   : > { %v1393_v41 = vadd.f32 %v1343_v23, %v991_v62  ;;  %v993_v62 = vadd.f32 %v992_v53, %v6598_v43  ;;  %v2443_v23 = vrot.slane %v6112_v4, 5  ;;  %v3773_v27 = vsel %vm6385_vm7, %v5808_v8, %v3772_v55 }
 0x191   : > { %5775 = vmatmul.msk.bf16.gmra.mxu3 %vm658_vm4, %v3499_v44  ;;  %v3189_v44 = vshrl.u32 %v6984_v16, 16  ;;  %v3178_v43 = vrot.slane %v3176_v48, 4  ;;  %v3181_v53 = vrot.slane %v3179_v19, 5  ;;  %v7007_v9 = vrot.slane %v3185_v61, 5 }
 0x192   : > { %v2444_v63 = vsel %vm6385_vm7, %v2442_v58, %v2443_v23  ;;  %v3869_v8 = vunpack.c.l.b16 %v3773_v27  ;;  %v5793_v27 = vld [vmem:[%s6199_s27 + $0x48] sm:$0xe] }
 0x193   : > { %v2284_v21 = vpop.f32.mrf.mxu0  ;;  %v3191_v28 = vrot.slane %v3189_v44, 4  ;;  %v3182_v61 = vor.u32 %v3181_v53, %v3178_v43 }
 0x194   : > { %v1630_v50 = vpop.f32.mrf.mxu3  ;;  %v995_v14 = vpop.f32.mrf.mxu1 }
 0x195   : > { %v1680_v22 = vadd.f32 %v1630_v50, %v1393_v41  ;;  %v5582_v41 = vrot.slane %v5566_v56, 9  ;;  %v7016_v56 = vld [vmem:[%s6199_s27 + $0x50] sm:$0x1]  ;;  %v3192_v44 = vor.u32 %v3191_v28, %v7007_v9  ;;  %v3183_v58 = vrot.slane %v3182_v61, 4 }
 0x196   : > { %5824 = vmatmul.msk.bf16.gmra.mxu0 %vm658_vm4, %v3897_v60 }
 0x197   : > { %v1345_v7 = vpop.f32.mrf.mxu2  ;;  %5598 = vmatmul.msk.bf16.gmra.mxu1 %vm658_vm4, %v2559_v38  ;;  %v7005_v60 = vadd.f32 %v2284_v21, %v1680_v22  ;;  %v3776_v38 = vsel %vm6385_vm7, %v3774_v35, %v3775_v30  ;;  %v2441_v5 = vsel %vm6385_vm7, %v5582_v41, %v2440_v11  ;;  %v3500_v21 = vpack.c.b16 %v3472_v24, %v3471_v17  ;;  %v7024_v41 = vld [vmem:[%s6199_s27 + $0x58] sm:$0xf] }
 0x198   : > { %v1394_v52 = vadd.f32 %v1345_v7, %v993_v62  ;;  %v3870_v19 = vunpack.c.l.b16 %v3776_v38  ;;  %v996_v11 = vadd.f32 %v995_v14, %v6619_v40  ;;  %v2532_v62 = vunpack.c.l.b16 %v2441_v5  ;;  %v5739_v7 = vld [vmem:[%s6199_s27 + $0x54] sm:$0xf] }
 0x199   : > { %v2533_v35 = vunpack.c.l.b16 %v2444_v63  ;;  %v3195_v30 = vshll.u32 %v7016_v56, 16  ;;  %v3779_v40 = vrot.slane %v6984_v16, 5  ;;  %v3200_v53 = vshrl.u32 %v5739_v7, 16 }
 0x19a   : > { %v3898_v17 = vpack.c.b16 %v3870_v19, %v3869_v8  ;;  %v3203_v28 = vshll.u32 %v5739_v7, 16  ;;  %v3209_v38 = vshll.u32 %v7024_v41, 16  ;;  %v3213_v5 = vshrl.u32 %v7024_v41, 16  ;;  %v6114_v19 = vld [vmem:[%s6199_s27 + $0x50] sm:$0x1] }
 0x19b   : > { %v2286_v50 = vpop.f32.mrf.mxu0  ;;  %v3197_v24 = vrot.slane %v3195_v30, 5  ;;  %v2450_v61 = vrot.slane %v6114_v19, 5  ;;  %v3782_v16 = vrot.slane %v7016_v56, 5  ;;  %v3781_v30 = vrot.slane %v3779_v40, 4  ;;  %v7051_v19 = vld [vmem:[%s6199_s27 + $0x5c] sm:$0x1] }
 0x19c   : > { %v1632_v55 = vpop.f32.mrf.mxu3  ;;  %5711 = vmatmul.msk.bf16.gmra.mxu2 %vm658_vm4, %v5909_v20  ;;  %v997_v48 = vpop.f32.mrf.mxu1  ;;  %v2560_v20 = vpack.c.b16 %v2533_v35, %v2532_v62  ;;  %v3188_v62 = vsel %vm6211_vm3, %v3183_v58, %v7007_v9  ;;  %v3205_v7 = vrot.slane %v3203_v28, 5  ;;  %v7045_v56 = vrot.slane %v3209_v38, 5 }
 0x19d   : > { %v1681_v22 = vadd.f32 %v1632_v55, %v1394_v52  ;;  %v3193_v52 = vrot.slane %v3192_v44, 4  ;;  %v3473_v9 = vunpack.c.l.b16 %v3188_v62 }
 0x19f   : > { %v1348_v4 = vpop.f32.mrf.mxu2  ;;  %v7029_v14 = vadd.f32 %v2286_v50, %v1681_v22  ;;  %v5567_v50 = vld [vmem:[%s6199_s27 + $0x48] sm:$0xe]  ;;  %v998_v22 = vadd.f32 %v997_v48, %v6634_v10  ;;  %v3198_v35 = vsel %vm6211_vm3, %v3193_v52, %v3197_v24 }
 0x1a0   : > { %v1395_v23 = vadd.f32 %v1348_v4, %v996_v11  ;;  %v5809_v11 = vrot.slane %v5793_v27, 9  ;;  %v3215_v27 = vrot.slane %v3213_v5, 4  ;;  %v5583_v10 = vrot.slane %v5567_v50, 9 }
 0x1a1   : > { %5776 = vmatmul.msk.bf16.gmra.mxu3 %vm658_vm4, %v3500_v21  ;;  %v6113_v21 = vld [vmem:[%s6199_s27 + $0x4c] sm:$0xf]  ;;  %v3474_v58 = vunpack.c.l.b16 %v3198_v35 }
 0x1a2   : > { %v2447_v8 = vrot.slane %v6113_v21, 5  ;;  %v3780_v24 = vsel %vm6385_vm7, %v5809_v11, %v3779_v40  ;;  %v3219_v40 = vshll.u32 %v7051_v19, 16 }
 0x1a3   : > { %v2289_v43 = vpop.f32.mrf.mxu0  ;;  %v3501_v50 = vpack.c.b16 %v3474_v58, %v3473_v9  ;;  %v6115_v58 = vld [vmem:[%s6199_s27 + $0x58] sm:$0xf] }
 0x1a4   : > { %v1635_v63 = vpop.f32.mrf.mxu3  ;;  %v1000_v55 = vpop.f32.mrf.mxu1  ;;  %v2449_v48 = vrot.slane %v2447_v8, 4 }
 0x1a5   : > { %v1682_v44 = vadd.f32 %v1635_v63, %v1395_v23  ;;  %v3202_v23 = vrot.slane %v3200_v53, 4  ;;  %v5910_v63 = vld [vmem:[%s6199_s27 + $0x48] sm:$0xff] }
 0x1a6   : > { %5825 = vmatmul.msk.bf16.gmra.mxu0 %vm658_vm4, %v3898_v17  ;;  %v2451_v5 = vsel %vm6385_vm7, %v2449_v48, %v2450_v61  ;;  %v7070_v48 = vld [vmem:[%s6199_s27 + $0x64] sm:$0xf] }
 0x1a7   : > { %v1350_v4 = vpop.f32.mrf.mxu2  ;;  %5599 = vmatmul.msk.bf16.gmra.mxu1 %vm658_vm4, %v2560_v20  ;;  %v7048_v21 = vadd.f32 %v2289_v43, %v1682_v44  ;;  %v3783_v20 = vsel %vm6385_vm7, %v3781_v30, %v3782_v16  ;;  %v3206_v53 = vor.u32 %v3205_v7, %v3202_v23  ;;  %v2448_v43 = vsel %vm6385_vm7, %v5583_v10, %v2447_v8 }
 0x1a8   : > { %v1396_v17 = vadd.f32 %v1350_v4, %v998_v22  ;;  %v3216_v44 = vor.u32 %v3215_v27, %v7045_v56  ;;  %v1001_v16 = vadd.f32 %v1000_v55, %v6510_v49  ;;  %v3871_v22 = vunpack.c.l.b16 %v3780_v24  ;;  %v5794_v27 = vld [vmem:[%s6199_s27 + $0x54] sm:$0xe] }
 0x1a9   : > { %v3872_v62 = vunpack.c.l.b16 %v3783_v20  ;;  %v2534_v30 = vunpack.c.l.b16 %v2448_v43  ;;  %v2535_v8 = vunpack.c.l.b16 %v2451_v5  ;;  %v3207_v23 = vrot.slane %v3206_v53, 4 }
 0x1aa   : > { %v3217_v61 = vrot.slane %v3216_v44, 4  ;;  %v3221_v7 = vrot.slane %v3219_v40, 5  ;;  %v3786_v10 = vrot.slane %v7024_v41, 5  ;;  %v2454_v24 = vrot.slane %v6115_v58, 5  ;;  %v5568_v41 = vld [vmem:[%s6199_s27 + $0x54] sm:$0xe] }
 0x1ab   : > { %v2291_v52 = vpop.f32.mrf.mxu0  ;;  %v2561_v9 = vpack.c.b16 %v2535_v8, %v2534_v30  ;;  %v5810_v5 = vrot.slane %v5794_v27, 9 }
 0x1ac   : > { %v1637_v28 = vpop.f32.mrf.mxu3  ;;  %5712 = vmatmul.msk.bf16.gmra.mxu2 %vm658_vm4, %v5910_v63  ;;  %v1002_v38 = vpop.f32.mrf.mxu1  ;;  %v5742_v63 = vld [vmem:[%s6199_s27 + $0x60] sm:$0xf]  ;;  %v3222_v43 = vsel %vm6211_vm3, %v3217_v61, %v3221_v7  ;;  %v5911_v7 = vld [vmem:[%s6199_s27 + $0x54] sm:$0xff] }
 0x1ad   : > { %v1683_v11 = vadd.f32 %v1637_v28, %v1396_v17  ;;  %v3899_v17 = vpack.c.b16 %v3872_v62, %v3871_v22  ;;  %v3212_v28 = vsel %vm6211_vm3, %v3207_v23, %v7045_v56  ;;  %v3224_v44 = vshrl.u32 %v5742_v63, 16  ;;  %v6116_v62 = vld [vmem:[%s6199_s27 + $0x5c] sm:$0x1] }
 0x1ae   : > { %v3788_v22 = vrot.slane %v3786_v10, 4  ;;  %v3789_v56 = vrot.slane %v7051_v19, 5  ;;  %v3475_v8 = vunpack.c.l.b16 %v3212_v28  ;;  %v2456_v23 = vrot.slane %v2454_v24, 4 }
 0x1af   : > { %v1353_v35 = vpop.f32.mrf.mxu2  ;;  %v7072_v49 = vadd.f32 %v2291_v52, %v1683_v11  ;;  %v3227_v52 = vshll.u32 %v5742_v63, 16  ;;  %v3233_v11 = vshll.u32 %v7070_v48, 16  ;;  %v3476_v27 = vunpack.c.l.b16 %v3222_v43 }
 0x1b0   : > { %v1397_v4 = vadd.f32 %v1353_v35, %v1001_v16  ;;  %v1003_v16 = vadd.f32 %v1002_v38, %v6529_v0  ;;  %v2457_v35 = vrot.slane %v6116_v62, 5  ;;  %v3787_v63 = vsel %vm6385_vm7, %v5810_v5, %v3786_v10 }
 0x1b1   : > { %5777 = vmatmul.msk.bf16.gmra.mxu3 %vm658_vm4, %v3501_v50  ;;  %v3237_v50 = vshrl.u32 %v7070_v48, 16  ;;  %v3226_v0 = vrot.slane %v3224_v44, 4  ;;  %v3229_v38 = vrot.slane %v3227_v52, 5  ;;  %v7093_v19 = vrot.slane %v3233_v11, 5 }
 0x1b2   : > { %v2458_v43 = vsel %vm6385_vm7, %v2456_v23, %v2457_v35  ;;  %v3873_v5 = vunpack.c.l.b16 %v3787_v63  ;;  %v5795_v63 = vld [vmem:[%s6199_s27 + $0x60] sm:$0xe] }
 0x1b3   : > { %v2294_v55 = vpop.f32.mrf.mxu0  ;;  %v3239_v58 = vrot.slane %v3237_v50, 4  ;;  %v3230_v11 = vor.u32 %v3229_v38, %v3226_v0 }
 0x1b4   : > { %v1640_v20 = vpop.f32.mrf.mxu3  ;;  %v1005_v53 = vpop.f32.mrf.mxu1 }
 0x1b5   : > { %v1684_v40 = vadd.f32 %v1640_v20, %v1397_v4  ;;  %v5584_v4 = vrot.slane %v5568_v41, 9  ;;  %v7102_v41 = vld [vmem:[%s6199_s27 + $0x68] sm:$0x1]  ;;  %v3240_v50 = vor.u32 %v3239_v58, %v7093_v19  ;;  %v3231_v23 = vrot.slane %v3230_v11, 4 }
 0x1b6   : > { %5826 = vmatmul.msk.bf16.gmra.mxu0 %vm658_vm4, %v3899_v17 }
 0x1b7   : > { %v1355_v30 = vpop.f32.mrf.mxu2  ;;  %5600 = vmatmul.msk.bf16.gmra.mxu1 %vm658_vm4, %v2561_v9  ;;  %v7091_v17 = vadd.f32 %v2294_v55, %v1684_v40  ;;  %v3790_v9 = vsel %vm6385_vm7, %v3788_v22, %v3789_v56  ;;  %v2455_v28 = vsel %vm6385_vm7, %v5584_v4, %v2454_v24  ;;  %v3502_v55 = vpack.c.b16 %v3476_v27, %v3475_v8  ;;  %v7110_v4 = vld [vmem:[%s6199_s27 + $0x70] sm:$0xf] }
 0x1b8   : > { %v1398_v61 = vadd.f32 %v1355_v30, %v1003_v16  ;;  %v3874_v52 = vunpack.c.l.b16 %v3790_v9  ;;  %v1006_v24 = vadd.f32 %v1005_v53, %v6550_v39  ;;  %v2536_v16 = vunpack.c.l.b16 %v2455_v28  ;;  %v5745_v30 = vld [vmem:[%s6199_s27 + $0x6c] sm:$0xf] }
 0x1b9   : > { %v2537_v22 = vunpack.c.l.b16 %v2458_v43  ;;  %v3243_v56 = vshll.u32 %v7102_v41, 16  ;;  %v3793_v39 = vrot.slane %v7070_v48, 5  ;;  %v3248_v38 = vshrl.u32 %v5745_v30, 16 }
 0x1ba   : > { %v3900_v8 = vpack.c.b16 %v3874_v52, %v3873_v5  ;;  %v3251_v58 = vshll.u32 %v5745_v30, 16  ;;  %v3257_v9 = vshll.u32 %v7110_v4, 16  ;;  %v3261_v28 = vshrl.u32 %v7110_v4, 16  ;;  %v6118_v52 = vld [vmem:[%s6199_s27 + $0x68] sm:$0x1] }
 0x1bb   : > { %v2296_v20 = vpop.f32.mrf.mxu0  ;;  %v3245_v27 = vrot.slane %v3243_v56, 5  ;;  %v2464_v11 = vrot.slane %v6118_v52, 5  ;;  %v3796_v48 = vrot.slane %v7102_v41, 5  ;;  %v3795_v56 = vrot.slane %v3793_v39, 4 }
 0x1bc   : > { %v1642_v10 = vpop.f32.mrf.mxu3  ;;  %5713 = vmatmul.msk.bf16.gmra.mxu2 %vm658_vm4, %v5911_v7  ;;  %v1007_v44 = vpop.f32.mrf.mxu1  ;;  %v2562_v7 = vpack.c.b16 %v2537_v22, %v2536_v16  ;;  %v3236_v16 = vsel %vm6211_vm3, %v3231_v23, %v7093_v19  ;;  %v3253_v30 = vrot.slane %v3251_v58, 5  ;;  %v3259_v41 = vrot.slane %v3257_v9, 5  ;;  %v7135_v23 = vld [vmem:[%s6199_s27 + $0x74] sm:$0x1] }
 0x1bd   : > { %v1685_v40 = vadd.f32 %v1642_v10, %v1398_v61  ;;  %v3241_v61 = vrot.slane %v3240_v50, 4  ;;  %v3477_v52 = vunpack.c.l.b16 %v3236_v16 }
 0x1bf   : > { %v1358_v62 = vpop.f32.mrf.mxu2  ;;  %v7115_v53 = vadd.f32 %v2296_v20, %v1685_v40  ;;  %v5569_v20 = vld [vmem:[%s6199_s27 + $0x60] sm:$0xe]  ;;  %v1008_v40 = vadd.f32 %v1007_v44, %v6569_v6  ;;  %v3246_v22 = vsel %vm6211_vm3, %v3241_v61, %v3245_v27 }
 0x1c0   : > { %v1399_v35 = vadd.f32 %v1358_v62, %v1006_v24  ;;  %v5811_v24 = vrot.slane %v5795_v63, 9  ;;  %v3263_v63 = vrot.slane %v3261_v28, 4  ;;  %v3478_v19 = vunpack.c.l.b16 %v3246_v22 }
 0x1c1   : > { %5778 = vmatmul.msk.bf16.gmra.mxu3 %vm658_vm4, %v3502_v55  ;;  %9443 = vst [vmem:[#allocation4_spill] sm:$0xff] %v7115_v53  ;;  %v6117_v55 = vld [vmem:[%s6199_s27 + $0x64] sm:$0xf] }
 0x1c2   : > { %v2461_v5 = vrot.slane %v6117_v55, 5  ;;  %v5585_v55 = vrot.slane %v5569_v20, 9  ;;  %v3794_v61 = vsel %vm6385_vm7, %v5811_v24, %v3793_v39  ;;  %v3264_v28 = vor.u32 %v3263_v63, %v3259_v41  ;;  %v5748_v63 = vld [vmem:[%s6199_s27 + $0x78] sm:$0xf] }
 0x1c3   : > { %v2299_v0 = vpop.f32.mrf.mxu0  ;;  %v3503_v24 = vpack.c.b16 %v3478_v19, %v3477_v52  ;;  %v3875_v20 = vunpack.c.l.b16 %v3794_v61 }
 0x1c4   : > { %v1645_v43 = vpop.f32.mrf.mxu3  ;;  %v1010_v10 = vpop.f32.mrf.mxu1  ;;  %v2463_v6 = vrot.slane %v2461_v5, 4 }
 0x1c5   : > { %v1686_v50 = vadd.f32 %v1645_v43, %v1399_v35  ;;  %v3250_v35 = vrot.slane %v3248_v38, 4 }
 0x1c6   : > { %5827 = vmatmul.msk.bf16.gmra.mxu0 %vm658_vm4, %v3900_v8  ;;  %v5912_v8 = vld [vmem:[%s6199_s27 + $0x60] sm:$0xff]  ;;  %v2465_v9 = vsel %vm6385_vm7, %v2463_v6, %v2464_v11  ;;  %v5796_v11 = vld [vmem:[%s6199_s27 + $0x6c] sm:$0xe] }
 0x1c7   : > { %v1360_v62 = vpop.f32.mrf.mxu2  ;;  %5601 = vmatmul.msk.bf16.gmra.mxu1 %vm658_vm4, %v2562_v7  ;;  %v7132_v44 = vadd.f32 %v2299_v0, %v1686_v50  ;;  %v3797_v7 = vsel %vm6385_vm7, %v3795_v56, %v3796_v48  ;;  %v3254_v27 = vor.u32 %v3253_v30, %v3250_v35  ;;  %v2462_v0 = vsel %vm6385_vm7, %v5585_v55, %v2461_v5  ;;  %v7153_v55 = vld [vmem:[%s6199_s27 + $0x7c] sm:$0xf] }
 0x1c8   : > { %v1400_v43 = vadd.f32 %v1360_v62, %v1008_v40  ;;  %v3267_v50 = vshll.u32 %v7135_v23, 16  ;;  %v1011_v48 = vadd.f32 %v1010_v10, %v6588_v45  ;;  %v3876_v40 = vunpack.c.l.b16 %v3797_v7 }
 0x1c9   : > { %v2538_v22 = vunpack.c.l.b16 %v2462_v0  ;;  %v2539_v56 = vunpack.c.l.b16 %v2465_v9  ;;  %v3255_v5 = vrot.slane %v3254_v27, 4  ;;  %v3265_v35 = vrot.slane %v3264_v28, 4  ;;  %v6119_v0 = vld [vmem:[%s6199_s27 + $0x70] sm:$0xf] }
 0x1ca   : > { %v3269_v30 = vrot.slane %v3267_v50, 5  ;;  %v5812_v52 = vrot.slane %v5796_v11, 9  ;;  %v2468_v9 = vrot.slane %v6119_v0, 5  ;;  %v3272_v28 = vshrl.u32 %v5748_v63, 16 }
 0x1cb   : > { %v2301_v53 = vpop.f32.mrf.mxu0  ;;  %v2563_v6 = vpack.c.b16 %v2539_v56, %v2538_v22  ;;  %v3260_v7 = vsel %vm6211_vm3, %v3255_v5, %v3259_v41  ;;  %v3275_v50 = vshll.u32 %v5748_v63, 16  ;;  %v5913_v5 = vld [vmem:[%s6199_s27 + $0x6c] sm:$0xff] }
 0x1cc   : > { %v1647_v38 = vpop.f32.mrf.mxu3  ;;  %5714 = vmatmul.msk.bf16.gmra.mxu2 %vm658_vm4, %v5912_v8  ;;  %v1012_v58 = vpop.f32.mrf.mxu1  ;;  %v3800_v8 = vrot.slane %v7110_v4, 5  ;;  %v3270_v27 = vsel %vm6211_vm3, %v3265_v35, %v3269_v30  ;;  %v2470_v35 = vrot.slane %v2468_v9, 4  ;;  %v6120_v30 = vld [vmem:[%s6199_s27 + $0x74] sm:$0x1] }
 0x1cd   : > { %v1687_v39 = vadd.f32 %v1647_v38, %v1400_v43  ;;  %v3901_v43 = vpack.c.b16 %v3876_v40, %v3875_v20  ;;  %v5570_v38 = vld [vmem:[%s6199_s27 + $0x6c] sm:$0xe]  ;;  %v3479_v40 = vunpack.c.l.b16 %v3260_v7  ;;  %v2471_v11 = vrot.slane %v6120_v30, 5  ;;  %v7180_v7 = vld [vmem:[%s6199_s27 + $0x80] sm:$0x1] }
 0x1ce   : > { %v3802_v41 = vrot.slane %v3800_v8, 4  ;;  %v3801_v22 = vsel %vm6385_vm7, %v5812_v52, %v3800_v8  ;;  %v5586_v56 = vrot.slane %v5570_v38, 9 }
 0x1cf   : > { %v1363_v16 = vpop.f32.mrf.mxu2  ;;  %v7155_v45 = vadd.f32 %v2301_v53, %v1687_v39  ;;  %v3281_v53 = vshll.u32 %v7153_v55, 16  ;;  %v3285_v39 = vshrl.u32 %v7153_v55, 16  ;;  %v2472_v0 = vsel %vm6385_vm7, %v2470_v35, %v2471_v11 }
 0x1d0   : > { %v1401_v62 = vadd.f32 %v1363_v16, %v1011_v48  ;;  %v3803_v48 = vrot.slane %v7135_v23, 5  ;;  %v3480_v16 = vunpack.c.l.b16 %v3270_v27  ;;  %v3877_v27 = vunpack.c.l.b16 %v3801_v22  ;;  %v7192_v22 = vld [vmem:[%s6199_s27 + $0x88] sm:$0xf] }
 0x1d1   : > { %5779 = vmatmul.msk.bf16.gmra.mxu3 %vm658_vm4, %v3503_v24  ;;  %v1013_v24 = vadd.f32 %v1012_v58, %v6611_v12  ;;  %v3274_v12 = vrot.slane %v3272_v28, 4  ;;  %v3277_v58 = vrot.slane %v3275_v50, 5  ;;  %v7175_v23 = vrot.slane %v3281_v53, 5 }
 0x1d2   : > { %v3504_v52 = vpack.c.b16 %v3480_v16, %v3479_v40  ;;  %v2469_v38 = vsel %vm6385_vm7, %v5586_v56, %v2468_v9  ;;  %v5751_v40 = vld [vmem:[%s6199_s27 + $0x84] sm:$0xf] }
 0x1d3   : > { %v2304_v10 = vpop.f32.mrf.mxu0  ;;  %v3278_v50 = vor.u32 %v3277_v58, %v3274_v12  ;;  %v3299_v58 = vshll.u32 %v5751_v40, 16 }
 0x1d4   : > { %v1650_v19 = vpop.f32.mrf.mxu3  ;;  %v1015_v61 = vpop.f32.mrf.mxu1 }
 0x1d5   : > { %v1688_v4 = vadd.f32 %v1650_v19, %v1401_v62  ;;  %v3279_v56 = vrot.slane %v3278_v50, 4 }
 0x1d6   : > { %5828 = vmatmul.msk.bf16.gmra.mxu0 %vm658_vm4, %v3901_v43  ;;  %v3287_v43 = vrot.slane %v3285_v39, 4  ;;  %v1016_v39 = vadd.f32 %v1015_v61, %v6630_v59  ;;  %v3807_v59 = vrot.slane %v7153_v55, 5  ;;  %v3296_v61 = vshrl.u32 %v5751_v40, 16 }
 0x1d7   : > { %v1365_v20 = vpop.f32.mrf.mxu2  ;;  %5602 = vmatmul.msk.bf16.gmra.mxu1 %vm658_vm4, %v2563_v6  ;;  %v7173_v63 = vadd.f32 %v2304_v10, %v1688_v4  ;;  %v3804_v6 = vsel %vm6385_vm7, %v3802_v41, %v3803_v48  ;;  %v2540_v48 = vunpack.c.l.b16 %v2469_v38  ;;  %v5571_v38 = vld [vmem:[%s6199_s27 + $0x78] sm:$0xe] }
 0x1d8   : > { %v1402_v62 = vadd.f32 %v1365_v20, %v1013_v24  ;;  %v3878_v4 = vunpack.c.l.b16 %v3804_v6  ;;  %v3288_v53 = vor.u32 %v3287_v43, %v7175_v23  ;;  %v3291_v24 = vshll.u32 %v7180_v7, 16 }
 0x1d9   : > { %v2541_v20 = vunpack.c.l.b16 %v2472_v0  ;;  %v3305_v43 = vshll.u32 %v7192_v22, 16  ;;  %v3309_v6 = vshrl.u32 %v7192_v22, 16  ;;  %v6121_v0 = vld [vmem:[%s6199_s27 + $0x7c] sm:$0xf] }
 0x1da   : > { %v3902_v9 = vpack.c.b16 %v3878_v4, %v3877_v27  ;;  %v3293_v35 = vrot.slane %v3291_v24, 5  ;;  %v2475_v4 = vrot.slane %v6121_v0, 5  ;;  %v3809_v24 = vrot.slane %v3807_v59, 4 }
 0x1db   : > { %v2306_v19 = vpop.f32.mrf.mxu0  ;;  %v2564_v12 = vpack.c.b16 %v2541_v20, %v2540_v48  ;;  %v3301_v20 = vrot.slane %v3299_v58, 5  ;;  %v3307_v40 = vrot.slane %v3305_v43, 5 }
 0x1dc   : > { %v1652_v8 = vpop.f32.mrf.mxu3  ;;  %5715 = vmatmul.msk.bf16.gmra.mxu2 %vm658_vm4, %v5913_v5  ;;  %v1017_v10 = vpop.f32.mrf.mxu1  ;;  %v5797_v5 = vld [vmem:[%s6199_s27 + $0x78] sm:$0xe] }
 0x1dd   : > { %v1689_v28 = vadd.f32 %v1652_v8, %v1402_v62  ;;  %v3289_v62 = vrot.slane %v3288_v53, 4  ;;  %v5813_v27 = vrot.slane %v5797_v5, 9  ;;  %v1018_v53 = vadd.f32 %v1017_v10, %v6647_v32  ;;  %v6122_v5 = vld [vmem:[%s6199_s27 + $0x80] sm:$0x1] }
 0x1df   : > { %v1368_v41 = vpop.f32.mrf.mxu2  ;;  %v7197_v30 = vadd.f32 %v2306_v19, %v1689_v28  ;;  %v3284_v19 = vsel %vm6211_vm3, %v3279_v56, %v7175_v23  ;;  %v3810_v28 = vrot.slane %v7180_v7, 5  ;;  %v3311_v23 = vrot.slane %v3309_v6, 4  ;;  %v5914_v56 = vld [vmem:[%s6199_s27 + $0x78] sm:$0xff] }
 0x1e0   : > { %v1403_v16 = vadd.f32 %v1368_v41, %v1016_v39  ;;  %v3294_v39 = vsel %vm6211_vm3, %v3289_v62, %v3293_v35  ;;  %v3298_v41 = vrot.slane %v3296_v61, 4  ;;  %v2477_v7 = vrot.slane %v2475_v4, 4  ;;  %v7218_v62 = vld [vmem:[%s6199_s27 + $0x8c] sm:$0x1] }
 0x1e1   : > { %5780 = vmatmul.msk.bf16.gmra.mxu3 %vm658_vm4, %v3504_v52  ;;  %v3481_v32 = vunpack.c.l.b16 %v3284_v19  ;;  %v3482_v10 = vunpack.c.l.b16 %v3294_v39  ;;  %v3808_v61 = vsel %vm6385_vm7, %v5813_v27, %v3807_v59  ;;  %v3315_v0 = vshll.u32 %v7218_v62, 16 }
 0x1e2   : > { %v3302_v58 = vor.u32 %v3301_v20, %v3298_v41  ;;  %v3879_v19 = vunpack.c.l.b16 %v3808_v61 }
 0x1e3   : > { %v2309_v11 = vpop.f32.mrf.mxu0  ;;  %v3505_v27 = vpack.c.b16 %v3482_v10, %v3481_v32  ;;  %v3317_v20 = vrot.slane %v3315_v0, 5  ;;  %v5572_v0 = vld [vmem:[%s6199_s27 + $0x84] sm:$0xe] }
 0x1e4   : > { %v1655_v8 = vpop.f32.mrf.mxu3  ;;  %v2632_v52 = vpop.f32.mrf.mxu1  ;;  %v3303_v41 = vrot.slane %v3302_v58, 4 }
 0x1e5   : > { %v1690_v50 = vadd.f32 %v1655_v8, %v1403_v16  ;;  %v2712_v55 = vadd.f32 %v2632_v52, %v6664_v46  ;;  %v5587_v46 = vrot.slane %v5571_v38, 9  ;;  %v3312_v38 = vor.u32 %v3311_v23, %v3307_v40 }
 0x1e6   : > { %5829 = vmatmul.msk.bf16.gmra.mxu0 %vm658_vm4, %v3902_v9  ;;  %v2478_v9 = vrot.slane %v6122_v5, 5  ;;  %v3814_v23 = vrot.slane %v7192_v22, 5 }
 0x1e7   : > { %v1370_v48 = vpop.f32.mrf.mxu2  ;;  %5603 = vmatmul.msk.bf16.gmra.mxu1 %vm658_vm4, %v2564_v12  ;;  %v7215_v8 = vadd.f32 %v2309_v11, %v1690_v50  ;;  %v3811_v12 = vsel %vm6385_vm7, %v3809_v24, %v3810_v28  ;;  %v2476_v11 = vsel %vm6385_vm7, %v5587_v46, %v2475_v4  ;;  %v3313_v46 = vrot.slane %v3312_v38, 4 }
 0x1e8   : > { %v1404_v16 = vadd.f32 %v1370_v48, %v1018_v53  ;;  %v2479_v52 = vsel %vm6385_vm7, %v2477_v7, %v2478_v9  ;;  %v3880_v28 = vunpack.c.l.b16 %v3811_v12  ;;  %v2542_v39 = vunpack.c.l.b16 %v2476_v11  ;;  %v5798_v48 = vld [vmem:[%s6199_s27 + $0x84] sm:$0xe]  ;;  %v6123_v11 = vld [vmem:[%s6199_s27 + $0x88] sm:$0xf] }
 0x1e9   : > { %v2543_v24 = vunpack.c.l.b16 %v2479_v52  ;;  %v5814_v7 = vrot.slane %v5798_v48, 9  ;;  %v3318_v58 = vsel %vm6211_vm3, %v3313_v46, %v3317_v20  ;;  %v2482_v52 = vrot.slane %v6123_v11, 5  ;;  %v6124_v46 = vld [vmem:[%s6199_s27 + $0x8c] sm:$0x1] }
 0x1ea   : > { %v5588_v48 = vrot.slane %v5572_v0, 9  ;;  %v2485_v20 = vrot.slane %v6124_v46, 5 }
 0x1eb   : > { %v2311_v35 = vpop.f32.mrf.mxu0  ;;  %v2565_v32 = vpack.c.b16 %v2543_v24, %v2542_v39 }
 0x1ec   : > { %v1657_v43 = vpop.f32.mrf.mxu3  ;;  %5716 = vmatmul.msk.bf16.gmra.mxu2 %vm658_vm4, %v5914_v56  ;;  %v2634_v6 = vpop.f32.mrf.mxu1  ;;  %v5754_v56 = vld [vmem:[%s6199_s27 + $0x90] sm:$0xf] }
 0x1ed   : > { %v1691_v59 = vadd.f32 %v1657_v43, %v1404_v16  ;;  %v2713_v50 = vadd.f32 %v2634_v6, %v6677_v42  ;;  %v3903_v16 = vpack.c.b16 %v3880_v28, %v3879_v19  ;;  %v7236_v42 = vld [vmem:[%s6199_s27 + $0x94] sm:$0xf]  ;;  %v3320_v10 = vshrl.u32 %v5754_v56, 16 }
 0x1ee   : > { %v3323_v61 = vshll.u32 %v5754_v56, 16  ;;  %v3816_v43 = vrot.slane %v3814_v23, 4  ;;  %v3817_v6 = vrot.slane %v7218_v62, 5  ;;  %v3815_v19 = vsel %vm6385_vm7, %v5814_v7, %v3814_v23  ;;  %v7263_v7 = vld [vmem:[%s6199_s27 + $0x98] sm:$0x1] }
 0x1ef   : > { %v2919_v53 = vpop.f32.mrf.mxu2  ;;  %v7238_v5 = vadd.f32 %v2311_v35, %v1691_v59  ;;  %v3333_v59 = vshrl.u32 %v7236_v42, 16 }
 0x1f0   : > { %v2999_v4 = vadd.f32 %v2919_v53, %v2712_v55  ;;  %v3308_v55 = vsel %vm6211_vm3, %v3303_v41, %v3307_v40  ;;  %v3329_v40 = vshll.u32 %v7236_v42, 16  ;;  %v3484_v53 = vunpack.c.l.b16 %v3318_v58  ;;  %v5915_v41 = vld [vmem:[%s6199_s27 + $0x84] sm:$0xff] }
 0x1f1   : > { %5781 = vmatmul.msk.bf16.gmra.mxu3 %vm658_vm4, %v3505_v27  ;;  %9444 = vst [vmem:[#allocation5_spill] sm:$0xff] %v7238_v5  ;;  %v3483_v27 = vunpack.c.l.b16 %v3308_v55  ;;  %v3325_v39 = vrot.slane %v3323_v61, 5  ;;  %v3818_v56 = vsel %vm6385_vm7, %v3816_v43, %v3817_v6  ;;  %v3335_v23 = vrot.slane %v3333_v59, 4 }
 0x1f3   : > { %v3971_v9 = vpop.f32.mrf.mxu0  ;;  %v3506_v55 = vpack.c.b16 %v3484_v53, %v3483_v27 }
 0x1f4   : > { %v3573_v12 = vpop.f32.mrf.mxu3  ;;  %v2637_v22 = vpop.f32.mrf.mxu1 }
 0x1f5   : > { %v3653_v35 = vadd.f32 %v3573_v12, %v2999_v4  ;;  %v2714_v38 = vadd.f32 %v2637_v22, %v6690_v15  ;;  %v3322_v15 = vrot.slane %v3320_v10, 4  ;;  %v2484_v4 = vrot.slane %v2482_v52, 4 }
 0x1f6   : > { %5830 = vmatmul.msk.bf16.gmra.mxu0 %vm658_vm4, %v3903_v16  ;;  %v7260_v16 = vrot.slane %v3329_v40, 5  ;;  %v2483_v12 = vsel %vm6385_vm7, %v5588_v48, %v2482_v52 }
 0x1f7   : > { %v7253_v62 = vadd.f32 %v3971_v9, %v3653_v35  ;;  %v2921_v28 = vpop.f32.mrf.mxu2  ;;  %5604 = vmatmul.msk.bf16.gmra.mxu1 %vm658_vm4, %v2565_v32  ;;  %v3881_v32 = vunpack.c.l.b16 %v3815_v19  ;;  %v2486_v22 = vsel %vm6385_vm7, %v2484_v4, %v2485_v20  ;;  %v3326_v58 = vor.u32 %v3325_v39, %v3322_v15  ;;  %v5757_v19 = vld [vmem:[%s6199_s27 + $0x9c] sm:$0xf] }
 0x1f8   : > { %v3000_v24 = vadd.f32 %v2921_v28, %v2713_v50  ;;  %v3882_v50 = vunpack.c.l.b16 %v3818_v56  ;;  %v3336_v11 = vor.u32 %v3335_v23, %v7260_v16  ;;  %v3339_v35 = vshll.u32 %v7263_v7, 16  ;;  %v7277_v28 = vld [vmem:[%s6199_s27 + $0xa0] sm:$0xf] }
 0x1f9   : > { %v2544_v59 = vunpack.c.l.b16 %v2483_v12  ;;  %v2545_v27 = vunpack.c.l.b16 %v2486_v22  ;;  %v3327_v15 = vrot.slane %v3326_v58, 4  ;;  %v3353_v48 = vshll.u32 %v7277_v28, 16  ;;  %v5573_v22 = vld [vmem:[%s6199_s27 + $0x90] sm:$0xe] }
 0x1fa   : > { %v3904_v53 = vpack.c.b16 %v3882_v50, %v3881_v32  ;;  %v3341_v39 = vrot.slane %v3339_v35, 5  ;;  %v3357_v4 = vshrl.u32 %v7277_v28, 16  ;;  %v3821_v56 = vrot.slane %v7236_v42, 5 }
 0x1fb   : > { %v3973_v9 = vpop.f32.mrf.mxu0  ;;  %v2566_v20 = vpack.c.b16 %v2545_v27, %v2544_v59  ;;  %v3824_v59 = vrot.slane %v7263_v7, 5 }
 0x1fc   : > { %v3575_v10 = vpop.f32.mrf.mxu3  ;;  %5717 = vmatmul.msk.bf16.gmra.mxu2 %vm658_vm4, %v5915_v41  ;;  %v2639_v61 = vpop.f32.mrf.mxu1  ;;  %v3347_v41 = vshll.u32 %v5757_v19, 16 }
 0x1fd   : > { %v3654_v43 = vadd.f32 %v3575_v10, %v3000_v24  ;;  %v2715_v6 = vadd.f32 %v2639_v61, %v6703_v13  ;;  %v3337_v13 = vrot.slane %v3336_v11, 4  ;;  %v3344_v24 = vshrl.u32 %v5757_v19, 16  ;;  %v6125_v10 = vld [vmem:[%s6199_s27 + $0x94] sm:$0xf] }
 0x1fe   : > { %v3332_v61 = vsel %vm6211_vm3, %v3327_v15, %v7260_v16  ;;  %v3349_v58 = vrot.slane %v3347_v41, 5  ;;  %v3359_v11 = vrot.slane %v3357_v4, 4  ;;  %v3823_v16 = vrot.slane %v3821_v56, 4  ;;  %v5916_v19 = vld [vmem:[%s6199_s27 + $0x90] sm:$0xff] }
 0x1ff   : > { %v7273_v0 = vadd.f32 %v3973_v9, %v3654_v43  ;;  %v2924_v40 = vpop.f32.mrf.mxu2  ;;  %v5799_v9 = vld [vmem:[%s6199_s27 + $0x90] sm:$0xe]  ;;  %v3342_v12 = vsel %vm6211_vm3, %v3337_v13, %v3341_v39  ;;  %v3346_v42 = vrot.slane %v3344_v24, 4  ;;  %v7293_v43 = vrot.slane %v3353_v48, 5  ;;  %v7302_v39 = vld [vmem:[%s6199_s27 + $0xa4] sm:$0x1] }
 0x200   : > { %v3001_v52 = vadd.f32 %v2924_v40, %v2714_v38  ;;  %v5815_v40 = vrot.slane %v5799_v9, 9  ;;  %v3485_v24 = vunpack.c.l.b16 %v3332_v61  ;;  %v3486_v41 = vunpack.c.l.b16 %v3342_v12 }
 0x201   : > { %5782 = vmatmul.msk.bf16.gmra.mxu3 %vm658_vm4, %v3506_v55  ;;  %v2489_v55 = vrot.slane %v6125_v10, 5  ;;  %v3350_v48 = vor.u32 %v3349_v58, %v3346_v42  ;;  %v3360_v4 = vor.u32 %v3359_v11, %v7293_v43  ;;  %v3825_v7 = vsel %vm6385_vm7, %v3823_v16, %v3824_v59 }
 0x202   : > { %v3507_v61 = vpack.c.b16 %v3486_v41, %v3485_v24 }
 0x203   : > { %v3976_v46 = vpop.f32.mrf.mxu0  ;;  %v2491_v15 = vrot.slane %v2489_v55, 4  ;;  %v3351_v42 = vrot.slane %v3350_v48, 4  ;;  %v3361_v58 = vrot.slane %v3360_v4, 4 }
 0x204   : > { %v3578_v23 = vpop.f32.mrf.mxu3  ;;  %v2642_v38 = vpop.f32.mrf.mxu1 }
 0x205   : > { %v3655_v32 = vadd.f32 %v3578_v23, %v3001_v52  ;;  %v2716_v50 = vadd.f32 %v2642_v38, %v6716_v57  ;;  %v5589_v52 = vrot.slane %v5573_v22, 9  ;;  %v3884_v22 = vunpack.c.l.b16 %v3825_v7 }
 0x206   : > { %5831 = vmatmul.msk.bf16.gmra.mxu0 %vm658_vm4, %v3904_v53  ;;  %v6126_v53 = vld [vmem:[%s6199_s27 + $0x98] sm:$0x1]  ;;  %v3831_v7 = vrot.slane %v7302_v39, 5 }
 0x207   : > { %v7295_v35 = vadd.f32 %v3976_v46, %v3655_v32  ;;  %v2926_v57 = vpop.f32.mrf.mxu2  ;;  %5605 = vmatmul.msk.bf16.gmra.mxu1 %vm658_vm4, %v2566_v20  ;;  %v2492_v13 = vrot.slane %v6126_v53, 5  ;;  %v3822_v20 = vsel %vm6385_vm7, %v5815_v40, %v3821_v56  ;;  %v2490_v9 = vsel %vm6385_vm7, %v5589_v52, %v2489_v55  ;;  %v5800_v55 = vld [vmem:[%s6199_s27 + $0x9c] sm:$0xe] }
 0x208   : > { %v3002_v27 = vadd.f32 %v2926_v57, %v2715_v6  ;;  %v3363_v6 = vshll.u32 %v7302_v39, 16  ;;  %v3883_v12 = vunpack.c.l.b16 %v3822_v20  ;;  %v2546_v40 = vunpack.c.l.b16 %v2490_v9  ;;  %v5574_v9 = vld [vmem:[%s6199_s27 + $0x9c] sm:$0xe] }
 0x209   : > { %v2493_v10 = vsel %vm6385_vm7, %v2491_v15, %v2492_v13  ;;  %v3828_v52 = vrot.slane %v7277_v28, 5  ;;  %v3356_v15 = vsel %vm6211_vm3, %v3351_v42, %v7293_v43  ;;  %v5816_v53 = vrot.slane %v5800_v55, 9  ;;  %v7326_v13 = vld [vmem:[%s6199_s27 + $0xac] sm:$0xf]  ;;  %v6128_v55 = vld [vmem:[%s6199_s27 + $0xa4] sm:$0x1] }
 0x20a   : > { %v2547_v16 = vunpack.c.l.b16 %v2493_v10  ;;  %v3365_v59 = vrot.slane %v3363_v6, 5  ;;  %v6127_v6 = vld [vmem:[%s6199_s27 + $0xa0] sm:$0xf]  ;;  %v3377_v10 = vshll.u32 %v7326_v13, 16 }
 0x20b   : > { %v3978_v46 = vpop.f32.mrf.mxu0  ;;  %v3830_v20 = vrot.slane %v3828_v52, 4  ;;  %v3829_v42 = vsel %vm6385_vm7, %v5816_v53, %v3828_v52 }
 0x20c   : > { %v3580_v23 = vpop.f32.mrf.mxu3  ;;  %5718 = vmatmul.msk.bf16.gmra.mxu2 %vm658_vm4, %v5916_v19  ;;  %v2644_v38 = vpop.f32.mrf.mxu1  ;;  %v2567_v41 = vpack.c.b16 %v2547_v16, %v2546_v40  ;;  %v5917_v40 = vld [vmem:[%s6199_s27 + $0x9c] sm:$0xff]  ;;  %v5590_v16 = vrot.slane %v5574_v9, 9 }
 0x20d   : > { %v3656_v32 = vadd.f32 %v3580_v23, %v3002_v27  ;;  %v2717_v56 = vadd.f32 %v2644_v38, %v6729_v54  ;;  %v5760_v27 = vld [vmem:[%s6199_s27 + $0xa8] sm:$0xf]  ;;  %v3905_v54 = vpack.c.b16 %v3884_v22, %v3883_v12  ;;  %v2496_v23 = vrot.slane %v6127_v6, 5 }
 0x20e   : > { %v3368_v48 = vshrl.u32 %v5760_v27, 16  ;;  %v3371_v28 = vshll.u32 %v5760_v27, 16  ;;  %v3832_v27 = vsel %vm6385_vm7, %v3830_v20, %v3831_v7 }
 0x20f   : > { %v7316_v11 = vadd.f32 %v3978_v46, %v3656_v32  ;;  %v2929_v57 = vpop.f32.mrf.mxu2  ;;  %v3381_v32 = vshrl.u32 %v7326_v13, 16 }
 0x210   : > { %v3003_v19 = vadd.f32 %v2929_v57, %v2716_v50  ;;  %v3366_v50 = vsel %vm6211_vm3, %v3361_v58, %v3365_v59  ;;  %v3373_v58 = vrot.slane %v3371_v28, 5  ;;  %v2498_v59 = vrot.slane %v2496_v23, 4 }
 0x211   : > { %5783 = vmatmul.msk.bf16.gmra.mxu3 %vm658_vm4, %v3507_v61  ;;  %v3487_v61 = vunpack.c.l.b16 %v3356_v15  ;;  %v3488_v12 = vunpack.c.l.b16 %v3366_v50  ;;  %v3383_v15 = vrot.slane %v3381_v32, 4 }
 0x213   : > { %v3981_v24 = vpop.f32.mrf.mxu0  ;;  %v3508_v50 = vpack.c.b16 %v3488_v12, %v3487_v61  ;;  %v5763_v12 = vld [vmem:[%s6199_s27 + $0xb4] sm:$0xf] }
 0x214   : > { %v3583_v4 = vpop.f32.mrf.mxu3  ;;  %v2647_v46 = vpop.f32.mrf.mxu1 }
 0x215   : > { %v3657_v43 = vadd.f32 %v3583_v4, %v3003_v19  ;;  %v2718_v38 = vadd.f32 %v2647_v46, %v6742_v33  ;;  %v3370_v33 = vrot.slane %v3368_v48, 4  ;;  %v2499_v19 = vrot.slane %v6128_v55, 5 }
 0x216   : > { %5832 = vmatmul.msk.bf16.gmra.mxu0 %vm658_vm4, %v3905_v54  ;;  %v7346_v54 = vrot.slane %v3377_v10, 5  ;;  %v3885_v4 = vunpack.c.l.b16 %v3829_v42  ;;  %v2497_v48 = vsel %vm6385_vm7, %v5590_v16, %v2496_v23  ;;  %v3395_v16 = vshll.u32 %v5763_v12, 16 }
 0x217   : > { %v7337_v22 = vadd.f32 %v3981_v24, %v3657_v43  ;;  %v2931_v39 = vpop.f32.mrf.mxu2  ;;  %5606 = vmatmul.msk.bf16.gmra.mxu1 %vm658_vm4, %v2567_v41  ;;  %v7349_v24 = vld [vmem:[%s6199_s27 + $0xb0] sm:$0x1]  ;;  %v2500_v28 = vsel %vm6385_vm7, %v2498_v59, %v2499_v19  ;;  %v3374_v46 = vor.u32 %v3373_v58, %v3370_v33  ;;  %v2548_v32 = vunpack.c.l.b16 %v2497_v48 }
 0x218   : > { %v3004_v57 = vadd.f32 %v2931_v39, %v2717_v56  ;;  %v3886_v56 = vunpack.c.l.b16 %v3832_v27  ;;  %v3384_v6 = vor.u32 %v3383_v15, %v7346_v54  ;;  %v3387_v43 = vshll.u32 %v7349_v24, 16  ;;  %v7363_v39 = vld [vmem:[%s6199_s27 + $0xb8] sm:$0xf] }
 0x219   : > { %v2549_v61 = vunpack.c.l.b16 %v2500_v28  ;;  %v3375_v42 = vrot.slane %v3374_v46, 4  ;;  %v3401_v59 = vshll.u32 %v7363_v39, 16  ;;  %v3405_v55 = vshrl.u32 %v7363_v39, 16  ;;  %v5575_v46 = vld [vmem:[%s6199_s27 + $0xa8] sm:$0xe] }
 0x21a   : > { %v3906_v33 = vpack.c.b16 %v3886_v56, %v3885_v4  ;;  %v3385_v58 = vrot.slane %v3384_v6, 4  ;;  %v3835_v15 = vrot.slane %v7326_v13, 5  ;;  %v6129_v4 = vld [vmem:[%s6199_s27 + $0xac] sm:$0xf] }
 0x21b   : > { %v3983_v41 = vpop.f32.mrf.mxu0  ;;  %v2568_v27 = vpack.c.b16 %v2549_v61, %v2548_v32  ;;  %v3403_v6 = vrot.slane %v3401_v59, 5  ;;  %v7384_v61 = vld [vmem:[%s6199_s27 + $0xbc] sm:$0x1] }
 0x21c   : > { %v3585_v52 = vpop.f32.mrf.mxu3  ;;  %5719 = vmatmul.msk.bf16.gmra.mxu2 %vm658_vm4, %v5917_v40  ;;  %v2649_v53 = vpop.f32.mrf.mxu1  ;;  %v3392_v40 = vshrl.u32 %v5763_v12, 16  ;;  %v3837_v32 = vrot.slane %v3835_v15, 4 }
 0x21d   : > { %v3658_v20 = vadd.f32 %v3585_v52, %v3004_v57  ;;  %v2719_v7 = vadd.f32 %v2649_v53, %v6755_v31  ;;  %v3389_v31 = vrot.slane %v3387_v43, 5  ;;  %v5801_v57 = vld [vmem:[%s6199_s27 + $0xa8] sm:$0xe]  ;;  %v2503_v52 = vrot.slane %v6129_v4, 5 }
 0x21e   : > { %v5817_v28 = vrot.slane %v5801_v57, 9  ;;  %v3394_v13 = vrot.slane %v3392_v40, 4  ;;  %v3407_v43 = vrot.slane %v3405_v55, 4 }
 0x21f   : > { %v7359_v9 = vadd.f32 %v3983_v41, %v3658_v20  ;;  %v2934_v10 = vpop.f32.mrf.mxu2  ;;  %v3390_v48 = vsel %vm6211_vm3, %v3385_v58, %v3389_v31  ;;  %v3397_v20 = vrot.slane %v3395_v16, 5  ;;  %v2505_v58 = vrot.slane %v2503_v52, 4  ;;  %v6130_v31 = vld [vmem:[%s6199_s27 + $0xb0] sm:$0x1] }
 0x220   : > { %v3005_v23 = vadd.f32 %v2934_v10, %v2718_v38  ;;  %v3490_v40 = vunpack.c.l.b16 %v3390_v48  ;;  %v3836_v16 = vsel %vm6385_vm7, %v5817_v28, %v3835_v15  ;;  %v3408_v55 = vor.u32 %v3407_v43, %v3403_v6 }
 0x221   : > { %5784 = vmatmul.msk.bf16.gmra.mxu3 %vm658_vm4, %v3508_v50  ;;  %v3380_v50 = vsel %vm6211_vm3, %v3375_v42, %v7346_v54  ;;  %v5591_v42 = vrot.slane %v5575_v46, 9  ;;  %v3398_v59 = vor.u32 %v3397_v20, %v3394_v13 }
 0x222   : > { %v3489_v57 = vunpack.c.l.b16 %v3380_v50  ;;  %v3409_v13 = vrot.slane %v3408_v55, 4 }
 0x223   : > { %v3986_v19 = vpop.f32.mrf.mxu0  ;;  %v3399_v46 = vrot.slane %v3398_v59, 4 }
 0x224   : > { %v3588_v38 = vpop.f32.mrf.mxu3  ;;  %v2652_v41 = vpop.f32.mrf.mxu1  ;;  %v3509_v4 = vpack.c.b16 %v3490_v40, %v3489_v57  ;;  %v5802_v57 = vld [vmem:[%s6199_s27 + $0xb4] sm:$0xe]  ;;  %v3842_v40 = vrot.slane %v7363_v39, 5 }
 0x225   : > { %v3659_v56 = vadd.f32 %v3588_v38, %v3005_v23  ;;  %v2720_v53 = vadd.f32 %v2652_v41, %v6768_v1  ;;  %v3838_v1 = vrot.slane %v7349_v24, 5  ;;  %v5918_v23 = vld [vmem:[%s6199_s27 + $0xa8] sm:$0xff]  ;;  %v2504_v41 = vsel %vm6385_vm7, %v5591_v42, %v2503_v52 }
 0x226   : > { %5833 = vmatmul.msk.bf16.gmra.mxu0 %vm658_vm4, %v3906_v33  ;;  %v2506_v33 = vrot.slane %v6130_v31, 5 }
 0x227   : > { %v7379_v54 = vadd.f32 %v3986_v19, %v3659_v56  ;;  %v2936_v10 = vpop.f32.mrf.mxu2  ;;  %5607 = vmatmul.msk.bf16.gmra.mxu1 %vm658_vm4, %v2568_v27  ;;  %v3411_v19 = vshll.u32 %v7384_v61, 16  ;;  %v3839_v24 = vsel %vm6385_vm7, %v3837_v32, %v3838_v1  ;;  %v3887_v56 = vunpack.c.l.b16 %v3836_v16 }
 0x228   : > { %v3006_v12 = vadd.f32 %v2936_v10, %v2719_v7  ;;  %v2507_v50 = vsel %vm6385_vm7, %v2505_v58, %v2506_v33  ;;  %v3888_v28 = vunpack.c.l.b16 %v3839_v24  ;;  %v2550_v32 = vunpack.c.l.b16 %v2504_v41  ;;  %v7408_v58 = vld [vmem:[%s6199_s27 + $0xc4] sm:$0xf] }
 0x229   : > { %v3413_v20 = vrot.slane %v3411_v19, 5  ;;  %v2551_v1 = vunpack.c.l.b16 %v2507_v50  ;;  %v6131_v19 = vld [vmem:[%s6199_s27 + $0xb8] sm:$0xf]  ;;  %v3425_v41 = vshll.u32 %v7408_v58, 16  ;;  %v3429_v50 = vshrl.u32 %v7408_v58, 16 }
 0x22b   : > { %v3988_v27 = vpop.f32.mrf.mxu0  ;;  %v3414_v42 = vsel %vm6211_vm3, %v3409_v13, %v3413_v20  ;;  %v2569_v33 = vpack.c.b16 %v2551_v1, %v2550_v32  ;;  %v3844_v13 = vrot.slane %v3842_v40, 4  ;;  %v5919_v1 = vld [vmem:[%s6199_s27 + $0xb4] sm:$0xff] }
 0x22c   : > { %v3590_v38 = vpop.f32.mrf.mxu3  ;;  %5720 = vmatmul.msk.bf16.gmra.mxu2 %vm658_vm4, %v5918_v23  ;;  %v2654_v7 = vpop.f32.mrf.mxu1  ;;  %v5766_v23 = vld [vmem:[%s6199_s27 + $0xc0] sm:$0xf]  ;;  %v3492_v39 = vunpack.c.l.b16 %v3414_v42  ;;  %v3431_v42 = vrot.slane %v3429_v50, 4 }
 0x22d   : > { %v3660_v15 = vadd.f32 %v3590_v38, %v3006_v12  ;;  %v2721_v48 = vadd.f32 %v2654_v7, %v6782_v25  ;;  %v3907_v12 = vpack.c.b16 %v3888_v28, %v3887_v56  ;;  %v3404_v25 = vsel %vm6211_vm3, %v3399_v46, %v3403_v6  ;;  %v9445_v38 = vld [vmem:[#allocation2_spill] sm:$0xff]  ;;  %v5576_v6 = vld [vmem:[%s6199_s27 + $0xb4] sm:$0xe] }
 0x22e   : > { %v3416_v16 = vshrl.u32 %v5766_v23, 16  ;;  %v3845_v56 = vrot.slane %v7384_v61, 5 }
 0x22f   : > { %v7399_v43 = vadd.f32 %v3988_v27, %v3660_v15  ;;  %v2939_v10 = vpop.f32.mrf.mxu2  ;;  %v2510_v27 = vrot.slane %v6131_v19, 5  ;;  %v3491_v15 = vunpack.c.l.b16 %v3404_v25  ;;  %v3427_v25 = vrot.slane %v3425_v41, 5 }
 0x230   : > { %v3007_v52 = vadd.f32 %v2939_v10, %v2720_v53  ;;  %v3419_v53 = vshll.u32 %v5766_v23, 16  ;;  %v3418_v20 = vrot.slane %v3416_v16, 4 }
 0x231   : > { %5785 = vmatmul.msk.bf16.gmra.mxu3 %vm658_vm4, %v3509_v4  ;;  %v5818_v4 = vrot.slane %v5802_v57, 9  ;;  %v2512_v23 = vrot.slane %v2510_v27, 4  ;;  %v7425_v57 = vld [vmem:[%s6199_s27 + $0xc8] sm:$0x1] }
 0x232   : > { %v3421_v10 = vrot.slane %v3419_v53, 5  ;;  %v3435_v41 = vshll.u32 %v7425_v57, 16 }
 0x233   : > { %v3991_v31 = vpop.f32.mrf.mxu0  ;;  %v3843_v61 = vsel %vm6385_vm7, %v5818_v4, %v3842_v40  ;;  %v3432_v40 = vor.u32 %v3431_v42, %v3427_v25 }
 0x234   : > { %v3593_v59 = vpop.f32.mrf.mxu3  ;;  %v2657_v55 = vpop.f32.mrf.mxu1  ;;  %v3889_v50 = vunpack.c.l.b16 %v3843_v61  ;;  %v6133_v61 = vld [vmem:[%s6199_s27 + $0xc4] sm:$0xf] }
 0x235   : > { %v3661_v24 = vadd.f32 %v3593_v59, %v3007_v52  ;;  %v2722_v7 = vadd.f32 %v2657_v55, %v9445_v38  ;;  %v5592_v52 = vrot.slane %v5576_v6, 9  ;;  %v6132_v59 = vld [vmem:[%s6199_s27 + $0xbc] sm:$0x1] }
 0x236   : > { %5834 = vmatmul.msk.bf16.gmra.mxu0 %vm658_vm4, %v3907_v12  ;;  %v2513_v12 = vrot.slane %v6132_v59, 5  ;;  %v5769_v59 = vld [vmem:[%s6199_s27 + $0xcc] sm:$0xf] }
 0x237   : > { %v7419_v28 = vadd.f32 %v3991_v31, %v3661_v24  ;;  %v2941_v46 = vpop.f32.mrf.mxu2  ;;  %5608 = vmatmul.msk.bf16.gmra.mxu1 %vm658_vm4, %v2569_v33  ;;  %v3846_v31 = vsel %vm6385_vm7, %v3844_v13, %v3845_v56  ;;  %v2511_v53 = vsel %vm6385_vm7, %v5592_v52, %v2510_v27  ;;  %v3422_v24 = vor.u32 %v3421_v10, %v3418_v20 }
 0x238   : > { %v3008_v32 = vadd.f32 %v2941_v46, %v2721_v48  ;;  %v3510_v48 = vpack.c.b16 %v3492_v39, %v3491_v15  ;;  %v2514_v19 = vsel %vm6385_vm7, %v2512_v23, %v2513_v12  ;;  %v3890_v4 = vunpack.c.l.b16 %v3846_v31  ;;  %v7445_v12 = vld [vmem:[%s6199_s27 + $0xd0] sm:$0xf] }
 0x239   : > { %v2552_v56 = vunpack.c.l.b16 %v2511_v53  ;;  %v2553_v27 = vunpack.c.l.b16 %v2514_v19  ;;  %v3423_v13 = vrot.slane %v3422_v24, 4  ;;  %v3433_v20 = vrot.slane %v3432_v40, 4 }
 0x23a   : > { %v3437_v10 = vrot.slane %v3435_v41, 5  ;;  %v3849_v23 = vrot.slane %v7408_v58, 5  ;;  %v2517_v31 = vrot.slane %v6133_v61, 5  ;;  %v5577_v58 = vld [vmem:[%s6199_s27 + $0xc0] sm:$0xe]  ;;  %v3440_v19 = vshrl.u32 %v5769_v59, 16 }
 0x23b   : > { %v3993_v55 = vpop.f32.mrf.mxu0  ;;  %v2570_v52 = vpack.c.b16 %v2553_v27, %v2552_v56  ;;  %v3443_v24 = vshll.u32 %v5769_v59, 16  ;;  %v5593_v56 = vrot.slane %v5577_v58, 9  ;;  %v9446_v58 = vld [vmem:[#allocation3_spill] sm:$0xff] }
 0x23c   : > { %v3595_v33 = vpop.f32.mrf.mxu3  ;;  %5721 = vmatmul.msk.bf16.gmra.mxu2 %vm658_vm4, %v5919_v1  ;;  %v2659_v16 = vpop.f32.mrf.mxu1  ;;  %v2519_v27 = vrot.slane %v2517_v31, 4 }
 0x23d   : > { %v3662_v38 = vadd.f32 %v3595_v33, %v3008_v32  ;;  %v2723_v6 = vadd.f32 %v2659_v16, %v6829_v47  ;;  %v3908_v47 = vpack.c.b16 %v3890_v4, %v3889_v50  ;;  %v5803_v32 = vld [vmem:[%s6199_s27 + $0xc0] sm:$0xe]  ;;  %v3438_v16 = vsel %vm6211_vm3, %v3433_v20, %v3437_v10 }
 0x23e   : > { %v5819_v53 = vrot.slane %v5803_v32, 9  ;;  %v3852_v50 = vrot.slane %v7425_v57, 5  ;;  %v3494_v10 = vunpack.c.l.b16 %v3438_v16  ;;  %v3442_v32 = vrot.slane %v3440_v19, 4 }
 0x23f   : > { %v7438_v15 = vadd.f32 %v3993_v55, %v3662_v38  ;;  %v2944_v39 = vpop.f32.mrf.mxu2  ;;  %v3449_v38 = vshll.u32 %v7445_v12, 16 }
 0x240   : > { %v3009_v46 = vadd.f32 %v2944_v39, %v2722_v7  ;;  %v3428_v7 = vsel %vm6211_vm3, %v3423_v13, %v3427_v25  ;;  %v3453_v25 = vshrl.u32 %v7445_v12, 16  ;;  %v5920_v39 = vld [vmem:[%s6199_s27 + $0xc0] sm:$0xff] }
 0x241   : > { %5786 = vmatmul.msk.bf16.gmra.mxu3 %vm658_vm4, %v3510_v48  ;;  %v3493_v20 = vunpack.c.l.b16 %v3428_v7  ;;  %v3451_v59 = vrot.slane %v3449_v38, 5  ;;  %v2518_v7 = vsel %vm6385_vm7, %v5593_v56, %v2517_v31 }
 0x243   : > { %v3996_v1 = vpop.f32.mrf.mxu0  ;;  %v3511_v16 = vpack.c.b16 %v3494_v10, %v3493_v20  ;;  %v3856_v10 = vrot.slane %v7445_v12, 5 }
 0x244   : > { %v3598_v42 = vpop.f32.mrf.mxu3  ;;  %v2662_v55 = vpop.f32.mrf.mxu1 }
 0x245   : > { %v3663_v33 = vadd.f32 %v3598_v42, %v3009_v46  ;;  %v2724_v48 = vadd.f32 %v2662_v55, %v6840_v51  ;;  %v3851_v51 = vrot.slane %v3849_v23, 4  ;;  %v6134_v46 = vld [vmem:[%s6199_s27 + $0xc8] sm:$0x1]  ;;  %v3455_v42 = vrot.slane %v3453_v25, 4  ;;  %v5771_v55 = vld [vmem:[%s6199_s27 + $0xd4] sm:$0x1] }
 0x246   : > { %5835 = vmatmul.msk.bf16.gmra.mxu0 %vm658_vm4, %v3908_v47  ;;  %v2520_v13 = vrot.slane %v6134_v46, 5  ;;  %v3850_v47 = vsel %vm6385_vm7, %v5819_v53, %v3849_v23 }
 0x247   : > { %v7457_v40 = vadd.f32 %v3996_v1, %v3663_v33  ;;  %v2946_v41 = vpop.f32.mrf.mxu2  ;;  %5609 = vmatmul.msk.bf16.gmra.mxu1 %vm658_vm4, %v2570_v52  ;;  %v3445_v1 = vrot.slane %v3443_v24, 5  ;;  %v3853_v57 = vsel %vm6385_vm7, %v3851_v51, %v3852_v50  ;;  %v3891_v53 = vunpack.c.l.b16 %v3850_v47 }
 0x248   : > { %v3010_v4 = vadd.f32 %v2946_v41, %v2723_v6  ;;  %v2521_v33 = vsel %vm6385_vm7, %v2519_v27, %v2520_v13  ;;  %v3892_v24 = vunpack.c.l.b16 %v3853_v57  ;;  %v3456_v25 = vor.u32 %v3455_v42, %v3451_v59 }
 0x249   : > { %v3446_v38 = vor.u32 %v3445_v1, %v3442_v32  ;;  %v3459_v41 = vshll.u32 %v5771_v55, 16  ;;  %v2555_v46 = vunpack.c.l.b16 %v2521_v33  ;;  %v5804_v1 = vld [vmem:[%s6199_s27 + $0xcc] sm:$0xe]  ;;  %v3859_v33 = vrot.slane %v5771_v55, 5 }
 0x24a   : > { %v3909_v31 = vpack.c.b16 %v3892_v24, %v3891_v53  ;;  %v5820_v12 = vrot.slane %v5804_v1, 9 }
 0x24b   : > { %v3998_v52 = vpop.f32.mrf.mxu0  ;;  %v3447_v56 = vrot.slane %v3446_v38, 4  ;;  %v3461_v27 = vrot.slane %v3459_v41, 5 }
 0x24c   : > { %v3600_v6 = vpop.f32.mrf.mxu3  ;;  %5722 = vmatmul.msk.bf16.gmra.mxu2 %vm658_vm4, %v5920_v39  ;;  %v2664_v61 = vpop.f32.mrf.mxu1  ;;  %v2554_v39 = vunpack.c.l.b16 %v2518_v7  ;;  %v3858_v7 = vrot.slane %v3856_v10, 4 }
 0x24d   : > { %v3664_v23 = vadd.f32 %v3600_v6, %v3010_v4  ;;  %v2725_v19 = vadd.f32 %v2664_v61, %v9446_v58  ;;  %v3457_v4 = vrot.slane %v3456_v25, 4  ;;  %v3857_v58 = vsel %vm6385_vm7, %v5820_v12, %v3856_v10 }
 0x24e   : > { %v2571_v20 = vpack.c.b16 %v2555_v46, %v2554_v39  ;;  %v3860_v36 = vsel %vm6385_vm7, %v3858_v7, %v3859_v33  ;;  %v3893_v55 = vunpack.c.l.b16 %v3857_v58 }
 0x24f   : > { %v7474_v51 = vadd.f32 %v3998_v52, %v3664_v23  ;;  %v2949_v50 = vpop.f32.mrf.mxu2  ;;  %v3462_v57 = vsel %vm6211_vm3, %v3457_v4, %v3461_v27 }
 0x250   : > { %v3011_v5 = vadd.f32 %v2949_v50, %v2724_v48  ;;  %v3452_v48 = vsel %vm6211_vm3, %v3447_v56, %v3451_v59 }
 0x251   : > { %5787 = vmatmul.msk.bf16.gmra.mxu3 %vm658_vm4, %v3511_v16  ;;  %v3495_v16 = vunpack.c.l.b16 %v3452_v48 }
 0x253   : > { %v4001_v13 = vpop.f32.mrf.mxu0 }
 0x254   : > { %v3603_v47 = vpop.f32.mrf.mxu3  ;;  %v2667_v32 = vpop.f32.mrf.mxu1 }
 0x255   : > { %v3665_v42 = vadd.f32 %v3603_v47, %v3011_v5  ;;  %v2726_v52 = vadd.f32 %v2667_v32, %v6876_v29  ;;  %v5921_v5 = vld [vmem:[%s6199_s27 + $0xcc] sm:$0xff]  ;;  %v3496_v29 = vunpack.c.l.b16 %v3462_v57 }
 0x256   : > { %5836 = vmatmul.msk.bf16.gmra.mxu0 %vm658_vm4, %v3909_v31 }
 0x257   : > { %v7485_v6 = vadd.f32 %v4001_v13, %v3665_v42  ;;  %v2951_v61 = vpop.f32.mrf.mxu2  ;;  %5610 = vmatmul.msk.bf16.gmra.mxu1 %vm658_vm4, %v2571_v20  ;;  %v3512_v25 = vpack.c.b16 %v3496_v29, %v3495_v16 }
 0x258   : > { %v3012_v23 = vadd.f32 %v2951_v61, %v2725_v19  ;;  %v3894_v19 = vunpack.c.l.b16 %v3860_v36 }
 0x25a   : > { %v3910_v31 = vpack.c.b16 %v3894_v19, %v3893_v55 }
 0x25b   : > { %v4003_v53 = vpop.f32.mrf.mxu0 }
 0x25c   : > { %v3605_v59 = vpop.f32.mrf.mxu3  ;;  %5723 = vmatmul.msk.bf16.gmra.mxu2 %vm658_vm4, %v5921_v5  ;;  %v2669_v24 = vpop.f32.mrf.mxu1 }
 0x25d   : > { %v3666_v38 = vadd.f32 %v3605_v59, %v3012_v23  ;;  %v2727_v41 = vadd.f32 %v2669_v24, %v6900_v37 }
 0x25f   : > { %v7495_v50 = vadd.f32 %v4003_v53, %v3666_v38  ;;  %v2954_v39 = vpop.f32.mrf.mxu2 }
 0x260   : > { %v3013_v46 = vadd.f32 %v2954_v39, %v2726_v52 }
 0x261   : > { %5788 = vmatmul.msk.bf16.gmra.mxu3 %vm658_vm4, %v3512_v25 }
 0x263   : > { %v4006_v56 = vpop.f32.mrf.mxu0 }
 0x264   : > { %v3608_v18 = vpop.f32.mrf.mxu3  ;;  %v2672_v4 = vpop.f32.mrf.mxu1 }
 0x265   : > { %v3667_v27 = vadd.f32 %v3608_v18, %v3013_v46  ;;  %v2728_v13 = vadd.f32 %v2672_v4, %v6919_v34 }
 0x266   : > { %5837 = vmatmul.msk.bf16.gmra.mxu0 %vm658_vm4, %v3910_v31 }
 0x267   : > { %v7500_v20 = vadd.f32 %v4006_v56, %v3667_v27  ;;  %v2956_v37 = vpop.f32.mrf.mxu2 }
 0x268   : > { %v3014_v10 = vadd.f32 %v2956_v37, %v2727_v41 }
 0x26b   : > { %v4008_v47 = vpop.f32.mrf.mxu0 }
 0x26c   : > { %v3610_v32 = vpop.f32.mrf.mxu3  ;;  %v2674_v1 = vpop.f32.mrf.mxu1 }
 0x26d   : > { %v3668_v42 = vadd.f32 %v3610_v32, %v3014_v10  ;;  %v2729_v52 = vadd.f32 %v2674_v1, %v6943_v3 }
 0x26f   : > { %v7503_v48 = vadd.f32 %v4008_v47, %v3668_v42  ;;  %v2959_v57 = vpop.f32.mrf.mxu2 }
 0x270   : > { %v3015_v61 = vadd.f32 %v2959_v57, %v2728_v13 }
 0x273   : > { %v4011_v12 = vpop.f32.mrf.mxu0 }
 0x274   : > { %v3613_v7 = vpop.f32.mrf.mxu3  ;;  %v2677_v33 = vpop.f32.mrf.mxu1 }
 0x275   : > { %v3669_v34 = vadd.f32 %v3613_v7, %v3015_v61  ;;  %v2730_v23 = vadd.f32 %v2677_v33, %v6962_v2 }
 0x277   : > { %v7506_v5 = vadd.f32 %v4011_v12, %v3669_v34  ;;  %v2961_v16 = vpop.f32.mrf.mxu2 }
 0x278   : > { %v3016_v29 = vadd.f32 %v2961_v16, %v2729_v52  ;;  %v7541_v16 = vld [vmem:[%s9381_s2] ss:$0 sm:$0xff] }
 0x27b   : > { %v4013_v53 = vpop.f32.mrf.mxu0 }
 0x27c   : > { %v3615_v58 = vpop.f32.mrf.mxu3  ;;  %v2679_v36 = vpop.f32.mrf.mxu1 }
 0x27d   : > { %v3670_v59 = vadd.f32 %v3615_v58, %v3016_v29  ;;  %v2731_v3 = vadd.f32 %v2679_v36, %v6986_v26  ;;  %v7551_v58 = vadd.f32 %v7541_v16, %v7253_v62  ;;  %v7555_v36 = vadd.f32 %v7541_v16, %v7295_v35 }
 0x27f   : > { %v7509_v24 = vadd.f32 %v4013_v53, %v3670_v59  ;;  %v2964_v38 = vpop.f32.mrf.mxu2  ;;  %v7547_v53 = vadd.f32 %v7541_v16, %v7273_v0  ;;  %9447 = vst [vmem:[#allocation2_spill] sm:$0xff] %v7555_v36  ;;  %v4189_v62 = vmul.f32 %v7551_v58, %v7551_v58  ;;  %v4191_v35 = vmul.f32 %v7555_v36, %v7555_v36 }
 0x280   : > { %v3017_v25 = vadd.f32 %v2964_v38, %v2730_v23  ;;  %v7563_v38 = vadd.f32 %v7541_v16, %v7316_v11 }
 0x281   : > { %v4121_v11 = vsel %vm4119_vm8, %v7547_v53, 0.0 }
 0x282   : > { %9448 = vst [vmem:[#allocation3_spill] sm:$0xff] %v7563_v38 }
 0x283   : > { %v4016_v41 = vpop.f32.mrf.mxu0 }
 0x284   : > { %v3618_v55 = vpop.f32.mrf.mxu3  ;;  %v2682_v19 = vpop.f32.mrf.mxu1 }
 0x285   : > { %v3671_v39 = vadd.f32 %v3618_v55, %v3017_v25  ;;  %v2732_v2 = vadd.f32 %v2682_v19, %v7005_v60 }
 0x287   : > { %v7512_v46 = vadd.f32 %v4016_v41, %v3671_v39  ;;  %v2966_v31 = vpop.f32.mrf.mxu2  ;;  %v7575_v41 = vadd.f32 %v7541_v16, %v7337_v22  ;;  %v4192_v39 = vmul.f32 %v7563_v38, %v7563_v38  ;;  %v4221_v22 = vsel %vm4119_vm8, %v4189_v62, 0.0 }
 0x288   : > { %v3018_v56 = vadd.f32 %v2966_v31, %v2731_v3  ;;  %v4190_v3 = vmul.f32 %v7547_v53, %v7547_v53  ;;  %v4120_v31 = vsel %vm4119_vm8, %v7551_v58, 0.0 }
 0x289   : > { %9449 = vst [vmem:[#allocation6_spill] sm:$0xff] %v7575_v41 }
 0x28a   : > { %v4222_v19 = vsel %vm4119_vm8, %v4190_v3, 0.0  ;;  %v7609_v3 = vadd.f32 %v7541_v16, %v7399_v43 }
 0x28b   : > { %v4018_v18 = vpop.f32.mrf.mxu0 }
 0x28c   : > { %v3620_v4 = vpop.f32.mrf.mxu3  ;;  %v7514_v27 = vpop.f32.mrf.mxu1  ;;  %9452 = vst [vmem:[#allocation9_spill] sm:$0xff] %v7609_v3 }
 0x28d   : > { %v3672_v13 = vadd.f32 %v3620_v4, %v3018_v56  ;;  %v4123_v56 = vsel %vm4119_vm8, %v7555_v36, 0.0  ;;  %v4193_v4 = vmul.f32 %v7575_v41, %v7575_v41 }
 0x28f   : > { %v7516_v26 = vadd.f32 %v4018_v18, %v3672_v13  ;;  %v2969_v37 = vpop.f32.mrf.mxu2  ;;  %v4224_v18 = vsel %vm4119_vm8, %v4191_v35, 0.0  ;;  %v7598_v13 = vadd.f32 %v7541_v16, %v7379_v54 }
 0x290   : > { %v3019_v10 = vadd.f32 %v2969_v37, %v2732_v2  ;;  %v7586_v2 = vadd.f32 %v7541_v16, %v7359_v9  ;;  %v4122_v37 = vadd.f32 %v4121_v11, %v4120_v31  ;;  %v4223_v9 = vadd.f32 %v4222_v19, %v4221_v22 }
 0x291   : > { %9451 = vst [vmem:[#allocation8_spill] sm:$0xff] %v7598_v13  ;;  %v4127_v19 = vsel %vm4119_vm8, %v7575_v41, 0.0  ;;  %v4228_v31 = vsel %vm4119_vm8, %v4193_v4, 0.0  ;;  %v7622_v22 = vadd.f32 %v7541_v16, %v7419_v28  ;;  %v7633_v4 = vadd.f32 %v7541_v16, %v7438_v15 }
 0x292   : > { %9450 = vst [vmem:[#allocation7_spill] sm:$0xff] %v7586_v2  ;;  %v4124_v35 = vadd.f32 %v4123_v56, %v4122_v37  ;;  %v4225_v11 = vadd.f32 %v4224_v18, %v4223_v9  ;;  %v4129_v56 = vsel %vm4119_vm8, %v7586_v2, 0.0  ;;  %v4196_v37 = vmul.f32 %v7609_v3, %v7609_v3 }
 0x293   : > { %v4021_v47 = vpop.f32.mrf.mxu0  ;;  %9453 = vst [vmem:[#allocation10_spill] sm:$0xff] %v7622_v22  ;;  %v4131_v28 = vsel %vm4119_vm8, %v7598_v13, 0.0  ;;  %v4133_v15 = vsel %vm4119_vm8, %v7609_v3, 0.0 }
 0x294   : > { %v3623_v32 = vpop.f32.mrf.mxu3  ;;  %v7518_v1 = vpop.f32.mrf.mxu1 }
 0x295   : > { %v3673_v42 = vadd.f32 %v3623_v32, %v3019_v10  ;;  %v4226_v32 = vsel %vm4119_vm8, %v4192_v39, 0.0  ;;  %v4195_v39 = vmul.f32 %v7598_v13, %v7598_v13 }
 0x297   : > { %v7520_v52 = vadd.f32 %v4021_v47, %v3673_v42  ;;  %v7522_v60 = vpop.f32.mrf.mxu2  ;;  %v4125_v47 = vsel %vm4119_vm8, %v7563_v38, 0.0  ;;  %v4194_v42 = vmul.f32 %v7586_v2, %v7586_v2  ;;  %v4227_v38 = vadd.f32 %v4226_v32, %v4225_v11 }
 0x298   : > { %v4126_v43 = vadd.f32 %v4125_v47, %v4124_v35  ;;  %v4232_v47 = vsel %vm4119_vm8, %v4195_v39, 0.0  ;;  %v4197_v32 = vmul.f32 %v7622_v22, %v7622_v22 }
 0x299   : > { %v4230_v18 = vsel %vm4119_vm8, %v4194_v42, 0.0  ;;  %v4229_v41 = vadd.f32 %v4228_v31, %v4227_v38  ;;  %v7642_v42 = vadd.f32 %v7541_v16, %v7457_v40  ;;  %v4234_v38 = vsel %vm4119_vm8, %v4196_v37, 0.0 }
 0x29a   : > { %v4128_v9 = vadd.f32 %v4127_v19, %v4126_v43  ;;  %v4198_v19 = vmul.f32 %v7633_v4, %v7633_v4  ;;  %v7653_v31 = vadd.f32 %v7541_v16, %v7474_v51 }
 0x29b   : > { %v7524_v57 = vpop.f32.mrf.mxu0  ;;  %9454 = vst [vmem:[#allocation11_spill] sm:$0xff] %v7642_v42  ;;  %v4231_v11 = vadd.f32 %v4230_v18, %v4229_v41  ;;  %v4236_v18 = vsel %vm4119_vm8, %v4197_v32, 0.0  ;;  %v4199_v37 = vmul.f32 %v7642_v42, %v7642_v42 }
 0x29c   : > { %v7526_v61 = vpop.f32.mrf.mxu3  ;;  %v7528_v12 = vpop.f32.mrf.mxu1  ;;  %v4130_v35 = vadd.f32 %v4129_v56, %v4128_v9  ;;  %9455 = vst [vmem:[#allocation12_spill] sm:$0xff] %v7653_v31  ;;  %v4135_v56 = vsel %vm4119_vm8, %v7622_v22, 0.0  ;;  %v7666_v9 = vadd.f32 %v7541_v16, %v7485_v6  ;;  %v7677_v22 = vadd.f32 %v7541_v16, %v7495_v50 }
 0x29d   : > { %v4233_v41 = vadd.f32 %v4232_v47, %v4231_v11  ;;  %v4238_v47 = vsel %vm4119_vm8, %v4198_v19, 0.0  ;;  %v4139_v6 = vsel %vm4119_vm8, %v7642_v42, 0.0  ;;  %v7686_v19 = vadd.f32 %v7541_v16, %v7500_v20 }
 0x29e   : > { %v4132_v43 = vadd.f32 %v4131_v28, %v4130_v35  ;;  %9456 = vst [vmem:[#allocation13_spill] sm:$0xff] %v7666_v9  ;;  %v4137_v28 = vsel %vm4119_vm8, %v7633_v4, 0.0  ;;  %v4200_v35 = vmul.f32 %v7653_v31, %v7653_v31  ;;  %v4141_v50 = vsel %vm4119_vm8, %v7653_v31, 0.0 }
 0x29f   : > { %v7530_v7 = vpop.f32.mrf.mxu2  ;;  %v4235_v3 = vadd.f32 %v4234_v38, %v4233_v41  ;;  %v4201_v38 = vmul.f32 %v7666_v9, %v7666_v9  ;;  %v4202_v42 = vmul.f32 %v7677_v22, %v7677_v22  ;;  %v4143_v20 = vsel %vm4119_vm8, %v7666_v9, 0.0 }
 0x2a0   : > { %v4134_v51 = vadd.f32 %v4133_v15, %v4132_v43  ;;  %v4240_v15 = vsel %vm4119_vm8, %v4199_v37, 0.0 }
 0x2a1   : > { %v4237_v11 = vadd.f32 %v4236_v18, %v4235_v3  ;;  %v4242_v3 = vsel %vm4119_vm8, %v4200_v35, 0.0 }
 0x2a2   : > { %v4136_v32 = vadd.f32 %v4135_v56, %v4134_v51 }
 0x2a3   : > { %v7532_v33 = vpop.f32.mrf.mxu0  ;;  %v4239_v41 = vadd.f32 %v4238_v47, %v4237_v11  ;;  %v4244_v47 = vsel %vm4119_vm8, %v4201_v38, 0.0  ;;  %v4246_v38 = vsel %vm4119_vm8, %v4202_v42, 0.0  ;;  %v7729_v42 = vadd.f32 %v7541_v16, %v7509_v24 }
 0x2a4   : > { %v7534_v34 = vpop.f32.mrf.mxu3  ;;  %v7536_v23 = vpop.f32.mrf.mxu1  ;;  %v4138_v43 = vadd.f32 %v4137_v28, %v4136_v32  ;;  %v7704_v32 = vadd.f32 %v7541_v16, %v7503_v48  ;;  %v7717_v48 = vadd.f32 %v7541_v16, %v7506_v5 }
 0x2a5   : > { %v4241_v37 = vadd.f32 %v4240_v15, %v4239_v41  ;;  %v2733_v41 = vadd.f32 %v7514_v27, %v7029_v14 }
 0x2a6   : > { %v4140_v51 = vadd.f32 %v4139_v6, %v4138_v43  ;;  %v4203_v6 = vmul.f32 %v7686_v19, %v7686_v19  ;;  %v4145_v43 = vsel %vm4119_vm8, %v7677_v22, 0.0 }
 0x2a7   : > { %v7543_v29 = vpop.f32.mrf.mxu2  ;;  %v4243_v35 = vadd.f32 %v4242_v3, %v4241_v37  ;;  %v4204_v3 = vmul.f32 %v7704_v32, %v7704_v32  ;;  %v2734_v37 = vadd.f32 %v7518_v1, %v7048_v21  ;;  %v2735_v21 = vadd.f32 %v7528_v12, %v7072_v49 }
 0x2a8   : > { %v4142_v11 = vadd.f32 %v4141_v50, %v4140_v51  ;;  %v4147_v50 = vsel %vm4119_vm8, %v7686_v19, 0.0  ;;  %v3020_v51 = vadd.f32 %v7522_v60, %v2733_v41  ;;  %v4248_v27 = vsel %vm4119_vm8, %v4203_v6, 0.0 }
 0x2a9   : > { %v4245_v31 = vadd.f32 %v4244_v47, %v4243_v35  ;;  %v3021_v47 = vadd.f32 %v7530_v7, %v2734_v37  ;;  %v4205_v60 = vmul.f32 %v7717_v48, %v7717_v48  ;;  %v4250_v24 = vsel %vm4119_vm8, %v4204_v3, 0.0  ;;  %v9457_v3 = vld [vmem:[#allocation4_spill] sm:$0xff] }
 0x2aa   : > { %v4144_v9 = vadd.f32 %v4143_v20, %v4142_v11  ;;  %v3674_v6 = vadd.f32 %v7526_v61, %v3020_v51  ;;  %v4206_v7 = vmul.f32 %v7729_v42, %v7729_v42  ;;  %v2736_v49 = vadd.f32 %v7536_v23, %v7091_v17 }
 0x2ab   : > { %v7557_v59 = vpop.f32.mrf.mxu0  ;;  %v4247_v20 = vadd.f32 %v4246_v38, %v4245_v31  ;;  %v7748_v31 = vadd.f32 %v7541_v16, %v7512_v46  ;;  %v4151_v38 = vsel %vm4119_vm8, %v7717_v48, 0.0  ;;  %v7757_v61 = vadd.f32 %v7541_v16, %v7516_v26 }
 0x2ac   : > { %v7565_v25 = vpop.f32.mrf.mxu3  ;;  %v7567_v0 = vpop.f32.mrf.mxu1  ;;  %v4146_v14 = vadd.f32 %v4145_v43, %v4144_v9  ;;  %v4149_v9 = vsel %vm4119_vm8, %v7704_v32, 0.0  ;;  %v3022_v43 = vadd.f32 %v7543_v29, %v2735_v21  ;;  %v4252_v29 = vsel %vm4119_vm8, %v4205_v60, 0.0 }
 0x2ad   : > { %v4249_v1 = vadd.f32 %v4248_v27, %v4247_v20  ;;  %v2737_v46 = vadd.f32 %v7567_v0, %v9457_v3  ;;  %v4153_v23 = vsel %vm4119_vm8, %v7729_v42, 0.0  ;;  %v4254_v20 = vsel %vm4119_vm8, %v4206_v7, 0.0 }
 0x2ae   : > { %v4148_v35 = vadd.f32 %v4147_v50, %v4146_v14  ;;  %v3675_v50 = vadd.f32 %v7534_v34, %v3021_v47  ;;  %v4072_v14 = vadd.f32 %v7524_v57, %v3674_v6  ;;  %v4207_v0 = vmul.f32 %v7748_v31, %v7748_v31 }
 0x2af   : > { %v7577_v55 = vpop.f32.mrf.mxu2  ;;  %v4251_v37 = vadd.f32 %v4250_v24, %v4249_v1  ;;  %v3676_v47 = vadd.f32 %v7565_v25, %v3022_v43  ;;  %v4208_v60 = vmul.f32 %v7757_v61, %v7757_v61  ;;  %v4155_v24 = vsel %vm4119_vm8, %v7748_v31, 0.0 }
 0x2b0   : > { %v4150_v51 = vadd.f32 %v4149_v9, %v4148_v35  ;;  %v3023_v17 = vadd.f32 %v7577_v55, %v2736_v49  ;;  %v4073_v57 = vadd.f32 %v7532_v33, %v3675_v50  ;;  %v7788_v6 = vadd.f32 %v7541_v16, %v4072_v14 }
 0x2b1   : > { %v4253_v55 = vadd.f32 %v4252_v29, %v4251_v37  ;;  %v4074_v7 = vadd.f32 %v7557_v59, %v3676_v47 }
 0x2b2   : > { %v4152_v34 = vadd.f32 %v4151_v38, %v4150_v51  ;;  %v7800_v49 = vadd.f32 %v7541_v16, %v4073_v57 }
 0x2b3   : > { %v7600_v10 = vpop.f32.mrf.mxu0  ;;  %v4255_v9 = vadd.f32 %v4254_v20, %v4253_v55 }
 0x2b4   : > { %v7611_v62 = vpop.f32.mrf.mxu3  ;;  %v7613_v54 = vpop.f32.mrf.mxu1  ;;  %v4154_v1 = vadd.f32 %v4153_v23, %v4152_v34 }
 0x2b5   : > { %v2738_v26 = vadd.f32 %v7613_v54, %v7132_v44  ;;  %v7780_v44 = vadd.f32 %v7541_v16, %v7520_v52  ;;  %v3677_v54 = vadd.f32 %v7611_v62, %v3023_v17 }
 0x2b7   : > { %v7624_v36 = vpop.f32.mrf.mxu2  ;;  %v4209_v38 = vmul.f32 %v7780_v44, %v7780_v44  ;;  %v4075_v59 = vadd.f32 %v7600_v10, %v3677_v54  ;;  %v4159_v37 = vsel %vm4119_vm8, %v7780_v44, 0.0 }
 0x2b8   : > { %v3024_v27 = vadd.f32 %v7624_v36, %v2737_v46  ;;  %v4210_v46 = vmul.f32 %v7788_v6, %v7788_v6 }
 0x2ba   : > { %v4262_v20 = vsel %vm4119_vm8, %v4210_v46, 0.0 }
 0x2bb   : > { %v7644_v2 = vpop.f32.mrf.mxu0 }
 0x2bc   : > { %v7655_v39 = vpop.f32.mrf.mxu3  ;;  %v7657_v40 = vpop.f32.mrf.mxu1 }
 0x2bd   : > { %v2739_v25 = vadd.f32 %v7657_v40, %v7155_v45  ;;  %v3678_v33 = vadd.f32 %v7655_v39, %v3024_v27  ;;  %v4157_v45 = vsel %vm4119_vm8, %v7757_v61, 0.0  ;;  %v4258_v40 = vsel %vm4119_vm8, %v4208_v60, 0.0 }
 0x2be   : > { %v4161_v27 = vsel %vm4119_vm8, %v7788_v6, 0.0 }
 0x2bf   : > { %v7668_v13 = vpop.f32.mrf.mxu2  ;;  %v4076_v51 = vadd.f32 %v7644_v2, %v3678_v33  ;;  %v4260_v2 = vsel %vm4119_vm8, %v4209_v38, 0.0 }
 0x2c0   : > { %v3025_v36 = vadd.f32 %v7668_v13, %v2738_v26  ;;  %v4256_v13 = vsel %vm4119_vm8, %v4207_v0, 0.0  ;;  %v7823_v26 = vadd.f32 %v7541_v16, %v4075_v59  ;;  %v4163_v0 = vsel %vm4119_vm8, %v7800_v49, 0.0 }
 0x2c1   : > { %v4257_v3 = vadd.f32 %v4256_v13, %v4255_v9  ;;  %v7829_v47 = vadd.f32 %v7541_v16, %v4076_v51 }
 0x2c3   : > { %v7688_v56 = vpop.f32.mrf.mxu0 }
 0x2c4   : > { %v7693_v18 = vpop.f32.mrf.mxu3  ;;  %v7697_v28 = vpop.f32.mrf.mxu1 }
 0x2c5   : > { %v2740_v62 = vadd.f32 %v7697_v28, %v7173_v63  ;;  %v3679_v39 = vadd.f32 %v7693_v18, %v3025_v36  ;;  %v4156_v28 = vadd.f32 %v4155_v24, %v4154_v1  ;;  %v7813_v18 = vadd.f32 %v7541_v16, %v4074_v7 }
 0x2c6   : > { %v4213_v24 = vmul.f32 %v7823_v26, %v7823_v26 }
 0x2c7   : > { %v7708_v15 = vpop.f32.mrf.mxu2  ;;  %v4158_v17 = vadd.f32 %v4157_v45, %v4156_v28  ;;  %v4077_v23 = vadd.f32 %v7688_v56, %v3679_v39  ;;  %v4212_v56 = vmul.f32 %v7813_v18, %v7813_v18  ;;  %v4165_v9 = vsel %vm4119_vm8, %v7813_v18, 0.0 }
 0x2c8   : > { %v3026_v52 = vadd.f32 %v7708_v15, %v2739_v25 }
 0x2c9   : > { %v7837_v25 = vadd.f32 %v7541_v16, %v4077_v23 }
 0x2cb   : > { %v7731_v5 = vpop.f32.mrf.mxu0 }
 0x2cc   : > { %v7734_v11 = vpop.f32.mrf.mxu3  ;;  %v2704_v41 = vpop.f32.mrf.mxu1 }
 0x2cd   : > { %v2741_v50 = vadd.f32 %v2704_v41, %v7197_v30  ;;  %v3680_v29 = vadd.f32 %v7734_v11, %v3026_v52  ;;  %v4259_v30 = vadd.f32 %v4258_v40, %v4257_v3  ;;  %v4211_v41 = vmul.f32 %v7800_v49, %v7800_v49 }
 0x2ce   : > { %v4160_v11 = vadd.f32 %v4159_v37, %v4158_v17  ;;  %v4266_v52 = vsel %vm4119_vm8, %v4212_v56, 0.0 }
 0x2cf   : > { %v2989_v12 = vpop.f32.mrf.mxu2  ;;  %v4078_v55 = vadd.f32 %v7731_v5, %v3680_v29  ;;  %v4261_v1 = vadd.f32 %v4260_v2, %v4259_v30  ;;  %v4264_v54 = vsel %vm4119_vm8, %v4211_v41, 0.0  ;;  %v4171_v29 = vsel %vm4119_vm8, %v7837_v25, 0.0  ;;  %v9458_v30 = vld [vmem:[#allocation5_spill] sm:$0xff] }
 0x2d0   : > { %v3027_v15 = vadd.f32 %v2989_v12, %v2740_v62  ;;  %v4167_v62 = vsel %vm4119_vm8, %v7823_v26, 0.0 }
 0x2d1   : > { %v4263_v5 = vadd.f32 %v4262_v20, %v4261_v1 }
 0x2d3   : > { %v4041_v35 = vpop.f32.mrf.mxu0  ;;  %v4265_v39 = vadd.f32 %v4264_v54, %v4263_v5 }
 0x2d4   : > { %v3643_v21 = vpop.f32.mrf.mxu3  ;;  %v2707_v63 = vpop.f32.mrf.mxu1 }
 0x2d5   : > { %v3681_v34 = vadd.f32 %v3643_v21, %v3027_v15  ;;  %v2742_v57 = vadd.f32 %v2707_v63, %v7215_v8  ;;  %v4162_v21 = vadd.f32 %v4161_v27, %v4160_v11  ;;  %v4214_v8 = vmul.f32 %v7829_v47, %v7829_v47 }
 0x2d6   : > { %v4169_v63 = vsel %vm4119_vm8, %v7829_v47, 0.0  ;;  %v4267_v46 = vadd.f32 %v4266_v52, %v4265_v39 }
 0x2d7   : > { %v2991_v43 = vpop.f32.mrf.mxu2  ;;  %v4079_v33 = vadd.f32 %v4041_v35, %v3681_v34  ;;  %v4164_v7 = vadd.f32 %v4163_v0, %v4162_v21  ;;  %v4215_v35 = vmul.f32 %v7837_v25, %v7837_v25  ;;  %v4270_v37 = vsel %vm4119_vm8, %v4214_v8, 0.0 }
 0x2d8   : > { %v3028_v12 = vadd.f32 %v2991_v43, %v2741_v50  ;;  %v7849_v43 = vadd.f32 %v7541_v16, %v4078_v55  ;;  %v4268_v50 = vsel %vm4119_vm8, %v4213_v24, 0.0 }
 0x2d9   : > { %v4166_v38 = vadd.f32 %v4165_v9, %v4164_v7  ;;  %v7857_v28 = vadd.f32 %v7541_v16, %v4079_v33  ;;  %v4272_v27 = vsel %vm4119_vm8, %v4215_v35, 0.0 }
 0x2da   : > { %v4173_v34 = vsel %vm4119_vm8, %v7849_v43, 0.0 }
 0x2db   : > { %v4043_v10 = vpop.f32.mrf.mxu0  ;;  %v4168_v51 = vadd.f32 %v4167_v62, %v4166_v38  ;;  %v4217_v11 = vmul.f32 %v7857_v28, %v7857_v28 }
 0x2dc   : > { %v3645_v14 = vpop.f32.mrf.mxu3  ;;  %v2709_v40 = vpop.f32.mrf.mxu1 }
 0x2dd   : > { %v3682_v60 = vadd.f32 %v3645_v14, %v3028_v12  ;;  %v2743_v41 = vadd.f32 %v2709_v40, %v9458_v30  ;;  %v4269_v14 = vadd.f32 %v4268_v50, %v4267_v46  ;;  %v4170_v2 = vadd.f32 %v4169_v63, %v4168_v51 }
 0x2de   : > { %v4276_v9 = vsel %vm4119_vm8, %v4217_v11, 0.0 }
 0x2df   : > { %v2994_v36 = vpop.f32.mrf.mxu2  ;;  %v4080_v45 = vadd.f32 %v4043_v10, %v3682_v60  ;;  %v4216_v10 = vmul.f32 %v7849_v43, %v7849_v43  ;;  %v4271_v56 = vadd.f32 %v4270_v37, %v4269_v14  ;;  %v4172_v55 = vadd.f32 %v4171_v29, %v4170_v2 }
 0x2e0   : > { %v3029_v13 = vadd.f32 %v2994_v36, %v2742_v57  ;;  %v4175_v57 = vsel %vm4119_vm8, %v7857_v28, 0.0  ;;  %v4290_v29 = vlaneseq }
 0x2e1   : > { %v7865_v12 = vadd.f32 %v7541_v16, %v4080_v45  ;;  %v4274_v60 = vsel %vm4119_vm8, %v4216_v10, 0.0  ;;  %v4273_v1 = vadd.f32 %v4272_v27, %v4271_v56  ;;  %v4174_v21 = vadd.f32 %v4173_v34, %v4172_v55 }
 0x2e2   : > { %v6143_v56 = vmov 0.0  }
 0x2e3   : > { %v4046_v59 = vpop.f32.mrf.mxu0  ;;  %v4218_v36 = vmul.f32 %v7865_v12, %v7865_v12  ;;  %v4177_v24 = vsel %vm4119_vm8, %v7865_v12, 0.0  ;;  %v4275_v5 = vadd.f32 %v4274_v60, %v4273_v1  ;;  %v4176_v7 = vadd.f32 %v4175_v57, %v4174_v21 }
 0x2e4   : > { %v3648_v15 = vpop.f32.mrf.mxu3 }
 0x2e5   : > { %v3683_v3 = vadd.f32 %v3648_v15, %v3029_v13  ;;  %v4278_v52 = vsel %vm4119_vm8, %v4218_v36, 0.0  ;;  %v4277_v40 = vadd.f32 %v4276_v9, %v4275_v5  ;;  %v4178_v39 = vadd.f32 %v4177_v24, %v4176_v7 }
 0x2e6   : > { %v6144_v5 = vmov 2048.0  }
 0x2e7   : > { %v4081_v17 = vadd.f32 %v4046_v59, %v3683_v3  ;;  %v2996_v23 = vpop.f32.mrf.mxu2  ;;  %v4279_v59 = vadd.f32 %v4278_v52, %v4277_v40  ;;  %5951 = vrcp.f32 %v6144_v5 }
 0x2e8   : > { %v3030_v0 = vadd.f32 %v2996_v23, %v2743_v41 }
 0x2e9   : > { %v7874_v20 = vadd.f32 %v7541_v16, %v4081_v17 }
 0x2eb   : > { %v4219_v33 = vmul.f32 %v7874_v20, %v7874_v20  ;;  %v4048_v8 = vpop.f32.mrf.mxu0  ;;  %v4179_v62 = vsel %vm4119_vm8, %v7874_v20, 0.0 }
 0x2ec   : > { %v3650_v54 = vpop.f32.mrf.mxu3  ;;  %v4180_v15 = vadd.f32 %v4179_v62, %v4178_v39 }
 0x2ed   : > { %v3684_v13 = vadd.f32 %v3650_v54, %v3030_v0  ;;  %v4280_v38 = vsel %vm4119_vm8, %v4219_v33, 0.0  ;;  %v5952_v7 = vpop.eup %5951 }
 0x2ee   : > { %v4281_v46 = vadd.f32 %v4280_v38, %v4279_v59  ;;  %vm4313_vm11 = vweird.f32 %v5952_v7 }
 0x2ef   : > { %v4082_v45 = vadd.f32 %v4048_v8, %v3684_v13  ;;  %v4309_v8 = vmul.f32 2048.0, %v5952_v7 }
 0x2f1   : > { %v7891_v35 = vadd.f32 %v7541_v16, %v4082_v45  ;;  %v4291_v16 = vand.u32 127, %v4290_v29  ;;  %v4310_v52 = vsub.f32 1.0, %v4309_v8 }
 0x2f3   : > { %v4181_v50 = vsel %vm4119_vm8, %v7891_v35, 0.0  ;;  %v4220_v63 = vmul.f32 %v7891_v35, %v7891_v35  ;;  %vm4292_vm9 = vcmp.lt.s32.totalorder %v4291_v16, 8  ;;  %v4311_v59 = vmul.f32 %v5952_v7, %v4310_v52 }
 0x2f4   : > { %v4182_v3 = vadd.f32 %v4181_v50, %v4180_v15  ;;  %v7898_v55 = vsel %vm4292_vm9, 1.0, %v6143_v56 }
 0x2f5   : > { %v4282_v51 = vsel %vm4119_vm8, %v4220_v63, 0.0  ;;  %v7903_v21 = vsub.f32 1.0, %v7898_v55 }
 0x2f6   : > { %v4183_v37 = vrot.slane %v4182_v3, 4  ;;  %v4283_v10 = vadd.f32 %v4282_v51, %v4281_v46 }
 0x2f8   : > { %v4184_v17 = vadd.f32 %v4183_v37, %v4182_v3  ;;  %v4284_v30 = vrot.slane %v4283_v10, 4  ;;  %v4312_v3 = vadd.f32 %v5952_v7, %v4311_v59 }
 0x2fa   : > { %v4185_v41 = vrot.slane %v4184_v17, 2  ;;  %v4285_v23 = vadd.f32 %v4284_v30, %v4283_v10  ;;  %v4314_v16 = vsel %vm4313_vm11, %v5952_v7, %v4312_v3 }
 0x2fc   : > { %v4186_v14 = vadd.f32 %v4185_v41, %v4184_v17  ;;  %v4286_v2 = vrot.slane %v4285_v23, 2 }
 0x2fe   : > { %v4187_v27 = vrot.slane %v4186_v14, 1  ;;  %v4287_v34 = vadd.f32 %v4286_v2, %v4285_v23 }
 0x300   : > { %v4188_v11 = vadd.f32 %v4187_v27, %v4186_v14  ;;  %v4288_v0 = vrot.slane %v4287_v34, 1 }
 0x302   : > { %v4296_v60 = vmul.f32 %v7898_v55, %v4188_v11  ;;  %v4289_v57 = vadd.f32 %v4288_v0, %v4287_v34  ;;  %v4317_v9 = vmul.f32 %v7903_v21, %v4188_v11 }
 0x304   : > { %v4298_v36 = vsel %vm4297_vm10, %v4296_v60, 0.0  ;;  %v4337_v1 = vmul.f32 %v7898_v55, %v4289_v57  ;;  %v4359_v24 = vmul.f32 %v7903_v21, %v4289_v57  ;;  %v4318_v33 = vsel %vm4297_vm10, %v4317_v9, 0.0 }
 0x305   : > { %4299 = vadd.xlane.f32.xlu0 %v4298_v36 }
 0x306   : > { %v4338_v54 = vsel %vm4297_vm10, %v4337_v1, 0.0  ;;  %v4360_v13 = vsel %vm4297_vm10, %v4359_v24, 0.0 }
 0x307   : > { %4339 = vadd.xlane.f32.xlu1 %v4338_v54 }
 0x30d   : > { %4319 = vadd.xlane.f32.xlu0 %v4318_v33 }
 0x30f   : > { %4361 = vadd.xlane.f32.xlu1 %v4360_v13 }
 0x378   : > { %v4300_v62 = vpop.xlane.xlu0 %4299 }
 0x379   : > { %v4301_v45 = vrot.slane %v4300_v62, 4 }
 0x37a   : > { %v4340_v40 = vpop.xlane.xlu1 %4339 }
 0x37b   : > { %v4302_v39 = vadd.f32 %v4301_v45, %v4300_v62  ;;  %v4341_v38 = vrot.slane %v4340_v40, 4 }
 0x37d   : > { %v4303_v15 = vrot.slane %v4302_v39, 2  ;;  %v4342_v50 = vadd.f32 %v4341_v38, %v4340_v40 }
 0x37f   : > { %v4304_v63 = vadd.f32 %v4303_v15, %v4302_v39  ;;  %v4343_v46 = vrot.slane %v4342_v50, 2 }
 0x380   : > { %v4320_v51 = vpop.xlane.xlu0 %4319 }
 0x381   : > { %v4321_v37 = vrot.slane %v4320_v51, 4  ;;  %v4305_v29 = vrot.slane %v4304_v63, 1  ;;  %v4344_v23 = vadd.f32 %v4343_v46, %v4342_v50 }
 0x382   : > { %v4362_v10 = vpop.xlane.xlu1 %4361 }
 0x383   : > { %v4322_v17 = vadd.f32 %v4321_v37, %v4320_v51  ;;  %v4363_v30 = vrot.slane %v4362_v10, 4  ;;  %v4306_v41 = vadd.f32 %v4305_v29, %v4304_v63  ;;  %v4345_v11 = vrot.slane %v4344_v23, 1 }
 0x385   : > { %v4323_v14 = vrot.slane %v4322_v17, 2  ;;  %v4364_v2 = vadd.f32 %v4363_v30, %v4362_v10  ;;  %5926 = vpush %v4306_v41  ;;  %v4346_v36 = vadd.f32 %v4345_v11, %v4344_v23  ;;  %v4084_v41 = vld [vmem:[%s9381_s2 + $0x1] sm:$0x1] }
 0x386   : > { %5928 = vpush %v4314_v16  ;;  %v9459_v11 = vld [vmem:[#allocation2_spill] sm:$0xff] }
 0x387   : > { %v4324_v27 = vadd.f32 %v4323_v14, %v4322_v17  ;;  %v4365_v34 = vrot.slane %v4364_v2, 2  ;;  %v4085_v14 = vld [vmem:[%s9381_s2 + $0x2] sm:$0x1] }
 0x389   : > { %v4366_v0 = vadd.f32 %v4365_v34, %v4364_v2  ;;  %v4325_v56 = vrot.slane %v4324_v27, 1 }
 0x38b   : > { %v4326_v60 = vadd.f32 %v4325_v56, %v4324_v27  ;;  %v4367_v57 = vrot.slane %v4366_v0, 1 }
 0x38d   : > { %5930 = vpush %v4326_v60  ;;  %v4368_v1 = vadd.f32 %v4367_v57, %v4366_v0  ;;  %v9461_v60 = vld [vmem:[#allocation3_spill] sm:$0xff] }
 0x38e   : > { %5932 = vpush %v4346_v36 }
 0x38f   : > { %5934 = vpush %v4368_v1  ;;  %v9463_v1 = vld [vmem:[#allocation6_spill] sm:$0xff] }
 0x3b6   : > { %s5927_s11 = spop %5926 }
 0x3b7   : > { %s5929_s14 = spop %5928 }
 0x3b8   : > { %s4316_s15 = smul.f32 %s5929_s14, %s5927_s11 }
 0x3ba   : > { %s4357_s17 = smul.f32 %s4316_s15, %s4316_s15  ;;  %v4407_v54 = vstv %s4316_s15 }
 0x3bb   : > { %v4408_v24 = vmul.f32 %v7898_v55, %v4407_v54 }
 0x3be   : > { %s5931_s16 = spop %5930 }
 0x3bf   : > { %s4336_s18 = smul.f32 %s5931_s16, %s5929_s14  ;;  %s5933_s19 = spop %5932 }
 0x3c0   : > { %s4356_s20 = smul.f32 %s5933_s19, %s5929_s14  ;;  %s5935_s21 = spop %5934 }
 0x3c1   : > { %s4379_s22 = smul.f32 %s4336_s18, %s4336_s18  ;;  %v4409_v9 = vstv %s4336_s18 }
 0x3c2   : > { %v4410_v33 = vmul.f32 %v4409_v9, %v7903_v21  ;;  %s4358_s23 = ssub.f32 %s4356_s20, %s4357_s17  ;;  %s4378_s24 = smul.f32 %s5935_s21, %s5929_s14  ;;  %v9465_v9 = vld [vmem:[#allocation7_spill] sm:$0xff] }
 0x3c4   : > { %v4411_v13 = vadd.f32 %v4410_v33, %v4408_v24  ;;  %s4381_s25 = sadd.f32 1e-05, %s4358_s23  ;;  %v9467_v33 = vld [vmem:[#allocation8_spill] sm:$0xff] }
 0x3c5   : > { %s4380_s26 = ssub.f32 %s4378_s24, %s4379_s22 }
 0x3c6   : > { %v4382_v5 = vstv %s4381_s25 }
 0x3c7   : > { %5953 = vrsqrt.f32 %v4382_v5  ;;  %s4394_s27 = sadd.f32 1e-05, %s4380_s26  ;;  %vm4389_vm13 = vweird.f32 %v4382_v5 }
 0x3c9   : > { %v4395_v7 = vstv %s4394_s27 }
 0x3ca   : > { %5955 = vrsqrt.f32 %v4395_v7  ;;  %vm4402_vm0 = vweird.f32 %v4395_v7 }
 0x3cd   : > { %v5954_v8 = vpop.eup %5953 }
 0x3ce   : > { %v4384_v52 = vmul.f32 %v5954_v8, %v4382_v5  ;;  %vm4390_vm12 = vweird.f32 %v5954_v8 }
 0x3cf   : > { %vm4391_vm14 = vmor %vm4389_vm13, %vm4390_vm12 }
 0x3d0   : > { %v5956_v62 = vpop.eup %5955  ;;  %v4385_v45 = vmul.f32 %v5954_v8, %v4384_v52 }
 0x3d1   : > { %v4397_v40 = vmul.f32 %v5956_v62, %v4395_v7  ;;  %vm4403_vm15 = vweird.f32 %v5956_v62 }
 0x3d2   : > { %v4386_v39 = vmul.f32 0.5, %v4385_v45  ;;  %vm4404_vm1 = vmor %vm4402_vm0, %vm4403_vm15 }
 0x3d3   : > { %v4398_v38 = vmul.f32 %v5956_v62, %v4397_v40 }
 0x3d4   : > { %v4387_v59 = vsub.f32 1.5, %v4386_v39 }
 0x3d5   : > { %v4399_v15 = vmul.f32 0.5, %v4398_v38 }
 0x3d6   : > { %v4388_v50 = vmul.f32 %v5954_v8, %v4387_v59  ;;  %v9472_v59 = vld [vmem:[#allocation11_spill] sm:$0xff] }
 0x3d7   : > { %v4400_v63 = vsub.f32 1.5, %v4399_v15 }
 0x3d8   : > { %v4392_v3 = vsel %vm4391_vm14, %v5954_v8, %v4388_v50  ;;  %v9469_v8 = vld [vmem:[#allocation9_spill] sm:$0xff] }
 0x3d9   : > { %5936 = vpush %v4392_v3  ;;  %v4401_v46 = vmul.f32 %v5956_v62, %v4400_v63  ;;  %v9474_v3 = vld [vmem:[#allocation12_spill] sm:$0xff] }
 0x3db   : > { %v4405_v51 = vsel %vm4404_vm1, %v5956_v62, %v4401_v46  ;;  %v9470_v62 = vld [vmem:[#allocation10_spill] sm:$0xff] }
 0x3dc   : > { %5938 = vpush %v4405_v51  ;;  %v9475_v51 = vld [vmem:[#allocation13_spill] sm:$0xff] }
 0x40a   : > { %s5937_s28 = spop %5936 }
 0x40b   : > { %v4412_v29 = vstv %s5937_s28 }
 0x40c   : > { %v4413_v17 = vmul.f32 %v7898_v55, %v4412_v29 }
 0x40d   : > { %s5939_s29 = spop %5938 }
 0x40e   : > { %v4414_v37 = vstv %s5939_s29 }
 0x40f   : > { %v4415_v10 = vmul.f32 %v4414_v37, %v7903_v21 }
 0x411   : > { %v4416_v30 = vadd.f32 %v4415_v10, %v4413_v17 }
 0x413   : > { %v4417_v16 = vmul.f32 %v4416_v30, %v4084_v41 }
 0x415   : > { %v4418_v23 = vmul.f32 %v4417_v16, %v4411_v13  ;;  %v7917_v27 = vperm.slane %v4417_v16, 0 }
 0x417   : > { %v4419_v2 = vsub.f32 %v4085_v14, %v4418_v23  ;;  %v4421_v21 = vmul.f32 %v7917_v27, %v7551_v58  ;;  %v4422_v55 = vmul.f32 %v7917_v27, %v7547_v53  ;;  %v4423_v0 = vmul.f32 %v7917_v27, %v9459_v11 }
 0x418   : > { %v4424_v57 = vmul.f32 %v7917_v27, %v9461_v60  ;;  %v4425_v54 = vmul.f32 %v7917_v27, %v9463_v1  ;;  %v4426_v53 = vmul.f32 %v7917_v27, %v9465_v9  ;;  %v4427_v13 = vmul.f32 %v7917_v27, %v9467_v33 }
 0x419   : > { %v7919_v34 = vperm.slane %v4419_v2, 0  ;;  %v4428_v52 = vmul.f32 %v7917_v27, %v9469_v8  ;;  %v4429_v45 = vmul.f32 %v7917_v27, %v9470_v62  ;;  %v4430_v38 = vmul.f32 %v7917_v27, %v7633_v4 }
 0x41a   : > { %v4431_v15 = vmul.f32 %v7917_v27, %v9472_v59  ;;  %v4432_v46 = vmul.f32 %v7917_v27, %v9474_v3  ;;  %v4433_v37 = vmul.f32 %v7917_v27, %v9475_v51  ;;  %v4434_v4 = vmul.f32 %v7917_v27, %v7677_v22 }
 0x41b   : > { %v7928_v56 = vadd.f32 %v7919_v34, %v4421_v21  ;;  %v7933_v36 = vadd.f32 %v7919_v34, %v4422_v55  ;;  %v7938_v58 = vadd.f32 %v7919_v34, %v4423_v0  ;;  %v7943_v24 = vadd.f32 %v7919_v34, %v4424_v57 }
 0x41c   : > { %v7948_v5 = vadd.f32 %v7919_v34, %v4425_v54  ;;  %v7956_v40 = vadd.f32 %v7919_v34, %v4426_v53  ;;  %v7964_v50 = vadd.f32 %v7919_v34, %v4427_v13  ;;  %v7972_v29 = vadd.f32 %v7919_v34, %v4428_v52 }
 0x41d   : > { %9460 = vst [vmem:[#allocation4_spill] sm:$0xff] %v7928_v56  ;;  %v5839_v7 = vmul.f32 -1.442695, %v7928_v56  ;;  %v5840_v39 = vmul.f32 -1.442695, %v7933_v36  ;;  %v7978_v17 = vadd.f32 %v7919_v34, %v4429_v45  ;;  %v4435_v41 = vmul.f32 %v7917_v27, %v7686_v19 }
 0x41e   : > { %9462 = vst [vmem:[#allocation5_spill] sm:$0xff] %v7933_v36  ;;  %v5841_v63 = vmul.f32 -1.442695, %v7938_v58  ;;  %v5842_v10 = vmul.f32 -1.442695, %v7943_v24  ;;  %v7984_v16 = vadd.f32 %v7919_v34, %v4430_v38  ;;  %v4436_v14 = vmul.f32 %v7917_v27, %v7704_v32 }
 0x41f   : > { %9464 = vst [vmem:[#allocation2_spill] sm:$0xff] %v7938_v58  ;;  %5957 = vpow2.f32 %v5839_v7  ;;  %v5843_v30 = vmul.f32 -1.442695, %v7948_v5  ;;  %v5844_v23 = vmul.f32 -1.442695, %v7956_v40  ;;  %v7990_v22 = vadd.f32 %v7919_v34, %v4431_v15 }
 0x420   : > { %9466 = vst [vmem:[#allocation3_spill] sm:$0xff] %v7943_v24  ;;  %5959 = vpow2.f32 %v5840_v39  ;;  %v5845_v2 = vmul.f32 -1.442695, %v7964_v50  ;;  %v4437_v21 = vmul.f32 %v7917_v27, %v7717_v48  ;;  %v7996_v19 = vadd.f32 %v7919_v34, %v4432_v46 }
 0x421   : > { %9468 = vst [vmem:[#allocation6_spill] sm:$0xff] %v7948_v5  ;;  %5961 = vpow2.f32 %v5841_v63  ;;  %v5846_v55 = vmul.f32 -1.442695, %v7972_v29  ;;  %v4438_v11 = vmul.f32 %v7917_v27, %v7729_v42  ;;  %v8002_v32 = vadd.f32 %v7919_v34, %v4433_v37 }
 0x422   : > { %9471 = vst [vmem:[#allocation7_spill] sm:$0xff] %v7956_v40  ;;  %5963 = vpow2.f32 %v5842_v10  ;;  %v5847_v0 = vmul.f32 -1.442695, %v7978_v17  ;;  %v4439_v60 = vmul.f32 %v7917_v27, %v7748_v31  ;;  %v8008_v48 = vadd.f32 %v7919_v34, %v4434_v4 }
 0x423   : > { %9473 = vst [vmem:[#allocation8_spill] sm:$0xff] %v7964_v50  ;;  %5965 = vpow2.f32 %v5843_v30  ;;  %v5848_v57 = vmul.f32 -1.442695, %v7984_v16  ;;  %v4440_v42 = vmul.f32 %v7917_v27, %v7757_v61  ;;  %v8016_v54 = vadd.f32 %v7919_v34, %v4435_v41 }
 0x424   : > { %9476 = vst [vmem:[#allocation9_spill] sm:$0xff] %v7972_v29  ;;  %5967 = vpow2.f32 %v5844_v23  ;;  %v5849_v9 = vmul.f32 -1.442695, %v7990_v22  ;;  %v4441_v31 = vmul.f32 %v7917_v27, %v7780_v44  ;;  %v8024_v33 = vadd.f32 %v7919_v34, %v4436_v14 }
 0x425   : > { %9477 = vst [vmem:[#allocation10_spill] sm:$0xff] %v7978_v17  ;;  %v8011_v1 = vpop.eup %5957  ;;  %5969 = vpow2.f32 %v5845_v2  ;;  %v5850_v13 = vmul.f32 -1.442695, %v7996_v19  ;;  %v4442_v61 = vmul.f32 %v7917_v27, %v7788_v6  ;;  %v8032_v8 = vadd.f32 %v7919_v34, %v4437_v21 }
 0x426   : > { %9478 = vst [vmem:[#allocation11_spill] sm:$0xff] %v7984_v16  ;;  %v8019_v53 = vpop.eup %5959  ;;  %5971 = vpow2.f32 %v5846_v55  ;;  %v5851_v52 = vmul.f32 -1.442695, %v8002_v32  ;;  %v4443_v44 = vmul.f32 %v7917_v27, %v7800_v49  ;;  %v8040_v45 = vadd.f32 %v7919_v34, %v4438_v11 }
 0x427   : > { %9479 = vst [vmem:[#allocation12_spill] sm:$0xff] %v7990_v22  ;;  %v8027_v7 = vpop.eup %5961  ;;  %5973 = vpow2.f32 %v5847_v0  ;;  %v5852_v39 = vmul.f32 -1.442695, %v8008_v48  ;;  %v4444_v6 = vmul.f32 %v7917_v27, %v7813_v18  ;;  %v8048_v59 = vadd.f32 %v7919_v34, %v4439_v60 }
 0x428   : > { %9480 = vst [vmem:[#allocation13_spill] sm:$0xff] %v7996_v19  ;;  %v8035_v62 = vpop.eup %5963  ;;  %5975 = vpow2.f32 %v5848_v57  ;;  %v5853_v15 = vmul.f32 -1.442695, %v8016_v54  ;;  %v4445_v49 = vmul.f32 %v7917_v27, %v7823_v26  ;;  %v8056_v3 = vadd.f32 %v7919_v34, %v4440_v42 }
 0x429   : > { %9481 = vst [vmem:[#allocation14_spill] sm:$0xff] %v8002_v32  ;;  %v8043_v38 = vpop.eup %5965  ;;  %5977 = vpow2.f32 %v5849_v9  ;;  %v5854_v46 = vmul.f32 -1.442695, %v8024_v33  ;;  %v4446_v18 = vmul.f32 %v7917_v27, %v7829_v47  ;;  %v8064_v37 = vadd.f32 %v7919_v34, %v4441_v31 }
 0x42a   : > { %9482 = vst [vmem:[#allocation15_spill] sm:$0xff] %v8008_v48  ;;  %v8051_v63 = vpop.eup %5967  ;;  %5979 = vpow2.f32 %v5850_v13  ;;  %v5855_v10 = vmul.f32 -1.442695, %v8032_v8  ;;  %v4447_v26 = vmul.f32 %v7917_v27, %v7837_v25  ;;  %v8072_v30 = vadd.f32 %v7919_v34, %v4442_v61 }
 0x42b   : > { %9483 = vst [vmem:[#allocation16_spill] sm:$0xff] %v8016_v54  ;;  %v8059_v51 = vpop.eup %5969  ;;  %5981 = vpow2.f32 %v5851_v52  ;;  %v5856_v41 = vmul.f32 -1.442695, %v8040_v45  ;;  %v4448_v47 = vmul.f32 %v7917_v27, %v7849_v43  ;;  %v8080_v14 = vadd.f32 %v7919_v34, %v4443_v44 }
 0x42c   : > { %9484 = vst [vmem:[#allocation17_spill] sm:$0xff] %v8024_v33  ;;  %v8067_v4 = vpop.eup %5971  ;;  %5983 = vpow2.f32 %v5852_v39  ;;  %v5857_v2 = vmul.f32 -1.442695, %v8048_v59  ;;  %v4449_v25 = vmul.f32 %v7917_v27, %v7857_v28  ;;  %v8088_v55 = vadd.f32 %v7919_v34, %v4444_v6 }
 0x42d   : > { %9485 = vst [vmem:[#allocation18_spill] sm:$0xff] %v8032_v8  ;;  %v8075_v23 = vpop.eup %5973  ;;  %5985 = vpow2.f32 %v5853_v15  ;;  %v5858_v11 = vmul.f32 -1.442695, %v8056_v3  ;;  %v4450_v43 = vmul.f32 %v7917_v27, %v7865_v12  ;;  %v8096_v60 = vadd.f32 %v7919_v34, %v4445_v49 }
 0x42e   : > { %9486 = vst [vmem:[#allocation19_spill] sm:$0xff] %v8040_v45  ;;  %v8083_v21 = vpop.eup %5975  ;;  %5987 = vpow2.f32 %v5854_v46  ;;  %v5859_v57 = vmul.f32 -1.442695, %v8064_v37  ;;  %v4451_v28 = vmul.f32 %v7917_v27, %v7874_v20  ;;  %v8104_v9 = vadd.f32 %v7919_v34, %v4446_v18 }
 0x42f   : > { %9487 = vst [vmem:[#allocation20_spill] sm:$0xff] %v8048_v59  ;;  %v8091_v0 = vpop.eup %5977  ;;  %5989 = vpow2.f32 %v5855_v10  ;;  %v5860_v31 = vmul.f32 -1.442695, %v8072_v30  ;;  %v4452_v12 = vmul.f32 %v7917_v27, %v7891_v35  ;;  %v8112_v61 = vadd.f32 %v7919_v34, %v4447_v26 }
 0x430   : > { %9488 = vst [vmem:[#allocation21_spill] sm:$0xff] %v8056_v3  ;;  %v8099_v42 = vpop.eup %5979  ;;  %5991 = vpow2.f32 %v5856_v41  ;;  %v5861_v52 = vmul.f32 -1.442695, %v8080_v14  ;;  %v8118_v20 = vadd.f32 %v7919_v34, %v4448_v47  ;;  %v8121_v39 = vadd.f32 %v7919_v34, %v4449_v25 }
 0x431   : > { %9489 = vst [vmem:[#allocation22_spill] sm:$0xff] %v8064_v37  ;;  %v8107_v13 = vpop.eup %5981  ;;  %5993 = vpow2.f32 %v5857_v2  ;;  %v5862_v6 = vmul.f32 -1.442695, %v8088_v55  ;;  %v8127_v35 = vadd.f32 %v7919_v34, %v4450_v43  ;;  %v5863_v27 = vmul.f32 -1.442695, %v8096_v60 }
 0x432   : > { %9490 = vst [vmem:[#allocation23_spill] sm:$0xff] %v8072_v30  ;;  %v8115_v44 = vpop.eup %5983  ;;  %5995 = vpow2.f32 %v5858_v11  ;;  %v8131_v49 = vadd.f32 1.0, %v8011_v1  ;;  %v8136_v18 = vadd.f32 %v7919_v34, %v4451_v28  ;;  %v5864_v10 = vmul.f32 -1.442695, %v8104_v9 }
 0x433   : > { %9491 = vst [vmem:[#allocation24_spill] sm:$0xff] %v8080_v14  ;;  %v8124_v15 = vpop.eup %5985  ;;  %5997 = vpow2.f32 %v5859_v57  ;;  %v8140_v26 = vadd.f32 1.0, %v8019_v53  ;;  %v8145_v47 = vadd.f32 %v7919_v34, %v4452_v12  ;;  %v5865_v1 = vmul.f32 -1.442695, %v8112_v61 }
 0x434   : > { %9492 = vst [vmem:[#allocation25_spill] sm:$0xff] %v8088_v55  ;;  %v8133_v46 = vpop.eup %5987  ;;  %5999 = vpow2.f32 %v5860_v31  ;;  %v5866_v25 = vmul.f32 -1.442695, %v8118_v20  ;;  %v5867_v11 = vmul.f32 -1.442695, %v8121_v39  ;;  %v8154_v57 = vadd.f32 1.0, %v8027_v7 }
 0x435   : > { %9493 = vst [vmem:[#allocation26_spill] sm:$0xff] %v8096_v60  ;;  %v8142_v41 = vpop.eup %5989  ;;  %6001 = vpow2.f32 %v5861_v52  ;;  %v5868_v53 = vmul.f32 -1.442695, %v8127_v35  ;;  %v4625_v34 = vand.u32 2147483648, %v8131_v49  ;;  %v5869_v31 = vmul.f32 -1.442695, %v8136_v18 }
 0x436   : > { %9494 = vst [vmem:[#allocation27_spill] sm:$0xff] %v8104_v9  ;;  %v8148_v2 = vpop.eup %5991  ;;  %6003 = vpow2.f32 %v5862_v6  ;;  %v8159_v12 = vadd.f32 1.0, %v8035_v62  ;;  %v4640_v52 = vand.u32 2147483648, %v8140_v26  ;;  %v4655_v7 = vand.u32 2147483648, %v8154_v57 }
 0x437   : > { %9495 = vst [vmem:[#allocation28_spill] sm:$0xff] %v8112_v61  ;;  %v5994_v43 = vpop.eup %5993  ;;  %6005 = vpow2.f32 %v5863_v27  ;;  %v5870_v27 = vmul.f32 -1.442695, %v8145_v47  ;;  %v8227_v37 = vadd.f32 1.0, %v8142_v41  ;;  %vm4619_vm2 = vweird.f32 %v8131_v49 }
 0x438   : > { %9496 = vst [vmem:[#allocation29_spill] sm:$0xff] %v8118_v20  ;;  %v5996_v28 = vpop.eup %5995  ;;  %6007 = vpow2.f32 %v5864_v10  ;;  %v8168_v10 = vadd.f32 1.0, %v8051_v63  ;;  %v8185_v63 = vor.u32 1.1754944e-38, %v4640_v52  ;;  %v8236_v3 = vadd.f32 1.0, %v5994_v43 }
 0x439   : > { %9497 = vst [vmem:[#allocation30_spill] sm:$0xff] %v8121_v39  ;;  %v5998_v6 = vpop.eup %5997  ;;  %6009 = vpow2.f32 %v5865_v1  ;;  %v8175_v1 = vadd.f32 1.0, %v8067_v4  ;;  %v8189_v4 = vadd.f32 1.0, %v8083_v21  ;;  %v8204_v21 = vor.u32 1.1754944e-38, %v4655_v7 }
 0x43a   : > { %9498 = vst [vmem:[#allocation31_spill] sm:$0xff] %v8127_v35  ;;  %v8164_v35 = vadd.f32 1.0, %v8043_v38  ;;  %v6000_v39 = vpop.eup %5999  ;;  %6011 = vpow2.f32 %v5866_v25  ;;  %v8178_v38 = vor.u32 1.1754944e-38, %v4625_v34  ;;  %v8182_v25 = vadd.f32 1.0, %v8075_v23 }
 0x43b   : > { %9499 = vst [vmem:[#allocation32_spill] sm:$0xff] %v8136_v18  ;;  %v8171_v18 = vadd.f32 1.0, %v8059_v51  ;;  %v6002_v20 = vpop.eup %6001  ;;  %6013 = vrcp.f32 %v8131_v49  ;;  %v4670_v51 = vand.u32 2147483648, %v8159_v12  ;;  %v8192_v34 = vadd.f32 1.0, %v8091_v0 }
 0x43c   : > { %9500 = vst [vmem:[#allocation33_spill] sm:$0xff] %v8145_v47  ;;  %v6004_v47 = vpop.eup %6003  ;;  %6015 = vrcp.f32 %v8140_v26  ;;  %v8196_v23 = vadd.f32 1.0, %v8099_v42  ;;  %v4685_v60 = vand.u32 2147483648, %v8164_v35  ;;  %v4700_v0 = vand.u32 2147483648, %v8168_v10 }
 0x43d   : > { %v6006_v62 = vpop.eup %6005  ;;  %6017 = vpow2.f32 %v5867_v11  ;;  %v8201_v11 = vadd.f32 1.0, %v8107_v13  ;;  %v8211_v42 = vor.u32 1.1754944e-38, %v4670_v51  ;;  %v8217_v13 = vadd.f32 1.0, %v8124_v15 }
 0x43e   : > { %v6008_v9 = vpop.eup %6007  ;;  %6019 = vpow2.f32 %v5868_v53  ;;  %v8208_v53 = vadd.f32 1.0, %v8115_v44  ;;  %v8220_v7 = vadd.f32 1.0, %v8133_v46  ;;  %v8229_v51 = vor.u32 1.1754944e-38, %v4685_v60 }
 0x43f   : > { %v6010_v55 = vpop.eup %6009  ;;  %6021 = vrcp.f32 %v8154_v57  ;;  %v4715_v52 = vand.u32 2147483648, %v8171_v18  ;;  %v8234_v46 = vadd.f32 1.0, %v8148_v2  ;;  %v8238_v59 = vor.u32 1.1754944e-38, %v4700_v0 }
 0x440   : > { %v6012_v61 = vpop.eup %6011  ;;  %6023 = vrcp.f32 %v8159_v12  ;;  %v8240_v45 = vadd.f32 1.0, %v5996_v28  ;;  %v4730_v41 = vand.u32 2147483648, %v8175_v1  ;;  %v8246_v33 = vadd.f32 1.0, %v5998_v6 }
 0x441   : > { %v8214_v14 = vpop.eup %6013  ;;  %6025 = vrcp.f32 %v8164_v35  ;;  %v8255_v28 = vadd.f32 1.0, %v6000_v39  ;;  %v8263_v60 = vadd.f32 1.0, %v6002_v20  ;;  %v8265_v54 = vadd.f32 1.0, %v6004_v47 }
 0x442   : > { %v8224_v44 = vpop.eup %6015  ;;  %6027 = vrcp.f32 %v8168_v10  ;;  %9501 = vst [vmem:[#allocation34_spill] sm:$0xff] %v8246_v33  ;;  %v4615_v2 = vmul.f32 %v8214_v14, %v8131_v49  ;;  %v4745_v48 = vand.u32 2147483648, %v8182_v25  ;;  %v8271_v39 = vadd.f32 1.0, %v6006_v62 }
 0x443   : > { %v6018_v15 = vpop.eup %6017  ;;  %6029 = vpow2.f32 %v5869_v31  ;;  %v4630_v43 = vmul.f32 %v8224_v44, %v8140_v26  ;;  %9502 = vst [vmem:[#allocation35_spill] sm:$0xff] %v8255_v28  ;;  %v4760_v0 = vand.u32 2147483648, %v8189_v4  ;;  %v8277_v16 = vadd.f32 1.0, %v6008_v9 }
 0x444   : > { %v6020_v30 = vpop.eup %6019  ;;  %6031 = vpow2.f32 %v5870_v27  ;;  %v8257_v27 = vor.u32 1.1754944e-38, %v4715_v52  ;;  %9503 = vst [vmem:[#allocation36_spill] sm:$0xff] %v8263_v60  ;;  %v8273_v52 = vor.u32 1.1754944e-38, %v4730_v41  ;;  %v4616_v20 = vsub.f32 1.0, %v4615_v2 }
 0x445   : > { %v8244_v8 = vpop.eup %6021  ;;  %6033 = vrcp.f32 %v8171_v18  ;;  %9504 = vst [vmem:[#allocation37_spill] sm:$0xff] %v8265_v54  ;;  %v4631_v47 = vsub.f32 1.0, %v4630_v43  ;;  %v8281_v50 = vadd.f32 1.0, %v6010_v55  ;;  %v8290_v9 = vadd.f32 1.0, %v6012_v61 }
 0x446   : > { %v8253_v31 = vpop.eup %6023  ;;  %6035 = vrcp.f32 %v8175_v1  ;;  %9505 = vst [vmem:[#allocation38_spill] sm:$0xff] %v8271_v39  ;;  %v4645_v17 = vmul.f32 %v8244_v8, %v8154_v57  ;;  %v8295_v43 = vor.u32 1.1754944e-38, %v4745_v48  ;;  %v8300_v5 = vadd.f32 1.0, %v6018_v15 }
 0x447   : > { %v8261_v6 = vpop.eup %6025  ;;  %6037 = vrcp.f32 %v8182_v25  ;;  %9506 = vst [vmem:[#allocation39_spill] sm:$0xff] %v8277_v16  ;;  %v4660_v62 = vmul.f32 %v8253_v31, %v8159_v12  ;;  %vm4634_vm3 = vweird.f32 %v8140_v26  ;;  %v8303_v19 = vor.u32 1.1754944e-38, %v4760_v0 }
 0x448   : > { %v8269_v32 = vpop.eup %6027  ;;  %9507 = vst [vmem:[#allocation40_spill] sm:$0xff] %v8281_v50  ;;  %v4675_v41 = vmul.f32 %v8261_v6, %v8164_v35  ;;  %6039 = vrcp.f32 %v8189_v4  ;;  %v8309_v58 = vadd.f32 1.0, %v6020_v30  ;;  %v4617_v48 = vmul.f32 %v8214_v14, %v4616_v20 }
 0x449   : > { %v6030_v22 = vpop.eup %6029  ;;  %9508 = vst [vmem:[#allocation41_spill] sm:$0xff] %v8290_v9  ;;  %v4690_v2 = vmul.f32 %v8269_v32, %v8168_v10  ;;  %6041 = vrcp.f32 %v8192_v34  ;;  %v4632_v36 = vmul.f32 %v8224_v44, %v4631_v47  ;;  %v4646_v56 = vsub.f32 1.0, %v4645_v17 }
 0x44a   : > { %v6032_v29 = vpop.eup %6031  ;;  %9509 = vst [vmem:[#allocation42_spill] sm:$0xff] %v8300_v5  ;;  %vm4649_vm4 = vweird.f32 %v8154_v57  ;;  %v4661_v15 = vsub.f32 1.0, %v4660_v62  ;;  %v4676_v5 = vsub.f32 1.0, %v4675_v41  ;;  %v4775_v9 = vand.u32 2147483648, %v8192_v34 }
 0x44b   : > { %v8288_v40 = vpop.eup %6033  ;;  %9510 = vst [vmem:[#allocation43_spill] sm:$0xff] %v8309_v58  ;;  %v8317_v50 = vadd.f32 1.0, %v6030_v22  ;;  %vm4664_vm5 = vweird.f32 %v8159_v12  ;;  %v4691_v30 = vsub.f32 1.0, %v4690_v2  ;;  %v8323_v17 = vadd.f32 1.0, %v6032_v29 }
 0x44c   : > { %v8298_v55 = vpop.eup %6035  ;;  %v4705_v0 = vmul.f32 %v8288_v40, %v8171_v18  ;;  %vm4620_vm6 = vweird.f32 %v8214_v14  ;;  %v9513_v62 = vand.u32 2147483647, %v8131_v49  ;;  %v9516_v22 = vand.u32 2147483647, %v8140_v26 }
 0x44d   : > { %v8307_v24 = vpop.eup %6037  ;;  %9511 = vst [vmem:[#allocation44_spill] sm:$0xff] %v8317_v50  ;;  %v4720_v20 = vmul.f32 %v8298_v55, %v8175_v1  ;;  %vm4679_vm9 = vweird.f32 %v8164_v35  ;;  %v4790_v2 = vand.u32 2147483648, %v8196_v23  ;;  %vm4635_vm10 = vweird.f32 %v8224_v44  ;;  %vm8361_vm13 = vmor %vm4619_vm2, %vm4620_vm6 }
 0x44e   : > { %9512 = vst [vmem:[#allocation45_spill] sm:$0xff] %v8323_v17  ;;  %vm8328_vm7 = vcmp.eq.f32.partialorder %v9513_v62, 8.507059e+37  ;;  %vm8334_vm8 = vcmp.eq.f32.partialorder %v9516_v22, 8.507059e+37  ;;  %v4735_v29 = vmul.f32 %v8307_v24, %v8182_v25  ;;  %v8342_v47 = vpop.eup %6039  ;;  %v4618_v62 = vadd.f32 %v8214_v14, %v4617_v48  ;;  %vm8377_vm0 = vmor %vm4634_vm3, %vm4635_vm10 }
 0x44f   : > { %v4633_v17 = vadd.f32 %v8224_v44, %v4632_v36  ;;  %v4647_v22 = vmul.f32 %v8244_v8, %v4646_v56  ;;  %vm4694_vm11 = vweird.f32 %v8168_v10  ;;  %v8349_v50 = vpop.eup %6041  ;;  %v4662_v58 = vmul.f32 %v8253_v31, %v4661_v15 }
 0x450   : > { %v4677_v16 = vmul.f32 %v8261_v6, %v4676_v5  ;;  %v4706_v39 = vsub.f32 1.0, %v4705_v0  ;;  %6043 = vrcp.f32 %v8196_v23  ;;  %vm4650_vm12 = vweird.f32 %v8244_v8 }
 0x451   : > { %v4692_v48 = vmul.f32 %v8269_v32, %v4691_v30  ;;  %v4721_v36 = vsub.f32 1.0, %v4720_v20  ;;  %6045 = vrcp.f32 %v8201_v11  ;;  %vm4665_vm14 = vweird.f32 %v8253_v31  ;;  %vm8420_vm15 = vmor %vm4649_vm4, %vm4650_vm12 }
 0x452   : > { %v4736_v5 = vsub.f32 1.0, %v4735_v29  ;;  %v4750_v15 = vmul.f32 %v8342_v47, %v8189_v4  ;;  %6047 = vrcp.f32 %v8208_v53  ;;  %v4622_v0 = vsel %vm8361_vm13, %v8214_v14, %v4618_v62  ;;  %vm8435_vm4 = vmor %vm4664_vm5, %vm4665_vm14 }
 0x453   : > { %v4648_v30 = vadd.f32 %v8244_v8, %v4647_v22  ;;  %v9523_v20 = vand.u32 2147483647, %v8154_v57  ;;  %v9526_v54 = vand.u32 2147483647, %v8159_v12  ;;  %vm4680_vm6 = vweird.f32 %v8261_v6 }
 0x454   : > { %v9529_v26 = vand.u32 2147483647, %v8164_v35  ;;  %v9532_v22 = vand.u32 2147483647, %v8168_v10  ;;  %v4678_v60 = vadd.f32 %v8261_v6, %v4677_v16  ;;  %v4707_v28 = vmul.f32 %v8288_v40, %v4706_v39  ;;  %vm8460_vm5 = vmor %vm4679_vm9, %vm4680_vm6 }
 0x455   : > { %vm8384_vm1 = vcmp.eq.f32.partialorder %v9523_v20, 8.507059e+37  ;;  %vm8390_vm2 = vcmp.eq.f32.partialorder %v9526_v54, 8.507059e+37  ;;  %v4765_v54 = vmul.f32 %v8349_v50, %v8192_v34  ;;  %v4637_v20 = vsel %vm8377_vm0, %v8224_v44, %v4633_v17 }
 0x456   : > { %vm8397_vm3 = vcmp.eq.f32.partialorder %v9529_v26, 8.507059e+37  ;;  %vm8403_vm10 = vcmp.eq.f32.partialorder %v9532_v22, 8.507059e+37  ;;  %v4663_v26 = vadd.f32 %v8253_v31, %v4662_v58  ;;  %v4693_v33 = vadd.f32 %v8269_v32, %v4692_v48  ;;  %v8429_v58 = vpop.eup %6043 }
 0x457   : > { %vm4695_vm13 = vweird.f32 %v8269_v32  ;;  %v4722_v44 = vmul.f32 %v8298_v55, %v4721_v36  ;;  %vm4739_vm0 = vweird.f32 %v8182_v25  ;;  %6049 = vrcp.f32 %v8217_v13  ;;  %v8444_v36 = vpop.eup %6045 }
 0x458   : > { %v4737_v57 = vmul.f32 %v8307_v24, %v4736_v5  ;;  %v4751_v39 = vsub.f32 1.0, %v4750_v15  ;;  %v8440_v17 = vor.u32 1.1754944e-38, %v4775_v9  ;;  %v8442_v48 = vor.u32 1.1754944e-38, %v4790_v2  ;;  %v8477_v35 = vpop.eup %6047 }
 0x459   : > { %v8449_v49 = vsel %vm8328_vm7, %v8178_v38, %v4622_v0  ;;  %v8454_v12 = vsel %vm8334_vm8, %v8185_v63, %v4637_v20  ;;  %vm4710_vm12 = vweird.f32 %v8288_v40  ;;  %v9541_v2 = vand.u32 2147483647, %v8171_v18  ;;  %vm8492_vm8 = vmor %vm4694_vm11, %vm4695_vm13 }
 0x45a   : > { %v9544_v61 = vand.u32 2147483647, %v8175_v1  ;;  %v4766_v41 = vsub.f32 1.0, %v4765_v54  ;;  %v4652_v5 = vsel %vm8420_vm15, %v8244_v8, %v4648_v30  ;;  %v4667_v15 = vsel %vm8435_vm4, %v8253_v31, %v4663_v26 }
 0x45b   : > { %vm8467_vm14 = vcmp.eq.f32.partialorder %v9541_v2, 8.507059e+37  ;;  %v4682_v0 = vsel %vm8460_vm5, %v8261_v6, %v4678_v60  ;;  %v4708_v20 = vadd.f32 %v8288_v40, %v4707_v28  ;;  %vm4754_vm9 = vweird.f32 %v8189_v4 }
 0x45c   : > { %vm8473_vm7 = vcmp.eq.f32.partialorder %v9544_v61, 8.507059e+37  ;;  %v4697_v8 = vsel %vm8492_vm8, %v8269_v32, %v4693_v33  ;;  %v4723_v31 = vadd.f32 %v8298_v55, %v4722_v44  ;;  %vm4725_vm15 = vweird.f32 %v8298_v55 }
 0x45d   : > { %vm4740_vm6 = vweird.f32 %v8307_v24  ;;  %v9549_v10 = vand.u32 2147483647, %v8182_v25  ;;  %vm4769_vm13 = vweird.f32 %v8192_v34  ;;  %v4738_v28 = vadd.f32 %v8307_v24, %v4737_v57  ;;  %v8516_v33 = vpop.eup %6049 }
 0x45e   : > { %v4752_v6 = vmul.f32 %v8342_v47, %v4751_v39  ;;  %v4780_v32 = vmul.f32 %v8429_v58, %v8196_v23  ;;  %6051 = vrcp.f32 %v8220_v7  ;;  %vm9552_vm4 = vweird.f32 %v8171_v18 }
 0x45f   : > { %vm8506_vm11 = vcmp.eq.f32.partialorder %v9549_v10, 8.507059e+37  ;;  %vm8522_vm5 = vmor %vm9552_vm4, %vm4710_vm12  ;;  %v4767_v26 = vmul.f32 %v8349_v50, %v4766_v41  ;;  %v4795_v22 = vmul.f32 %v8444_v36, %v8201_v11  ;;  %v4810_v44 = vmul.f32 %v8477_v35, %v8208_v53 }
 0x460   : > { %6053 = vrcp.f32 %v8227_v37  ;;  %v8535_v16 = vsel %vm8384_vm1, %v8204_v21, %v4652_v5  ;;  %v8540_v18 = vsel %vm8390_vm2, %v8211_v42, %v4667_v15  ;;  %v8545_v57 = vsel %vm8397_vm3, %v8229_v51, %v4682_v0 }
 0x461   : > { %v8550_v39 = vsel %vm8403_vm10, %v8238_v59, %v4697_v8  ;;  %vm9555_vm1 = vweird.f32 %v8175_v1  ;;  %v9558_v42 = vand.u32 2147483647, %v8189_v4  ;;  %v4712_v51 = vsel %vm8522_vm5, %v8288_v40, %v4708_v20  ;;  %vm8578_vm10 = vmor %vm4739_vm0, %vm4740_vm6 }
 0x462   : > { %vm8556_vm12 = vmor %vm9555_vm1, %vm4725_vm15  ;;  %vm4755_vm3 = vweird.f32 %v8342_v47  ;;  %v4805_v1 = vand.u32 2147483648, %v8201_v11  ;;  %v4753_v62 = vadd.f32 %v8342_v47, %v4752_v6  ;;  %vm4770_vm8 = vweird.f32 %v8349_v50 }
 0x463   : > { %vm8562_vm2 = vcmp.eq.f32.partialorder %v9558_v42, 8.507059e+37  ;;  %v4727_v59 = vsel %vm8556_vm12, %v8298_v55, %v4723_v31  ;;  %v9563_v40 = vand.u32 2147483647, %v8192_v34  ;;  %v4781_v56 = vsub.f32 1.0, %v4780_v32  ;;  %vm8617_vm4 = vmor %vm4754_vm9, %vm4755_vm3 }
 0x464   : > { %v4825_v9 = vmul.f32 %v8516_v33, %v8217_v13  ;;  %v4742_v25 = vsel %vm8578_vm10, %v8307_v24, %v4738_v28  ;;  %v4768_v2 = vadd.f32 %v8349_v50, %v4767_v26  ;;  %vm4784_vm0 = vweird.f32 %v8196_v23  ;;  %v8597_v5 = vpop.eup %6051 }
 0x465   : > { %vm8586_vm15 = vcmp.eq.f32.partialorder %v9563_v40, 8.507059e+37  ;;  %v4796_v61 = vsub.f32 1.0, %v4795_v22  ;;  %v4811_v41 = vsub.f32 1.0, %v4810_v44  ;;  %v8602_v15 = vsel %vm8467_vm14, %v8257_v27, %v4712_v51 }
 0x466   : > { %v8607_v0 = vsel %vm8473_vm7, %v8273_v52, %v4727_v59  ;;  %vm4799_vm6 = vweird.f32 %v8201_v11  ;;  %v4803_v24 = vand.u32 2147483647, %v8201_v11  ;;  %v8611_v54 = vpop.eup %6053  ;;  %v8621_v27 = vor.u32 1.1754944e-38, %v4805_v1  ;;  %vm8639_vm7 = vmor %vm4769_vm13, %vm4770_vm8 }
 0x467   : > { %vm4814_vm14 = vweird.f32 %v8208_v53  ;;  %v4818_v52 = vand.u32 2147483647, %v8208_v53  ;;  %v4820_v38 = vand.u32 2147483648, %v8208_v53  ;;  %6055 = vrcp.f32 %v8234_v46 }
 0x468   : > { %v8630_v63 = vsel %vm8506_vm11, %v8295_v43, %v4742_v25  ;;  %v4757_v4 = vsel %vm8617_vm4, %v8342_v47, %v4753_v62  ;;  %v4782_v31 = vmul.f32 %v8429_v58, %v4781_v56  ;;  %v4826_v10 = vsub.f32 1.0, %v4825_v9 }
 0x469   : > { %v4772_v43 = vsel %vm8639_vm7, %v8349_v50, %v4768_v2  ;;  %v4797_v60 = vmul.f32 %v8444_v36, %v4796_v61  ;;  %v4812_v28 = vmul.f32 %v8477_v35, %v4811_v41  ;;  %6057 = vrcp.f32 %v8236_v3  ;;  %v9583_v2 = vld [vmem:[#allocation34_spill] sm:$0xff] }
 0x46a   : > { %v9570_v47 = vand.u32 2147483647, %v8196_v23  ;;  %v4833_v6 = vand.u32 2147483647, %v8217_v13  ;;  %v4840_v32 = vmul.f32 %v8597_v5, %v8220_v7  ;;  %v4855_v50 = vmul.f32 %v8611_v54, %v8227_v37  ;;  %v9597_v23 = vld [vmem:[#allocation38_spill] sm:$0xff] }
 0x46b   : > { %6059 = vrcp.f32 %v8240_v45  ;;  %v8665_v30 = vsel %vm8562_vm2, %v8303_v19, %v4757_v4  ;;  %vm4785_vm11 = vweird.f32 %v8429_v58  ;;  %vm4800_vm13 = vweird.f32 %v8444_v36 }
 0x46c   : > { %vm8652_vm9 = vcmp.eq.f32.partialorder %v9570_v47, 8.507059e+37  ;;  %vm8669_vm5 = vcmp.eq.f32.partialorder %v4803_v24, 8.507059e+37  ;;  %v4835_v22 = vand.u32 2147483648, %v8217_v13  ;;  %v4783_v44 = vadd.f32 %v8429_v58, %v4782_v31  ;;  %vm8693_vm2 = vmor %vm4784_vm0, %vm4785_vm11 }
 0x46d   : > { %vm8675_vm1 = vcmp.eq.f32.partialorder %v4818_v52, 8.507059e+37  ;;  %v4821_v42 = vor.u32 1.1754944e-38, %v4820_v38  ;;  %v4827_v19 = vmul.f32 %v8516_v33, %v4826_v10  ;;  %v4850_v29 = vand.u32 2147483648, %v8220_v7  ;;  %v8681_v51 = vpop.eup %6055  ;;  %vm8708_vm8 = vmor %vm4799_vm6, %vm4800_vm13 }
 0x46e   : > { %v8686_v59 = vsel %vm8586_vm15, %v8440_v17, %v4772_v43  ;;  %v4798_v1 = vadd.f32 %v8444_v36, %v4797_v60  ;;  %v4813_v14 = vadd.f32 %v8477_v35, %v4812_v28  ;;  %vm4815_vm12 = vweird.f32 %v8477_v35  ;;  %v9586_v43 = vld [vmem:[#allocation35_spill] sm:$0xff]  ;;  %v9589_v28 = vld [vmem:[#allocation36_spill] sm:$0xff] }
 0x46f   : > { %vm4829_vm3 = vweird.f32 %v8217_v13  ;;  %vm8698_vm10 = vcmp.eq.f32.partialorder %v4833_v6, 8.507059e+37  ;;  %v4841_v17 = vsub.f32 1.0, %v4840_v32  ;;  %v4856_v55 = vsub.f32 1.0, %v4855_v50  ;;  %v8702_v56 = vpop.eup %6057  ;;  %vm8725_vm6 = vmor %vm4814_vm14, %vm4815_vm12 }
 0x470   : > { %vm4830_vm15 = vweird.f32 %v8516_v33  ;;  %v4836_v9 = vor.u32 1.1754944e-38, %v4835_v22  ;;  %vm4844_vm0 = vweird.f32 %v8220_v7  ;;  %v4848_v25 = vand.u32 2147483647, %v8220_v7 }
 0x471   : > { %6061 = vrcp.f32 %v9583_v2  ;;  %v8716_v61 = vpop.eup %6059  ;;  %v4787_v41 = vsel %vm8693_vm2, %v8429_v58, %v4783_v44  ;;  %v4828_v24 = vadd.f32 %v8516_v33, %v4827_v19  ;;  %v8730_v20 = vor.u32 1.1754944e-38, %v4850_v29  ;;  %vm8756_vm4 = vmor %vm4829_vm3, %vm4830_vm15 }
 0x472   : > { %v4870_v52 = vmul.f32 %v8681_v51, %v8234_v46  ;;  %v4802_v38 = vsel %vm8708_vm8, %v8444_v36, %v4798_v1  ;;  %v4817_v58 = vsel %vm8725_vm6, %v8477_v35, %v4813_v14  ;;  %v4863_v53 = vand.u32 2147483647, %v8227_v37  ;;  %v9594_v1 = vld [vmem:[#allocation37_spill] sm:$0xff] }
 0x473   : > { %v4865_v4 = vand.u32 2147483648, %v8227_v37  ;;  %v4842_v8 = vmul.f32 %v8597_v5, %v4841_v17  ;;  %v4857_v31 = vmul.f32 %v8611_v54, %v4856_v55  ;;  %v4885_v10 = vmul.f32 %v8702_v56, %v8236_v3 }
 0x474   : > { %6063 = vrcp.f32 %v9586_v43  ;;  %v8750_v36 = vsel %vm8652_vm9, %v8442_v48, %v4787_v41  ;;  %vm4859_vm14 = vweird.f32 %v8227_v37  ;;  %v4900_v60 = vmul.f32 %v8716_v61, %v8240_v45 }
 0x475   : > { %6065 = vrcp.f32 %v9589_v28  ;;  %v8767_v48 = vsel %vm8669_vm5, %v8621_v27, %v4802_v38  ;;  %v4832_v13 = vsel %vm8756_vm4, %v8516_v33, %v4828_v24  ;;  %vm4845_vm7 = vweird.f32 %v8597_v5 }
 0x476   : > { %vm8773_vm9 = vcmp.eq.f32.partialorder %v4848_v25, 8.507059e+37  ;;  %v4871_v34 = vsub.f32 1.0, %v4870_v52  ;;  %v8781_v32 = vsel %vm8675_vm1, %v4821_v42, %v4817_v58  ;;  %vm8783_vm11 = vcmp.eq.f32.partialorder %v4863_v53, 8.507059e+37  ;;  %vm8805_vm1 = vmor %vm4844_vm0, %vm4845_vm7 }
 0x477   : > { %v8777_v6 = vpop.eup %6061  ;;  %v4866_v50 = vor.u32 1.1754944e-38, %v4865_v4  ;;  %v4878_v33 = vand.u32 2147483647, %v8234_v46  ;;  %v4880_v26 = vand.u32 2147483648, %v8234_v46  ;;  %v4843_v22 = vadd.f32 %v8597_v5, %v4842_v8 }
 0x478   : > { %v4858_v44 = vadd.f32 %v8611_v54, %v4857_v31  ;;  %vm4860_vm13 = vweird.f32 %v8611_v54  ;;  %vm4874_vm5 = vweird.f32 %v8234_v46  ;;  %v4886_v21 = vsub.f32 1.0, %v4885_v10 }
 0x479   : > { %v8795_v42 = vsel %vm8698_vm10, %v4836_v9, %v4832_v13  ;;  %v4893_v19 = vand.u32 2147483647, %v8236_v3  ;;  %v4901_v29 = vsub.f32 1.0, %v4900_v60  ;;  %6067 = vrcp.f32 %v9594_v1  ;;  %vm8821_vm2 = vmor %vm4859_vm14, %vm4860_vm13 }
 0x47a   : > { %v8799_v14 = vpop.eup %6063  ;;  %v4872_v17 = vmul.f32 %v8681_v51, %v4871_v34  ;;  %vm4889_vm12 = vweird.f32 %v8236_v3  ;;  %v4895_v40 = vand.u32 2147483648, %v8236_v3  ;;  %v4915_v55 = vmul.f32 %v8777_v6, %v9583_v2 }
 0x47b   : > { %6069 = vrcp.f32 %v9597_v23  ;;  %v8815_v9 = vpop.eup %6065  ;;  %vm4875_vm3 = vweird.f32 %v8681_v51  ;;  %v4881_v25 = vor.u32 1.1754944e-38, %v4880_v26  ;;  %v4908_v41 = vand.u32 2147483647, %v8240_v45 }
 0x47c   : > { %v4910_v11 = vand.u32 2147483648, %v8240_v45  ;;  %v4847_v24 = vsel %vm8805_vm1, %v8597_v5, %v4843_v22  ;;  %v4862_v52 = vsel %vm8821_vm2, %v8611_v54, %v4858_v44  ;;  %vm8834_vm10 = vcmp.eq.f32.partialorder %v4878_v33, 8.507059e+37  ;;  %v9602_v5 = vld [vmem:[#allocation39_spill] sm:$0xff]  ;;  %vm8877_vm14 = vmor %vm4874_vm5, %vm4875_vm3 }
 0x47d   : > { %v4887_v38 = vmul.f32 %v8702_v56, %v4886_v21  ;;  %vm4904_vm8 = vweird.f32 %v8240_v45  ;;  %v4902_v58 = vmul.f32 %v8716_v61, %v4901_v29  ;;  %v4925_v53 = vand.u32 2147483648, %v9583_v2 }
 0x47e   : > { %v4930_v4 = vmul.f32 %v8799_v14, %v9586_v43  ;;  %6071 = vrcp.f32 %v9602_v5  ;;  %v4873_v8 = vadd.f32 %v8681_v51, %v4872_v17  ;;  %vm8846_vm15 = vcmp.eq.f32.partialorder %v4893_v19, 8.507059e+37 }
 0x47f   : > { %v4896_v31 = vor.u32 1.1754944e-38, %v4895_v40  ;;  %v4916_v10 = vsub.f32 1.0, %v4915_v55  ;;  %v4945_v35 = vmul.f32 %v8815_v9, %v9589_v28  ;;  %v8852_v60 = vpop.eup %6067  ;;  %v8857_v13 = vsel %vm8773_vm9, %v8730_v20, %v4847_v24 }
 0x480   : > { %vm4890_vm0 = vweird.f32 %v8702_v56  ;;  %vm8860_vm6 = vcmp.eq.f32.partialorder %v4908_v41, 8.507059e+37  ;;  %v4911_v33 = vor.u32 1.1754944e-38, %v4910_v11  ;;  %v8868_v22 = vsel %vm8783_vm11, %v4866_v50, %v4862_v52  ;;  %v9611_v41 = vld [vmem:[#allocation40_spill] sm:$0xff] }
 0x481   : > { %v8864_v26 = vpop.eup %6069  ;;  %v4888_v44 = vadd.f32 %v8702_v56, %v4887_v38  ;;  %vm4919_vm4 = vweird.f32 %v9583_v2  ;;  %v4923_v20 = vand.u32 2147483647, %v9583_v2  ;;  %v4903_v21 = vadd.f32 %v8716_v61, %v4902_v58  ;;  %vm8894_vm9 = vmor %vm4889_vm12, %vm4890_vm0 }
 0x482   : > { %vm4905_vm7 = vweird.f32 %v8716_v61  ;;  %v4926_v27 = vor.u32 1.1754944e-38, %v4925_v53  ;;  %v4931_v50 = vsub.f32 1.0, %v4930_v4  ;;  %v4877_v19 = vsel %vm8877_vm14, %v8681_v51, %v4873_v8 }
 0x483   : > { %v4917_v29 = vmul.f32 %v8777_v6, %v4916_v10  ;;  %v4938_v62 = vand.u32 2147483647, %v9586_v43  ;;  %v4946_v17 = vsub.f32 1.0, %v4945_v35  ;;  %v4940_v55 = vand.u32 2147483648, %v9586_v43  ;;  %vm8909_vm11 = vmor %vm4904_vm8, %vm4905_vm7 }
 0x484   : > { %v8888_v46 = vpop.eup %6071  ;;  %v4960_v51 = vmul.f32 %v8852_v60, %v9594_v1  ;;  %v4975_v7 = vmul.f32 %v8864_v26, %v9597_v23  ;;  %6073 = vrcp.f32 %v9611_v41  ;;  %v4892_v11 = vsel %vm8894_vm9, %v8702_v56, %v4888_v44 }
 0x485   : > { %vm8913_vm13 = vcmp.eq.f32.partialorder %v4923_v20, 8.507059e+37  ;;  %vm4934_vm5 = vweird.f32 %v9586_v43  ;;  %v4953_v52 = vand.u32 2147483647, %v9589_v28  ;;  %v4955_v38 = vand.u32 2147483648, %v9589_v28 }
 0x486   : > { %v8922_v58 = vsel %vm8834_vm10, %v4881_v25, %v4877_v19  ;;  %v4907_v45 = vsel %vm8909_vm11, %v8716_v61, %v4903_v21  ;;  %vm4920_vm1 = vweird.f32 %v8777_v6  ;;  %v4932_v56 = vmul.f32 %v8799_v14, %v4931_v50 }
 0x487   : > { %v4918_v53 = vadd.f32 %v8777_v6, %v4917_v29  ;;  %v4947_v4 = vmul.f32 %v8815_v9, %v4946_v17  ;;  %vm4949_vm12 = vweird.f32 %v9589_v28  ;;  %v4990_v8 = vmul.f32 %v8888_v46, %v9602_v5 }
 0x488   : > { %v8936_v25 = vsel %vm8846_vm15, %v4896_v31, %v4892_v11  ;;  %vm8938_vm2 = vcmp.eq.f32.partialorder %v4938_v62, 8.507059e+37  ;;  %v4941_v61 = vor.u32 1.1754944e-38, %v4940_v55  ;;  %v4961_v10 = vsub.f32 1.0, %v4960_v51  ;;  %vm8958_vm15 = vmor %vm4919_vm4, %vm4920_vm1  ;;  %v9622_v55 = vld [vmem:[#allocation41_spill] sm:$0xff] }
 0x489   : > { %v4976_v35 = vsub.f32 1.0, %v4975_v7  ;;  %v8944_v44 = vsel %vm8860_vm6, %v4911_v33, %v4907_v45  ;;  %vm4935_vm3 = vweird.f32 %v8799_v14  ;;  %vm8947_vm10 = vcmp.eq.f32.partialorder %v4953_v52, 8.507059e+37 }
 0x48a   : > { %v4956_v54 = vor.u32 1.1754944e-38, %v4955_v38  ;;  %vm4964_vm8 = vweird.f32 %v9594_v1  ;;  %v8952_v31 = vpop.eup %6073  ;;  %v4933_v34 = vadd.f32 %v8799_v14, %v4932_v56  ;;  %v4968_v33 = vand.u32 2147483647, %v9594_v1  ;;  %vm8979_vm6 = vmor %vm4934_vm5, %vm4935_vm3 }
 0x48b   : > { %v4970_v21 = vand.u32 2147483648, %v9594_v1  ;;  %v4983_v50 = vand.u32 2147483647, %v9597_v23  ;;  %v4922_v19 = vsel %vm8958_vm15, %v8777_v6, %v4918_v53  ;;  %v4948_v29 = vadd.f32 %v8815_v9, %v4947_v4 }
 0x48c   : > { %vm4950_vm0 = vweird.f32 %v8815_v9  ;;  %v4991_v2 = vsub.f32 1.0, %v4990_v8  ;;  %v4962_v62 = vmul.f32 %v8852_v60, %v4961_v10  ;;  %v4977_v17 = vmul.f32 %v8864_v26, %v4976_v35 }
 0x48d   : > { %v4985_v40 = vand.u32 2147483648, %v9597_v23  ;;  %6075 = vrcp.f32 %v9622_v55  ;;  %vm4979_vm4 = vweird.f32 %v9597_v23  ;;  %v4998_v6 = vand.u32 2147483647, %v9602_v5  ;;  %vm8997_vm14 = vmor %vm4949_vm12, %vm4950_vm0 }
 0x48e   : > { %v5000_v7 = vand.u32 2147483648, %v9602_v5  ;;  %v5005_v11 = vmul.f32 %v8952_v31, %v9611_v41  ;;  %v8990_v3 = vsel %vm8913_vm13, %v4926_v27, %v4922_v19  ;;  %v4937_v43 = vsel %vm8979_vm6, %v8799_v14, %v4933_v34 }
 0x48f   : > { %vm9001_vm7 = vcmp.eq.f32.partialorder %v4968_v33, 8.507059e+37  ;;  %v4971_v45 = vor.u32 1.1754944e-38, %v4970_v21  ;;  %v4952_v27 = vsel %vm8997_vm14, %v8815_v9, %v4948_v29  ;;  %vm4965_vm9 = vweird.f32 %v8852_v60  ;;  %v9635_v33 = vld [vmem:[#allocation42_spill] sm:$0xff]  ;;  %v9639_v29 = vld [vmem:[#allocation44_spill] sm:$0xff] }
 0x490   : > { %vm9009_vm11 = vcmp.eq.f32.partialorder %v4983_v50, 8.507059e+37  ;;  %v4992_v28 = vmul.f32 %v8888_v46, %v4991_v2  ;;  %vm4994_vm13 = vweird.f32 %v9602_v5  ;;  %v4963_v14 = vadd.f32 %v8852_v60, %v4962_v62  ;;  %vm9034_vm12 = vmor %vm4964_vm8, %vm4965_vm9 }
 0x491   : > { %v4978_v56 = vadd.f32 %v8864_v26, %v4977_v17  ;;  %vm4980_vm5 = vweird.f32 %v8864_v26  ;;  %v4986_v53 = vor.u32 1.1754944e-38, %v4985_v40  ;;  %v9020_v9 = vsel %vm8938_vm2, %v4941_v61, %v4937_v43  ;;  %v9640_v17 = vld [vmem:[#allocation45_spill] sm:$0xff]  ;;  %v9641_v40 = vld [vmem:[#allocation4_spill] sm:$0xff] }
 0x492   : > { %vm9022_vm1 = vcmp.eq.f32.partialorder %v4998_v6, 8.507059e+37  ;;  %v5001_v8 = vor.u32 1.1754944e-38, %v5000_v7  ;;  %v5006_v10 = vsub.f32 1.0, %v5005_v11  ;;  %v9030_v47 = vsel %vm8947_vm10, %v4956_v54, %v4952_v27  ;;  %vm9043_vm2 = vmor %vm4979_vm4, %vm4980_vm5  ;;  %v9638_v54 = vld [vmem:[#allocation43_spill] sm:$0xff]  ;;  %v9644_v7 = vld [vmem:[#allocation5_spill] sm:$0xff] }
 0x493   : > { %v9026_v35 = vpop.eup %6075  ;;  %v5013_v37 = vand.u32 2147483647, %v9611_v41  ;;  %v5015_v61 = vand.u32 2147483648, %v9611_v41  ;;  %6077 = vrcp.f32 %v9635_v33  ;;  %v4993_v20 = vadd.f32 %v8888_v46, %v4992_v28  ;;  %v9647_v27 = vld [vmem:[#allocation2_spill] sm:$0xff] }
 0x494   : > { %vm4995_vm3 = vweird.f32 %v8888_v46  ;;  %vm5009_vm10 = vweird.f32 %v9611_v41  ;;  %v5030_v1 = vand.u32 2147483648, %v9622_v55  ;;  %6079 = vrcp.f32 %v9638_v54 }
 0x495   : > { %v4967_v50 = vsel %vm9034_vm12, %v8852_v60, %v4963_v14  ;;  %v4982_v23 = vsel %vm9043_vm2, %v8864_v26, %v4978_v56  ;;  %v5045_v19 = vand.u32 2147483648, %v9635_v33  ;;  %6081 = vrcp.f32 %v9639_v29  ;;  %vm9068_vm8 = vmor %vm4994_vm13, %vm4995_vm3 }
 0x496   : > { %v5007_v2 = vmul.f32 %v8952_v31, %v5006_v10  ;;  %v5020_v62 = vmul.f32 %v9026_v35, %v9622_v55  ;;  %6083 = vrcp.f32 %v9640_v17  ;;  %v5094_v51 = vmul.f32 %v8449_v49, %v9641_v40  ;;  %v9654_v40 = vld [vmem:[#allocation9_spill] sm:$0xff] }
 0x497   : > { %vm5010_vm15 = vweird.f32 %v8952_v31  ;;  %v5016_v26 = vor.u32 1.1754944e-38, %v5015_v61  ;;  %v5028_v6 = vand.u32 2147483647, %v9622_v55  ;;  %v5095_v11 = vmul.f32 %v8454_v12, %v9644_v7  ;;  %v9649_v61 = vld [vmem:[#allocation6_spill] sm:$0xff] }
 0x498   : > { %v9079_v43 = vsel %vm9001_vm7, %v4971_v45, %v4967_v50  ;;  %v4997_v49 = vsel %vm9068_vm8, %v8888_v46, %v4993_v20  ;;  %vm9084_vm0 = vcmp.eq.f32.partialorder %v5013_v37, 8.507059e+37  ;;  %v9088_v52 = vor.u32 1.1754944e-38, %v5030_v1  ;;  %v9648_v46 = vld [vmem:[#allocation3_spill] sm:$0xff]  ;;  %vm9134_vm4 = vmor %vm5009_vm10, %vm5010_vm15  ;;  %v9655_v7 = vld [vmem:[#allocation10_spill] sm:$0xff] }
 0x499   : > { %v5096_v28 = vmul.f32 %v8535_v16, %v9647_v27  ;;  %v9092_v14 = vpop.eup %6077  ;;  %v9096_v12 = vsel %vm9009_vm11, %v4986_v53, %v4982_v23  ;;  %v5043_v38 = vand.u32 2147483647, %v9635_v33  ;;  %v9099_v45 = vor.u32 1.1754944e-38, %v5045_v19  ;;  %v9650_v53 = vld [vmem:[#allocation7_spill] sm:$0xff] }
 0x49a   : > { %v5097_v56 = vmul.f32 %v8540_v18, %v9648_v46  ;;  %v9103_v10 = vpop.eup %6079  ;;  %v5008_v34 = vadd.f32 %v8952_v31, %v5007_v2  ;;  %v5021_v37 = vsub.f32 1.0, %v5020_v62  ;;  %v5098_v16 = vmul.f32 %v8545_v57, %v9649_v61  ;;  %v9651_v2 = vld [vmem:[#allocation8_spill] sm:$0xff] }
 0x49b   : > { %v5126_v21 = vpack.c.bf16 %v5094_v51, %v5094_v51  ;;  %v9108_v20 = vpop.eup %6081  ;;  %v9117_v24 = vsel %vm9022_vm1, %v5001_v8, %v4997_v49  ;;  %v5058_v18 = vand.u32 2147483647, %v9638_v54  ;;  %v5099_v1 = vmul.f32 %v8550_v39, %v9650_v53 }
 0x49c   : > { %v5127_v50 = vpack.c.bf16 %v5095_v11, %v5095_v11  ;;  %v9122_v23 = vpop.eup %6083  ;;  %vm5025_vm6 = vweird.f32 %v9026_v35  ;;  %v5035_v57 = vmul.f32 %v9092_v14, %v9635_v33  ;;  %v5060_v19 = vand.u32 2147483648, %v9638_v54 }
 0x49d   : > { %v5100_v4 = vmul.f32 %v8602_v15, %v9651_v2  ;;  %v5128_v8 = vpack.c.bf16 %v5096_v28, %v5096_v28  ;;  %v5050_v62 = vmul.f32 %v9103_v10, %v9638_v54  ;;  %v5101_v51 = vmul.f32 %v8607_v0, %v9654_v40  ;;  %v9656_v28 = vld [vmem:[#allocation11_spill] sm:$0xff] }
 0x49e   : > { %v5129_v60 = vpack.c.bf16 %v5097_v56, %v5097_v56  ;;  %vm5158_vm14 = vcmask 125952   ;;  %v5012_v15 = vsel %vm9134_vm4, %v8952_v31, %v5008_v34  ;;  %vm5024_vm7 = vweird.f32 %v9622_v55  ;;  %v9660_v2 = vld [vmem:[#allocation15_spill] sm:$0xff] }
 0x49f   : > { %v5065_v41 = vmul.f32 %v9108_v20, %v9639_v29  ;;  %v5102_v11 = vmul.f32 %v8630_v63, %v9655_v7  ;;  %v5130_v49 = vpack.c.bf16 %v5098_v16, %v5098_v16  ;;  %5159 = vst.msk [vmem:[%s9113_s9] sm:$0xf] %vm5158_vm14, %v5126_v21  ;;  %v5022_v0 = vmul.f32 %v9026_v35, %v5021_v37  ;;  %v9657_v63 = vld [vmem:[#allocation12_spill] sm:$0xff]  ;;  %vm9222_vm3 = vmor %vm5024_vm7, %vm5025_vm6 }
 0x4a0   : > { %v5080_v27 = vmul.f32 %v9122_v23, %v9640_v17  ;;  %v5103_v31 = vmul.f32 %v8665_v30, %v9656_v28  ;;  %v5131_v46 = vpack.c.bf16 %v5099_v1, %v5099_v1  ;;  %5160 = vst.msk [vmem:[%s9113_s9 + $0x4] sm:$0xf] %vm5158_vm14, %v5127_v50  ;;  %v5036_v56 = vsub.f32 1.0, %v5035_v57  ;;  %v9658_v30 = vld [vmem:[#allocation13_spill] sm:$0xff]  ;;  %v9659_v50 = vld [vmem:[#allocation14_spill] sm:$0xff]  ;;  %v9672_v28 = vld [vmem:[#allocation19_spill] sm:$0xff] }
 0x4a1   : > { %v5073_v34 = vand.u32 2147483647, %v9639_v29  ;;  %v5104_v61 = vmul.f32 %v8686_v59, %v9657_v63  ;;  %v5132_v16 = vpack.c.bf16 %v5100_v4, %v5100_v4  ;;  %5161 = vst.msk [vmem:[%s9113_s9 + $0x8] sm:$0xf] %vm5158_vm14, %v5128_v8  ;;  %v9166_v37 = vsel %vm9084_vm0, %v5016_v26, %v5012_v15  ;;  %v9664_v15 = vld [vmem:[#allocation17_spill] sm:$0xff]  ;;  %v9675_v63 = vld [vmem:[#allocation20_spill] sm:$0xff] }
 0x4a2   : > { %v5051_v21 = vsub.f32 1.0, %v5050_v62  ;;  %v5105_v53 = vmul.f32 %v8750_v36, %v9658_v30  ;;  %v5133_v1 = vpack.c.bf16 %v5101_v51, %v5101_v51  ;;  %5162 = vst.msk [vmem:[%s9113_s9 + $0xc] sm:$0xf] %vm5158_vm14, %v5129_v60  ;;  %vm5039_vm9 = vweird.f32 %v9635_v33 }
 0x4a3   : > { %vm5040_vm11 = vweird.f32 %v9092_v14  ;;  %v5066_v59 = vsub.f32 1.0, %v5065_v41  ;;  %v5106_v57 = vmul.f32 %v8767_v48, %v9659_v50  ;;  %v5134_v5 = vpack.c.bf16 %v5102_v11, %v5102_v11  ;;  %5163 = vst.msk [vmem:[%s9113_s9 + $0x10] sm:$0xf] %vm5158_vm14, %v5130_v49  ;;  %v9661_v48 = vld [vmem:[#allocation16_spill] sm:$0xff]  ;;  %v9667_v11 = vld [vmem:[#allocation18_spill] sm:$0xff]  ;;  %v9680_v50 = vld [vmem:[#allocation23_spill] sm:$0xff] }
 0x4a4   : > { %v9179_v26 = vadd.f32 %v9026_v35, %v5022_v0  ;;  %vm5054_vm13 = vweird.f32 %v9638_v54  ;;  %v5081_v36 = vsub.f32 1.0, %v5080_v27  ;;  %v5107_v4 = vmul.f32 %v8781_v32, %v9660_v2  ;;  %5164 = vst.msk [vmem:[%s9113_s9 + $0x14] sm:$0xf] %vm5158_vm14, %v5131_v46  ;;  %vm9267_vm6 = vmor %vm5039_vm9, %vm5040_vm11 }
 0x4a5   : > { %v5135_v8 = vpack.c.bf16 %v5103_v31, %v5103_v31  ;;  %v5037_v39 = vmul.f32 %v9092_v14, %v5036_v56  ;;  %v9187_v62 = vor.u32 1.1754944e-38, %v5060_v19  ;;  %vm5069_vm5 = vweird.f32 %v9639_v29  ;;  %5165 = vst.msk [vmem:[%s9113_s9 + $0x18] sm:$0xf] %vm5158_vm14, %v5132_v16 }
 0x4a6   : > { %v5108_v40 = vmul.f32 %v8795_v42, %v9661_v48  ;;  %v5136_v51 = vpack.c.bf16 %v5104_v61, %v5104_v61  ;;  %vm9196_vm1 = vcmp.eq.f32.partialorder %v5028_v6, 8.507059e+37  ;;  %v5052_v60 = vmul.f32 %v9103_v10, %v5051_v21  ;;  %5166 = vst.msk [vmem:[%s9113_s9 + $0x1c] sm:$0xf] %vm5158_vm14, %v5133_v1  ;;  %v9676_v21 = vld [vmem:[#allocation21_spill] sm:$0xff] }
 0x4a7   : > { %v5075_v19 = vand.u32 2147483648, %v9639_v29  ;;  %v5109_v41 = vmul.f32 %v8857_v13, %v9664_v15  ;;  %v5137_v7 = vpack.c.bf16 %v5105_v53, %v5105_v53  ;;  %vm9208_vm12 = vcmp.eq.f32.partialorder %v5043_v38, 8.507059e+37  ;;  %5167 = vst.msk [vmem:[%s9113_s9 + $0x20] sm:$0xf] %vm5158_vm14, %v5134_v5  ;;  %v9691_v15 = vld [vmem:[#allocation28_spill] sm:$0xff] }
 0x4a8   : > { %v5067_v6 = vmul.f32 %v9108_v20, %v5066_v59  ;;  %vm5084_vm2 = vweird.f32 %v9640_v17  ;;  %v5110_v49 = vmul.f32 %v8868_v22, %v9667_v11  ;;  %v5138_v0 = vpack.c.bf16 %v5106_v57, %v5106_v57  ;;  %5168 = vst.msk [vmem:[%s9113_s9 + $0x24] sm:$0xf] %vm5158_vm14, %v5135_v8  ;;  %v9686_v8 = vld [vmem:[#allocation25_spill] sm:$0xff]  ;;  %v9695_v38 = vld [vmem:[#allocation32_spill] sm:$0xff] }
 0x4a9   : > { %vm9228_vm10 = vcmp.eq.f32.partialorder %v5058_v18, 8.507059e+37  ;;  %v5082_v22 = vmul.f32 %v9122_v23, %v5081_v36  ;;  %v5088_v27 = vand.u32 2147483647, %v9640_v17  ;;  %v5111_v31 = vmul.f32 %v8922_v58, %v9672_v28  ;;  %5169 = vst.msk [vmem:[%s9113_s9 + $0x28] sm:$0xf] %vm5158_vm14, %v5136_v51  ;;  %v9683_v36 = vld [vmem:[#allocation24_spill] sm:$0xff] }
 0x4aa   : > { %v5139_v46 = vpack.c.bf16 %v5107_v4, %v5107_v4  ;;  %v5027_v55 = vsel %vm9222_vm3, %v9026_v35, %v9179_v26  ;;  %v5038_v18 = vadd.f32 %v9092_v14, %v5037_v39  ;;  %vm9243_vm8 = vcmp.eq.f32.partialorder %v5073_v34, 8.507059e+37  ;;  %5170 = vst.msk [vmem:[%s9113_s9 + $0x2c] sm:$0xf] %vm5158_vm14, %v5137_v7  ;;  %v9696_v28 = vld [vmem:[#allocation33_spill] sm:$0xff] }
 0x4ab   : > { %v5112_v61 = vmul.f32 %v8936_v25, %v9675_v63  ;;  %v5140_v16 = vpack.c.bf16 %v5108_v40, %v5108_v40  ;;  %v5053_v58 = vadd.f32 %v9103_v10, %v5052_v60  ;;  %vm5055_vm15 = vweird.f32 %v9103_v10  ;;  %v9677_v25 = vld [vmem:[#allocation22_spill] sm:$0xff]  ;;  %5171 = vst.msk [vmem:[%s9113_s9 + $0x30] sm:$0xf] %vm5158_vm14, %v5138_v0 }
 0x4ac   : > { %v5113_v35 = vmul.f32 %v8944_v44, %v9676_v21  ;;  %v5141_v30 = vpack.c.bf16 %v5109_v41, %v5109_v41  ;;  %v5068_v34 = vadd.f32 %v9108_v20, %v5067_v6  ;;  %vm5070_vm0 = vweird.f32 %v9108_v20  ;;  %5172 = vst.msk [vmem:[%s9113_s9 + $0x34] sm:$0xf] %vm5158_vm14, %v5139_v46  ;;  %vm9284_vm7 = vmor %vm5054_vm13, %vm5055_vm15  ;;  %v9693_v6 = vld [vmem:[#allocation30_spill] sm:$0xff] }
 0x4ad   : > { %v5114_v53 = vmul.f32 %v8990_v3, %v9677_v25  ;;  %v5142_v1 = vpack.c.bf16 %v5110_v49, %v5110_v49  ;;  %v5083_v59 = vadd.f32 %v9122_v23, %v5082_v22  ;;  %vm5085_vm4 = vweird.f32 %v9122_v23  ;;  %5173 = vst.msk [vmem:[%s9113_s9 + $0x38] sm:$0xf] %vm5158_vm14, %v5140_v16  ;;  %vm9300_vm9 = vmor %vm5069_vm5, %vm5070_vm0  ;;  %v9694_v49 = vld [vmem:[#allocation31_spill] sm:$0xff] }
 0x4ae   : > { %v5115_v57 = vmul.f32 %v9020_v9, %v9680_v50  ;;  %v5143_v3 = vpack.c.bf16 %v5111_v31, %v5111_v31  ;;  %v5042_v5 = vsel %vm9267_vm6, %v9092_v14, %v5038_v18  ;;  %v5090_v26 = vand.u32 2147483648, %v9640_v17  ;;  %5174 = vst.msk [vmem:[%s9113_s9 + $0x3c] sm:$0xf] %vm5158_vm14, %v5141_v30  ;;  %vm9318_vm11 = vmor %vm5084_vm2, %vm5085_vm4  ;;  %v9690_v17 = vld [vmem:[#allocation27_spill] sm:$0xff] }
 0x4af   : > { %v5116_v9 = vmul.f32 %v9030_v47, %v9683_v36  ;;  %v5144_v2 = vpack.c.bf16 %v5112_v61, %v5112_v61  ;;  %v5057_v14 = vsel %vm9284_vm7, %v9103_v10, %v5053_v58  ;;  %v5076_v4 = vor.u32 1.1754944e-38, %v5075_v19  ;;  %5175 = vst.msk [vmem:[%s9113_s9 + $0x40] sm:$0xf] %vm5158_vm14, %v5142_v1 }
 0x4b0   : > { %v5117_v47 = vmul.f32 %v9079_v43, %v9686_v8  ;;  %v5145_v39 = vpack.c.bf16 %v5113_v35, %v5113_v35  ;;  %v5032_v10 = vsel %vm9196_vm1, %v9088_v52, %v5027_v55  ;;  %v5072_v29 = vsel %vm9300_vm9, %v9108_v20, %v5068_v34  ;;  %v9689_v43 = vld [vmem:[#allocation26_spill] sm:$0xff]  ;;  %5176 = vst.msk [vmem:[%s9113_s9 + $0x44] sm:$0xf] %vm5158_vm14, %v5143_v3 }
 0x4b1   : > { %v5118_v40 = vmul.f32 %v9096_v12, %v9689_v43  ;;  %v5146_v51 = vpack.c.bf16 %v5114_v53, %v5114_v53  ;;  %v5047_v52 = vsel %vm9208_vm12, %v9099_v45, %v5042_v5  ;;  %v5087_v20 = vsel %vm9318_vm11, %v9122_v23, %v5083_v59  ;;  %5177 = vst.msk [vmem:[%s9113_s9 + $0x48] sm:$0xf] %vm5158_vm14, %v5144_v2  ;;  %v9692_v23 = vld [vmem:[#allocation29_spill] sm:$0xff] }
 0x4b2   : > { %v5119_v32 = vmul.f32 %v9117_v24, %v9690_v17  ;;  %v5147_v60 = vpack.c.bf16 %v5115_v57, %v5115_v57  ;;  %v5062_v12 = vsel %vm9228_vm10, %v9187_v62, %v5057_v14  ;;  %v5091_v19 = vor.u32 1.1754944e-38, %v5090_v26  ;;  %5178 = vst.msk [vmem:[%s9113_s9 + $0x4c] sm:$0xf] %vm5158_vm14, %v5145_v39 }
 0x4b3   : > { %v5120_v45 = vmul.f32 %v9166_v37, %v9691_v15  ;;  %v5148_v41 = vpack.c.bf16 %v5116_v9, %v5116_v9  ;;  %v5077_v24 = vsel %vm9243_vm8, %v5076_v4, %v5072_v29  ;;  %vm5089_vm13 = vcmp.eq.f32.partialorder %v5088_v27, 8.507059e+37  ;;  %5179 = vst.msk [vmem:[%s9113_s9 + $0x50] sm:$0xf] %vm5158_vm14, %v5146_v51 }
 0x4b4   : > { %v5121_v7 = vmul.f32 %v5032_v10, %v9692_v23  ;;  %v5149_v42 = vpack.c.bf16 %v5117_v47, %v5117_v47  ;;  %v5092_v62 = vsel %vm5089_vm13, %v5091_v19, %v5087_v20  ;;  %v5122_v11 = vmul.f32 %v5047_v52, %v9693_v6  ;;  %5180 = vst.msk [vmem:[%s9113_s9 + $0x54] sm:$0xf] %vm5158_vm14, %v5147_v60 }
 0x4b5   : > { %v5150_v37 = vpack.c.bf16 %v5118_v40, %v5118_v40  ;;  %v5123_v0 = vmul.f32 %v5062_v12, %v9694_v49  ;;  %v5151_v13 = vpack.c.bf16 %v5119_v32, %v5119_v32  ;;  %v5124_v22 = vmul.f32 %v5077_v24, %v9695_v38  ;;  %5181 = vst.msk [vmem:[%s9113_s9 + $0x58] sm:$0xf] %vm5158_vm14, %v5148_v41 }
 0x4b6   : > { %v5152_v27 = vpack.c.bf16 %v5120_v45, %v5120_v45  ;;  %v5125_v31 = vmul.f32 %v5092_v62, %v9696_v28  ;;  %v5153_v46 = vpack.c.bf16 %v5121_v7, %v5121_v7  ;;  %5182 = vst.msk [vmem:[%s9113_s9 + $0x5c] sm:$0xf] %vm5158_vm14, %v5149_v42  ;;  %v5154_v55 = vpack.c.bf16 %v5122_v11, %v5122_v11 }
 0x4b7   : > { %5183 = vst.msk [vmem:[%s9113_s9 + $0x60] sm:$0xf] %vm5158_vm14, %v5150_v37  ;;  %v5155_v18 = vpack.c.bf16 %v5123_v0, %v5123_v0  ;;  %v5156_v56 = vpack.c.bf16 %v5124_v22, %v5124_v22 }
 0x4b8   : > { %5184 = vst.msk [vmem:[%s9113_s9 + $0x64] sm:$0xf] %vm5158_vm14, %v5151_v13  ;;  %v5157_v63 = vpack.c.bf16 %v5125_v31, %v5125_v31 }
 0x4b9   : > { %5185 = vst.msk [vmem:[%s9113_s9 + $0x68] sm:$0xf] %vm5158_vm14, %v5152_v27 }
 0x4ba   : > { %5186 = vst.msk [vmem:[%s9113_s9 + $0x6c] sm:$0xf] %vm5158_vm14, %v5153_v46 }
 0x4bb   : > { %5187 = vst.msk [vmem:[%s9113_s9 + $0x70] sm:$0xf] %vm5158_vm14, %v5154_v55 }
 0x4bc   : > { %5188 = vst.msk [vmem:[%s9113_s9 + $0x74] sm:$0xf] %vm5158_vm14, %v5155_v18 }
 0x4bd   : > { %5189 = vst.msk [vmem:[%s9113_s9 + $0x78] sm:$0xf] %vm5158_vm14, %v5156_v56 }
 0x4be   : > { %5190 = vst.msk [vmem:[%s9113_s9 + $0x7c] sm:$0xf] %vm5158_vm14, %v5157_v63 }
 0x4bf PF: > { %s13_s12 = sadd.s32 1, %s6141_s12  }
 0x4c0   : > { %p10_p4 = scmp.ge.s32.totalorder %s13_s12, 4  }
 0x4c2   :  { %12 = sbr.rel (!%p10_p4) target bundleno = 1 (0x1), region = 72 }

</bundles_post_ra>
